<compile_context>
chip_gen: v7x
topology: tpu7x:2x2x1
jax: 0.10.0
libtpu: 0.0.40
codegen_flags: <defaults>
</compile_context>

<pallas_src>
import jax
import jax.numpy as jnp
import numpy as np
from jax.experimental import pallas as pl
from jax.experimental.pallas import tpu as pltpu

LANES = 128                      # TPU lane width; kernel outputs padded to this
_TM_CONV1 = 1024                 # max rows per grid step for the conv1 kernel
_TM_MIN_CONV1 = 128
_TB_TAIL = 64                    # max batch rows per grid step for the tail kernel
_TB_MIN_TAIL = 16
_VMEM_LIMIT = 32 * 1024 * 1024   # explicit scoped-VMEM budget (safe on v5e/v6e/v7x)


def _round_up(x, m):
    return ((x + m - 1) // m) * m


def _pad_to(a, shape):
    return jnp.pad(a, [(0, s - d) for d, s in zip(a.shape, shape)])


def _pick_tile(m, t_max, t_min):
    """Row-tile size: <= t_max, multiple of 16, and aiming for >= 2 grid tiles
    so both v7x TensorCores get work (harmless on single-TC v5e/v6e)."""
    k = max(2, -(-m // t_max))          # number of tiles we aim for
    t = _round_up(-(-m // k), 16)
    return max(t_min, min(t, t_max))


# ----------------------------------------------------------------------------
# Pallas kernels
# ----------------------------------------------------------------------------
def _conv_pool_kernel(x_ref, w_ref, b_ref, o_ref, acc_ref):
    """conv-as-matmul + bias + ReLU + max-pool, pool-window axis on the grid.

    grid = (row_tiles, pool_windows); the pool axis is innermost/"arbitrary".
    x_ref:   (tm, Kp) bf16  -- im2col patches of the current pool window
    w_ref:   (Kp, 128) bf16 -- zero-padded weight matrix (resident)
    b_ref:   (1, 128) f32
    o_ref:   (tm, 128) bf16 -- lane-dense output tile (written on last window)
    acc_ref: (tm, 128) f32 VMEM scratch -- running max over pool windows
    Uses max_p(relu(x_p @ w + b)) == relu(max_p(x_p @ w) + b).
    """
    p = pl.program_id(1)

    @pl.when(p == 0)
    def _():
        acc_ref[...] = jnp.full(acc_ref.shape, -jnp.inf, acc_ref.dtype)

    acc_ref[...] = jnp.maximum(
        acc_ref[...],
        jnp.dot(x_ref[...], w_ref[...], preferred_element_type=jnp.float32))

    @pl.when(p == pl.num_programs(1) - 1)
    def _():
        o_ref[...] = jnp.maximum(acc_ref[...] + b_ref[...], 0.0).astype(o_ref.dtype)


def _tail_kernel(x_ref, w2_ref, b2_ref, w3_ref, b3_ref, w4_ref, b4_ref,
                 w5_ref, b5_ref, w6_ref, b6_ref, o_ref, acc2_ref, acc3_ref):
    """conv2+ReLU+maxpool3x3 fused with the 1x1-conv classifier head.

    grid = (batch_tiles, 9 conv2 pool windows); pool axis innermost/"arbitrary".
    x_ref:    (9, tb, K2p) bf16 -- conv2 patches of the current pool window for
                                   all 9 pooled spatial positions s of the tile
    acc2_ref: (9, tb, 128) f32  -- running max over the 9 pool windows
    acc3_ref: (tb, 512)  f32    -- conv3 output, max over the 9 positions s
    o_ref:    (tb, 128)  f32    -- logits in lanes 0..9 (written on last window)
    All weights are zero-padded so padded lanes stay exactly zero end to end.
    """
    d = pl.program_id(1)
    n_s = x_ref.shape[0]

    @pl.when(d == 0)
    def _():
        acc2_ref[...] = jnp.full(acc2_ref.shape, -jnp.inf, acc2_ref.dtype)

    w2 = w2_ref[...]                                   # hoisted out of the s loop
    for s in range(n_s):
        acc2_ref[s] = jnp.maximum(
            acc2_ref[s],
            jnp.dot(x_ref[s], w2, preferred_element_type=jnp.float32))

    @pl.when(d == pl.num_programs(1) - 1)
    def _():
        b2 = b2_ref[...]
        w3 = w3_ref[...]                               # hoisted out of the s loop
        # conv3 (1x1) + ReLU + 3x3 maxpool over the whole 3x3 map (positions s).
        for s in range(n_s):
            h2 = jnp.maximum(acc2_ref[s] + b2, 0.0).astype(jnp.bfloat16)
            m3 = jnp.dot(h2, w3, preferred_element_type=jnp.float32)
            if s == 0:
                acc3_ref[...] = m3
            else:
                acc3_ref[...] = jnp.maximum(acc3_ref[...], m3)
        h = jnp.maximum(acc3_ref[...] + b3_ref[...], 0.0).astype(jnp.bfloat16)
        h = jnp.maximum(
            jnp.dot(h, w4_ref[...], preferred_element_type=jnp.float32)
            + b4_ref[...], 0.0).astype(jnp.bfloat16)
        h = jnp.maximum(
            jnp.dot(h, w5_ref[...], preferred_element_type=jnp.float32)
            + b5_ref[...], 0.0).astype(jnp.bfloat16)
        o_ref[...] = (jnp.dot(h, w6_ref[...], preferred_element_type=jnp.float32)
                      + b6_ref[...]).astype(o_ref.dtype)


# ----------------------------------------------------------------------------
# XLA glue: im2col with the pool window broken out as a leading axis
# ----------------------------------------------------------------------------
def _conv_pool_patches(x_nhwc, kh, kw, pool, k_pad):
    """Patches for conv(kh,kw, valid, stride 1) + maxpool(pool, pool).

    Returns (pool*pool, N*Hp*Wp, k_pad) bf16 with feature order (i, j, c) and
    rows ordered (n, py, px), plus pooled spatial dims (Hp, Wp)."""
    n, h, w, c = x_nhwc.shape
    hp, wp = (h - kh + 1) // pool, (w - kw + 1) // pool
    cols = [x_nhwc[:, i:i + hp * pool, j:j + wp * pool, :]
            for i in range(kh) for j in range(kw)]
    k = c * kh * kw
    patches = jnp.concatenate(cols, axis=-1)              # (N, hp*p, wp*p, K)
    patches = patches.reshape(n, hp, pool, wp, pool, k)   # (n, py, di, px, dj, K)
    patches = patches.transpose(2, 4, 0, 1, 3, 5)         # (di, dj, n, py, px, K)
    patches = patches.reshape(pool * pool, n * hp * wp, k)
    return _pad_to(patches, (pool * pool, n * hp * wp, k_pad)), hp, wp


def _conv2_pool_patches(x_nhwc, kh, kw, pool, k_pad):
    """Like _conv_pool_patches but emits (pool*pool, Hp*Wp, N, k_pad): the
    pooled spatial positions stay a separate axis (the tail kernel max-pools
    over them again after conv3) and batch is the row axis it tiles over."""
    n, h, w, c = x_nhwc.shape
    hp, wp = (h - kh + 1) // pool, (w - kw + 1) // pool
    cols = [x_nhwc[:, i:i + hp * pool, j:j + wp * pool, :]
            for i in range(kh) for j in range(kw)]
    k = c * kh * kw
    patches = jnp.concatenate(cols, axis=-1)              # (N, hp*p, wp*p, K)
    patches = patches.reshape(n, hp, pool, wp, pool, k)   # (n, py, di, px, dj, K)
    patches = patches.transpose(2, 4, 1, 3, 0, 5)         # (di, dj, py, px, n, K)
    patches = patches.reshape(pool * pool, hp * wp, n, k)
    return _pad_to(patches, (pool * pool, hp * wp, n, k_pad)), hp, wp


# ----------------------------------------------------------------------------
# Pallas stages
# ----------------------------------------------------------------------------
def _conv1_stage(x_nhwc, wm, bm):
    """conv1 (valid, stride 1) + ReLU + maxpool2x2 in one pallas_call."""
    patches, hp, wp = _conv_pool_patches(x_nhwc, 5, 5, 2, k_pad=wm.shape[0])
    p_sz, m, kp = patches.shape
    cp = wm.shape[1]

    tm = _pick_tile(m, _TM_CONV1, _TM_MIN_CONV1)
    m_pad = _round_up(m, tm)
    patches = _pad_to(patches, (p_sz, m_pad, kp))

    out = pl.pallas_call(
        _conv_pool_kernel,
        out_shape=jax.ShapeDtypeStruct((m_pad, cp), jnp.bfloat16),
        grid=(m_pad // tm, p_sz),
        in_specs=[
            pl.BlockSpec((None, tm, kp), lambda i, p: (p, i, 0)),   # patches
            pl.BlockSpec((kp, cp), lambda i, p: (0, 0)),            # weights
            pl.BlockSpec((1, cp), lambda i, p: (0, 0)),             # bias
        ],
        out_specs=pl.BlockSpec((tm, cp), lambda i, p: (i, 0)),
        scratch_shapes=[pltpu.VMEM((tm, cp), jnp.float32)],
        compiler_params=pltpu.CompilerParams(
            dimension_semantics=("parallel", "arbitrary"),
            vmem_limit_bytes=_VMEM_LIMIT),
    )(patches, wm, bm)
    return out[:m], hp, wp


def _tail_stage(h1_nhwc, pp):
    """conv2 + ReLU + maxpool3x3 + fused 1x1-conv classifier -> (N, 10) f32."""
    n = h1_nhwc.shape[0]
    k2p = pp["w2"].shape[0]
    patches, hp, wp = _conv2_pool_patches(h1_nhwc, 5, 5, 3, k_pad=k2p)
    # conv3's 3x3 maxpool must cover the whole post-conv2 map (32x32 inputs).
    assert (hp, wp) == (3, 3), (hp, wp)
    p_sz, n_s = patches.shape[0], patches.shape[1]

    tb = _pick_tile(n, _TB_TAIL, _TB_MIN_TAIL)
    n_pad = _round_up(n, tb)
    patches = _pad_to(patches, (p_sz, n_s, n_pad, k2p))

    w2, b2 = pp["w2"], pp["b2"]
    w3, b3 = pp["w3"], pp["b3"]
    w4, b4 = pp["w4"], pp["b4"]
    w5, b5 = pp["w5"], pp["b5"]
    w6, b6 = pp["w6"], pp["b6"]

    def resident(shape):
        return pl.BlockSpec(shape, lambda b, d: (0, 0))

    out = pl.pallas_call(
        _tail_kernel,
        out_shape=jax.ShapeDtypeStruct((n_pad, LANES), jnp.float32),
        grid=(n_pad // tb, p_sz),
        in_specs=[
            pl.BlockSpec((None, n_s, tb, k2p), lambda b, d: (d, 0, b, 0)),
            resident(w2.shape), resident(b2.shape),
            resident(w3.shape), resident(b3.shape),
            resident(w4.shape), resident(b4.shape),
            resident(w5.shape), resident(b5.shape),
            resident(w6.shape), resident(b6.shape),
        ],
        out_specs=pl.BlockSpec((tb, LANES), lambda b, d: (b, 0)),
        scratch_shapes=[pltpu.VMEM((n_s, tb, LANES), jnp.float32),
                        pltpu.VMEM((tb, w3.shape[1]), jnp.float32)],
        compiler_params=pltpu.CompilerParams(
            dimension_semantics=("parallel", "arbitrary"),
            vmem_limit_bytes=_VMEM_LIMIT),
    )(patches, w2, b2, w3, b3, w4, b4, w5, b5, w6, b6)
    return out[:n, :10]


# ----------------------------------------------------------------------------
# Parameters (deterministic, PyTorch-like uniform(-1/sqrt(fan_in), 1/sqrt(fan_in)))
# ----------------------------------------------------------------------------
_CONV_SPECS = [
    (6, 3, 5, 5),
    (16, 6, 5, 5),
    (400, 16, 1, 1),
    (120, 400, 1, 1),
    (84, 120, 1, 1),
    (10, 84, 1, 1),
]


def init_params(key):
    params = []
    for spec in _CONV_SPECS:
        c_out, c_in, kh, kw = spec
        key, kw_key, kb_key = jax.random.split(key, 3)
        fan_in = c_in * kh * kw
        bound = 1.0 / (fan_in ** 0.5)
        w = jax.random.uniform(kw_key, spec, jnp.float32, -bound, bound)
        b = jax.random.uniform(kb_key, (c_out,), jnp.float32, -bound, bound)
        params.append((w, b))
    return params


def _prep_conv_weight(w, b, k_pad, c_pad):
    """torch conv weight (Cout, Cin, kh, kw) -> zero-padded (Kp, Cp) bf16 matmul
    matrix with (i, j, c) contraction ordering, plus (1, Cp) f32 bias."""
    c_out, c_in, kh, kw = w.shape
    wm = jnp.transpose(w, (0, 2, 3, 1)).reshape(c_out, kh * kw * c_in).T   # (K, Cout)
    wm = _pad_to(wm, (k_pad, c_pad)).astype(jnp.bfloat16)
    bm = _pad_to(b.reshape(1, c_out), (1, c_pad)).astype(jnp.float32)
    return wm, bm


def prepare_params(params):
    """One-time weight prep: flatten + transpose + pad K/Cout to lane multiples."""
    (w1, b1), (w2, b2), (w3, b3), (w4, b4), (w5, b5), (w6, b6) = params
    p = {}
    p["w1"], p["b1"] = _prep_conv_weight(w1, b1, 128, LANES)    # K 75  -> 128, C 6   -> 128
    p["w2"], p["b2"] = _prep_conv_weight(w2, b2, 256, LANES)    # K 150 -> 256, C 16  -> 128
    p["w3"], p["b3"] = _prep_conv_weight(w3, b3, LANES, 512)    # K 16  -> 128, C 400 -> 512
    p["w4"], p["b4"] = _prep_conv_weight(w4, b4, 512, LANES)    # K 400 -> 512, C 120 -> 128
    p["w5"], p["b5"] = _prep_conv_weight(w5, b5, LANES, LANES)  # K 120 -> 128, C 84  -> 128
    p["w6"], p["b6"] = _prep_conv_weight(w6, b6, LANES, LANES)  # K 84  -> 128, C 10  -> 128
    return p


# ----------------------------------------------------------------------------
# Forward pass (mirrors the nn.Sequential in the PyTorch module)
# ----------------------------------------------------------------------------
def lenet_forward(prepped, x):
    n, c, h, w = x.shape
    # CIFAR10-shaped input required: the conv/pool chain needs 32x32 spatial so
    # the 1x1-conv "classifier" layers see a 1x1 feature map.
    assert (c, h, w) == (3, 32, 32), (c, h, w)
    x_nhwc = jnp.transpose(x, (0, 2, 3, 1)).astype(jnp.bfloat16)    # single NCHW->NHWC

    # conv1(3->6, 5x5) + ReLU + maxpool2x2 -> rows (n,14,14), 6 real of 128 lanes
    h1, hp1, wp1 = _conv1_stage(x_nhwc, prepped["w1"], prepped["b1"])
    h1 = h1[:, :6].reshape(n, hp1, wp1, 6)                          # (N,14,14,6) bf16

    # conv2 + ReLU + maxpool3x3 + fused classifier head -> logits (N, 10) f32
    logits = _tail_stage(h1, prepped)
    # torch.squeeze(feature) where feature is (N, 10, 1, 1)
    return jnp.squeeze(logits.reshape(n, 10, 1, 1))


# ----------------------------------------------------------------------------
# Pure-JAX f32 reference (for a loose bf16-tolerant cross-check)
# ----------------------------------------------------------------------------
def _reference_forward(params, x):
    def conv(x, w, b):
        y = jax.lax.conv_general_dilated(
            x, w, (1, 1), "VALID", dimension_numbers=("NCHW", "OIHW", "NCHW"))
        return y + b.reshape(1, -1, 1, 1)

    def pool(x, k):
        return jax.lax.reduce_window(x, -jnp.inf, jax.lax.max,
                                     (1, 1, k, k), (1, 1, k, k), "VALID")

    (w1, b1), (w2, b2), (w3, b3), (w4, b4), (w5, b5), (w6, b6) = params
    x = pool(jax.nn.relu(conv(x, w1, b1)), 2)
    x = pool(jax.nn.relu(conv(x, w2, b2)), 3)
    x = pool(jax.nn.relu(conv(x, w3, b3)), 3)
    x = jax.nn.relu(conv(x, w4, b4))
    x = jax.nn.relu(conv(x, w5, b5))
    x = conv(x, w6, b6)
    return jnp.squeeze(x)


if __name__ == "__main__":
    key = jax.random.PRNGKey(0)
    k_x, k_p = jax.random.split(key)
    x = jax.random.normal(k_x, (2, 3, 32, 32), dtype=jnp.float32)
    params = init_params(k_p)
    prepped = prepare_params(params)          # one-time weight prep (pad/flatten)

    out = jax.jit(lenet_forward)(prepped, x)
    out = jax.block_until_ready(out)
    assert out.shape == (2, 10), out.shape
    assert out.dtype == jnp.float32

    # Loose cross-check against an f32 XLA reference (bf16 matmul tolerance).
    ref = jax.jit(_reference_forward)(params, x)
    ref = jax.block_until_ready(ref)
    np.testing.assert_allclose(np.asarray(out), np.asarray(ref), rtol=0.1, atol=0.1)

    print("KERNEL_OK")
</pallas_src>

<mosaic_0001>
module attributes {stable_mosaic.version = 11 : i64} {
  func.func @_conv_pool_kernel(%arg0: i32, %arg1: i32, %arg2: memref<1x208x128xbf16, #tpu.memory_space<vmem>>, %arg3: memref<128x128xbf16, #tpu.memory_space<vmem>>, %arg4: memref<1x128xf32, #tpu.memory_space<vmem>>, %arg5: memref<208x128xbf16, #tpu.memory_space<vmem>>, %arg6: memref<208x128xf32, #tpu.memory_space<vmem>>) attributes {dimension_semantics = [#tpu.dimension_semantics<parallel>, #tpu.dimension_semantics<arbitrary>], iteration_bounds = array<i64: 2, 4>, scalar_prefetch = 0 : i64, scratch_operands = 1 : i64, tpu.core_type = #tpu.core_type<tc>, window_params = [{transform_indices = @transform_0, window_bounds = array<i64: 1, 208, 128>}, {pipeline_mode = #tpu.pipeline_mode<synchronous>, transform_indices = @transform_1, window_bounds = array<i64: 128, 128>}, {pipeline_mode = #tpu.pipeline_mode<synchronous>, transform_indices = @transform_2, window_bounds = array<i64: 1, 128>}, {transform_indices = @transform_3, window_bounds = array<i64: 208, 128>}]} {
    %c0_i32 = arith.constant 0 : i32
    %0 = arith.cmpi eq, %arg1, %c0_i32 : i32
    %1 = arith.extui %0 : i1 to i32
    %c0_i32_0 = arith.constant 0 : i32
    %2 = arith.cmpi ne, %1, %c0_i32_0 : i32
    scf.if %2 {
      %cst_10 = arith.constant 0xFF800000 : f32
      %13 = vector.broadcast %cst_10 : f32 to vector<208x128xf32>
      %c0_11 = arith.constant 0 : index
      %c0_12 = arith.constant 0 : index
      %14 = vector.load %arg6[%c0_11, %c0_12] : memref<208x128xf32, #tpu.memory_space<vmem>>, vector<208x128xf32>
      tpu.vector_store %arg6[%c0_11, %c0_12], %13 {strides = array<i32>} : memref<208x128xf32, #tpu.memory_space<vmem>>, vector<208x128xf32>,
    } else {
    }
    %c0 = arith.constant 0 : index
    %c0_1 = arith.constant 0 : index
    %3 = vector.load %arg6[%c0, %c0_1] : memref<208x128xf32, #tpu.memory_space<vmem>>, vector<208x128xf32>
    %c0_2 = arith.constant 0 : index
    %c0_3 = arith.constant 0 : index
    %c0_4 = arith.constant 0 : index
    %4 = vector.load %arg2[%c0_2, %c0_3, %c0_4] : memref<1x208x128xbf16, #tpu.memory_space<vmem>>, vector<1x208x128xbf16>
    %5 = vector.shape_cast %4 : vector<1x208x128xbf16> to vector<208x128xbf16>
    %c0_5 = arith.constant 0 : index
    %c0_6 = arith.constant 0 : index
    %6 = vector.load %arg3[%c0_5, %c0_6] : memref<128x128xbf16, #tpu.memory_space<vmem>>, vector<128x128xbf16>
    %cst = arith.constant dense<0.000000e+00> : vector<208x128xf32>
    %7 = tpu.matmul %5, %6, %cst {dimension_numbers = #tpu.dot_dimension_numbers<[1], [0], [0], [1], [0, 0, 1, 1], [], []>} : vector<208x128xbf16>, vector<128x128xbf16>, vector<208x128xf32> -> vector<208x128xf32>
    %8 = arith.maximumf %3, %7 : vector<208x128xf32>
    %c0_7 = arith.constant 0 : index
    %c0_8 = arith.constant 0 : index
    %9 = vector.load %arg6[%c0_7, %c0_8] : memref<208x128xf32, #tpu.memory_space<vmem>>, vector<208x128xf32>
    tpu.vector_store %arg6[%c0_7, %c0_8], %8 {strides = array<i32>} : memref<208x128xf32, #tpu.memory_space<vmem>>, vector<208x128xf32>,
    %c3_i32 = arith.constant 3 : i32
    %10 = arith.cmpi eq, %arg1, %c3_i32 : i32
    %11 = arith.extui %10 : i1 to i32
    %c0_i32_9 = arith.constant 0 : i32
    %12 = arith.cmpi ne, %11, %c0_i32_9 : i32
    scf.if %12 {
      %c0_10 = arith.constant 0 : index
      %c0_11 = arith.constant 0 : index
      %13 = vector.load %arg6[%c0_10, %c0_11] : memref<208x128xf32, #tpu.memory_space<vmem>>, vector<208x128xf32>
      %c0_12 = arith.constant 0 : index
      %c0_13 = arith.constant 0 : index
      %14 = vector.load %arg4[%c0_12, %c0_13] : memref<1x128xf32, #tpu.memory_space<vmem>>, vector<1x128xf32>
      %15 = vector.broadcast %14 : vector<1x128xf32> to vector<208x128xf32>
      %16 = arith.addf %13, %15 : vector<208x128xf32>
      %cst_14 = arith.constant 0.000000e+00 : f32
      %17 = vector.broadcast %cst_14 : f32 to vector<208x128xf32>
      %18 = arith.maximumf %16, %17 : vector<208x128xf32>
      %19 = arith.truncf %18 : vector<208x128xf32> to vector<208x128xbf16>
      %c0_15 = arith.constant 0 : index
      %c0_16 = arith.constant 0 : index
      %20 = vector.load %arg5[%c0_15, %c0_16] : memref<208x128xbf16, #tpu.memory_space<vmem>>, vector<208x128xbf16>
      tpu.vector_store %arg5[%c0_15, %c0_16], %19 {strides = array<i32>} : memref<208x128xbf16, #tpu.memory_space<vmem>>, vector<208x128xbf16>,
    } else {
    }
    return
  }
  func.func @transform_0(%arg0: i32, %arg1: i32) -> (i32, i32, i32) {
    %c0_i32 = arith.constant 0 : i32
    %c0_i32_0 = arith.constant 0 : i32
    return %arg1, %arg0, %c0_i32 : i32, i32, i32
  }
  func.func @transform_1(%arg0: i32, %arg1: i32) -> (i32, i32) {
    %c0_i32 = arith.constant 0 : i32
    %c0_i32_0 = arith.constant 0 : i32
    %c0_i32_1 = arith.constant 0 : i32
    return %c0_i32, %c0_i32_0 : i32, i32
  }
  func.func @transform_2(%arg0: i32, %arg1: i32) -> (i32, i32) {
    %c0_i32 = arith.constant 0 : i32
    %c0_i32_0 = arith.constant 0 : i32
    %c0_i32_1 = arith.constant 0 : i32
    return %c0_i32, %c0_i32_0 : i32, i32
  }
  func.func @transform_3(%arg0: i32, %arg1: i32) -> (i32, i32) {
    %c0_i32 = arith.constant 0 : i32
    %c0_i32_0 = arith.constant 0 : i32
    return %arg0, %c0_i32 : i32, i32
  }
}

module attributes {stable_mosaic.version = 11 : i64} {
  func.func @_tail_kernel(%arg0: i32, %arg1: i32, %arg2: memref<1x9x16x256xbf16, #tpu.memory_space<vmem>>, %arg3: memref<256x128xbf16, #tpu.memory_space<vmem>>, %arg4: memref<1x128xf32, #tpu.memory_space<vmem>>, %arg5: memref<128x512xbf16, #tpu.memory_space<vmem>>, %arg6: memref<1x512xf32, #tpu.memory_space<vmem>>, %arg7: memref<512x128xbf16, #tpu.memory_space<vmem>>, %arg8: memref<1x128xf32, #tpu.memory_space<vmem>>, %arg9: memref<128x128xbf16, #tpu.memory_space<vmem>>, %arg10: memref<1x128xf32, #tpu.memory_space<vmem>>, %arg11: memref<128x128xbf16, #tpu.memory_space<vmem>>, %arg12: memref<1x128xf32, #tpu.memory_space<vmem>>, %arg13: memref<16x128xf32, #tpu.memory_space<vmem>>, %arg14: memref<9x16x128xf32, #tpu.memory_space<vmem>>, %arg15: memref<16x512xf32, #tpu.memory_space<vmem>>) attributes {dimension_semantics = [#tpu.dimension_semantics<parallel>, #tpu.dimension_semantics<arbitrary>], iteration_bounds = array<i64: 1, 9>, scalar_prefetch = 0 : i64, scratch_operands = 2 : i64, tpu.core_type = #tpu.core_type<tc>, window_params = [{transform_indices = @transform_0, window_bounds = array<i64: 1, 9, 16, 256>}, {pipeline_mode = #tpu.pipeline_mode<synchronous>, transform_indices = @transform_1, window_bounds = array<i64: 256, 128>}, {pipeline_mode = #tpu.pipeline_mode<synchronous>, transform_indices = @transform_2, window_bounds = array<i64: 1, 128>}, {pipeline_mode = #tpu.pipeline_mode<synchronous>, transform_indices = @transform_3, window_bounds = array<i64: 128, 512>}, {pipeline_mode = #tpu.pipeline_mode<synchronous>, transform_indices = @transform_4, window_bounds = array<i64: 1, 512>}, {pipeline_mode = #tpu.pipeline_mode<synchronous>, transform_indices = @transform_5, window_bounds = array<i64: 512, 128>}, {pipeline_mode = #tpu.pipeline_mode<synchronous>, transform_indices = @transform_6, window_bounds = array<i64: 1, 128>}, {pipeline_mode = #tpu.pipeline_mode<synchronous>, transform_indices = @transform_7, window_bounds = array<i64: 128, 128>}, {pipeline_mode = #tpu.pipeline_mode<synchronous>, transform_indices = @transform_8, window_bounds = array<i64: 1, 128>}, {pipeline_mode = #tpu.pipeline_mode<synchronous>, transform_indices = @transform_9, window_bounds = array<i64: 128, 128>}, {pipeline_mode = #tpu.pipeline_mode<synchronous>, transform_indices = @transform_10, window_bounds = array<i64: 1, 128>}, {transform_indices = @transform_11, window_bounds = array<i64: 16, 128>}]} {
    %c0_i32 = arith.constant 0 : i32
    %0 = arith.cmpi eq, %arg1, %c0_i32 : i32
    %1 = arith.extui %0 : i1 to i32
    %c0_i32_0 = arith.constant 0 : i32
    %2 = arith.cmpi ne, %1, %c0_i32_0 : i32
    scf.if %2 {
      %cst_93 = arith.constant 0xFF800000 : f32
      %88 = vector.broadcast %cst_93 : f32 to vector<9x16x128xf32>
      %c0_94 = arith.constant 0 : index
      %c0_95 = arith.constant 0 : index
      %c0_96 = arith.constant 0 : index
      %89 = vector.load %arg14[%c0_94, %c0_95, %c0_96] : memref<9x16x128xf32, #tpu.memory_space<vmem>>, vector<9x16x128xf32>
      tpu.vector_store %arg14[%c0_94, %c0_95, %c0_96], %88 {strides = array<i32>} : memref<9x16x128xf32, #tpu.memory_space<vmem>>, vector<9x16x128xf32>,
    } else {
    }
    %c0 = arith.constant 0 : index
    %c0_1 = arith.constant 0 : index
    %3 = vector.load %arg3[%c0, %c0_1] : memref<256x128xbf16, #tpu.memory_space<vmem>>, vector<256x128xbf16>
    %c0_2 = arith.constant 0 : index
    %c0_3 = arith.constant 0 : index
    %c0_4 = arith.constant 0 : index
    %4 = vector.load %arg14[%c0_2, %c0_3, %c0_4] : memref<9x16x128xf32, #tpu.memory_space<vmem>>, vector<1x16x128xf32>
    %5 = vector.shape_cast %4 : vector<1x16x128xf32> to vector<16x128xf32>
    %c0_5 = arith.constant 0 : index
    %c0_6 = arith.constant 0 : index
    %c0_7 = arith.constant 0 : index
    %c0_8 = arith.constant 0 : index
    %6 = vector.load %arg2[%c0_5, %c0_6, %c0_7, %c0_8] : memref<1x9x16x256xbf16, #tpu.memory_space<vmem>>, vector<1x1x16x256xbf16>
    %7 = vector.shape_cast %6 : vector<1x1x16x256xbf16> to vector<16x256xbf16>
    %cst = arith.constant dense<0.000000e+00> : vector<16x128xf32>
    %8 = tpu.matmul %7, %3, %cst {dimension_numbers = #tpu.dot_dimension_numbers<[1], [0], [0], [1], [0, 0, 1, 1], [], []>} : vector<16x256xbf16>, vector<256x128xbf16>, vector<16x128xf32> -> vector<16x128xf32>
    %9 = arith.maximumf %5, %8 : vector<16x128xf32>
    %c0_9 = arith.constant 0 : index
    %c0_10 = arith.constant 0 : index
    %c0_11 = arith.constant 0 : index
    %10 = vector.load %arg14[%c0_9, %c0_10, %c0_11] : memref<9x16x128xf32, #tpu.memory_space<vmem>>, vector<1x16x128xf32>
    %11 = vector.shape_cast %10 : vector<1x16x128xf32> to vector<16x128xf32>
    %12 = vector.shape_cast %9 : vector<16x128xf32> to vector<1x16x128xf32>
    tpu.vector_store %arg14[%c0_9, %c0_10, %c0_11], %12 {strides = array<i32>} : memref<9x16x128xf32, #tpu.memory_space<vmem>>, vector<1x16x128xf32>,
    %c1 = arith.constant 1 : index
    %c0_12 = arith.constant 0 : index
    %c0_13 = arith.constant 0 : index
    %13 = vector.load %arg14[%c1, %c0_12, %c0_13] : memref<9x16x128xf32, #tpu.memory_space<vmem>>, vector<1x16x128xf32>
    %14 = vector.shape_cast %13 : vector<1x16x128xf32> to vector<16x128xf32>
    %c0_14 = arith.constant 0 : index
    %c1_15 = arith.constant 1 : index
    %c0_16 = arith.constant 0 : index
    %c0_17 = arith.constant 0 : index
    %15 = vector.load %arg2[%c0_14, %c1_15, %c0_16, %c0_17] : memref<1x9x16x256xbf16, #tpu.memory_space<vmem>>, vector<1x1x16x256xbf16>
    %16 = vector.shape_cast %15 : vector<1x1x16x256xbf16> to vector<16x256xbf16>
    %cst_18 = arith.constant dense<0.000000e+00> : vector<16x128xf32>
    %17 = tpu.matmul %16, %3, %cst_18 {dimension_numbers = #tpu.dot_dimension_numbers<[1], [0], [0], [1], [0, 0, 1, 1], [], []>} : vector<16x256xbf16>, vector<256x128xbf16>, vector<16x128xf32> -> vector<16x128xf32>
    %18 = arith.maximumf %14, %17 : vector<16x128xf32>
    %c1_19 = arith.constant 1 : index
    %c0_20 = arith.constant 0 : index
    %c0_21 = arith.constant 0 : index
    %19 = vector.load %arg14[%c1_19, %c0_20, %c0_21] : memref<9x16x128xf32, #tpu.memory_space<vmem>>, vector<1x16x128xf32>
    %20 = vector.shape_cast %19 : vector<1x16x128xf32> to vector<16x128xf32>
    %21 = vector.shape_cast %18 : vector<16x128xf32> to vector<1x16x128xf32>
    tpu.vector_store %arg14[%c1_19, %c0_20, %c0_21], %21 {strides = array<i32>} : memref<9x16x128xf32, #tpu.memory_space<vmem>>, vector<1x16x128xf32>,
    %c2 = arith.constant 2 : index
    %c0_22 = arith.constant 0 : index
    %c0_23 = arith.constant 0 : index
    %22 = vector.load %arg14[%c2, %c0_22, %c0_23] : memref<9x16x128xf32, #tpu.memory_space<vmem>>, vector<1x16x128xf32>
    %23 = vector.shape_cast %22 : vector<1x16x128xf32> to vector<16x128xf32>
    %c0_24 = arith.constant 0 : index
    %c2_25 = arith.constant 2 : index
    %c0_26 = arith.constant 0 : index
    %c0_27 = arith.constant 0 : index
    %24 = vector.load %arg2[%c0_24, %c2_25, %c0_26, %c0_27] : memref<1x9x16x256xbf16, #tpu.memory_space<vmem>>, vector<1x1x16x256xbf16>
    %25 = vector.shape_cast %24 : vector<1x1x16x256xbf16> to vector<16x256xbf16>
    %cst_28 = arith.constant dense<0.000000e+00> : vector<16x128xf32>
    %26 = tpu.matmul %25, %3, %cst_28 {dimension_numbers = #tpu.dot_dimension_numbers<[1], [0], [0], [1], [0, 0, 1, 1], [], []>} : vector<16x256xbf16>, vector<256x128xbf16>, vector<16x128xf32> -> vector<16x128xf32>
    %27 = arith.maximumf %23, %26 : vector<16x128xf32>
    %c2_29 = arith.constant 2 : index
    %c0_30 = arith.constant 0 : index
    %c0_31 = arith.constant 0 : index
    %28 = vector.load %arg14[%c2_29, %c0_30, %c0_31] : memref<9x16x128xf32, #tpu.memory_space<vmem>>, vector<1x16x128xf32>
    %29 = vector.shape_cast %28 : vector<1x16x128xf32> to vector<16x128xf32>
    %30 = vector.shape_cast %27 : vector<16x128xf32> to vector<1x16x128xf32>
    tpu.vector_store %arg14[%c2_29, %c0_30, %c0_31], %30 {strides = array<i32>} : memref<9x16x128xf32, #tpu.memory_space<vmem>>, vector<1x16x128xf32>,
    %c3 = arith.constant 3 : index
    %c0_32 = arith.constant 0 : index
    %c0_33 = arith.constant 0 : index
    %31 = vector.load %arg14[%c3, %c0_32, %c0_33] : memref<9x16x128xf32, #tpu.memory_space<vmem>>, vector<1x16x128xf32>
    %32 = vector.shape_cast %31 : vector<1x16x128xf32> to vector<16x128xf32>
    %c0_34 = arith.constant 0 : index
    %c3_35 = arith.constant 3 : index
    %c0_36 = arith.constant 0 : index
    %c0_37 = arith.constant 0 : index
    %33 = vector.load %arg2[%c0_34, %c3_35, %c0_36, %c0_37] : memref<1x9x16x256xbf16, #tpu.memory_space<vmem>>, vector<1x1x16x256xbf16>
    %34 = vector.shape_cast %33 : vector<1x1x16x256xbf16> to vector<16x256xbf16>
    %cst_38 = arith.constant dense<0.000000e+00> : vector<16x128xf32>
    %35 = tpu.matmul %34, %3, %cst_38 {dimension_numbers = #tpu.dot_dimension_numbers<[1], [0], [0], [1], [0, 0, 1, 1], [], []>} : vector<16x256xbf16>, vector<256x128xbf16>, vector<16x128xf32> -> vector<16x128xf32>
    %36 = arith.maximumf %32, %35 : vector<16x128xf32>
    %c3_39 = arith.constant 3 : index
    %c0_40 = arith.constant 0 : index
    %c0_41 = arith.constant 0 : index
    %37 = vector.load %arg14[%c3_39, %c0_40, %c0_41] : memref<9x16x128xf32, #tpu.memory_space<vmem>>, vector<1x16x128xf32>
    %38 = vector.shape_cast %37 : vector<1x16x128xf32> to vector<16x128xf32>
    %39 = vector.shape_cast %36 : vector<16x128xf32> to vector<1x16x128xf32>
    tpu.vector_store %arg14[%c3_39, %c0_40, %c0_41], %39 {strides = array<i32>} : memref<9x16x128xf32, #tpu.memory_space<vmem>>, vector<1x16x128xf32>,
    %c4 = arith.constant 4 : index
    %c0_42 = arith.constant 0 : index
    %c0_43 = arith.constant 0 : index
    %40 = vector.load %arg14[%c4, %c0_42, %c0_43] : memref<9x16x128xf32, #tpu.memory_space<vmem>>, vector<1x16x128xf32>
    %41 = vector.shape_cast %40 : vector<1x16x128xf32> to vector<16x128xf32>
    %c0_44 = arith.constant 0 : index
    %c4_45 = arith.constant 4 : index
    %c0_46 = arith.constant 0 : index
    %c0_47 = arith.constant 0 : index
    %42 = vector.load %arg2[%c0_44, %c4_45, %c0_46, %c0_47] : memref<1x9x16x256xbf16, #tpu.memory_space<vmem>>, vector<1x1x16x256xbf16>
    %43 = vector.shape_cast %42 : vector<1x1x16x256xbf16> to vector<16x256xbf16>
    %cst_48 = arith.constant dense<0.000000e+00> : vector<16x128xf32>
    %44 = tpu.matmul %43, %3, %cst_48 {dimension_numbers = #tpu.dot_dimension_numbers<[1], [0], [0], [1], [0, 0, 1, 1], [], []>} : vector<16x256xbf16>, vector<256x128xbf16>, vector<16x128xf32> -> vector<16x128xf32>
    %45 = arith.maximumf %41, %44 : vector<16x128xf32>
    %c4_49 = arith.constant 4 : index
    %c0_50 = arith.constant 0 : index
    %c0_51 = arith.constant 0 : index
    %46 = vector.load %arg14[%c4_49, %c0_50, %c0_51] : memref<9x16x128xf32, #tpu.memory_space<vmem>>, vector<1x16x128xf32>
    %47 = vector.shape_cast %46 : vector<1x16x128xf32> to vector<16x128xf32>
    %48 = vector.shape_cast %45 : vector<16x128xf32> to vector<1x16x128xf32>
    tpu.vector_store %arg14[%c4_49, %c0_50, %c0_51], %48 {strides = array<i32>} : memref<9x16x128xf32, #tpu.memory_space<vmem>>, vector<1x16x128xf32>,
    %c5 = arith.constant 5 : index
    %c0_52 = arith.constant 0 : index
    %c0_53 = arith.constant 0 : index
    %49 = vector.load %arg14[%c5, %c0_52, %c0_53] : memref<9x16x128xf32, #tpu.memory_space<vmem>>, vector<1x16x128xf32>
    %50 = vector.shape_cast %49 : vector<1x16x128xf32> to vector<16x128xf32>
    %c0_54 = arith.constant 0 : index
    %c5_55 = arith.constant 5 : index
    %c0_56 = arith.constant 0 : index
    %c0_57 = arith.constant 0 : index
    %51 = vector.load %arg2[%c0_54, %c5_55, %c0_56, %c0_57] : memref<1x9x16x256xbf16, #tpu.memory_space<vmem>>, vector<1x1x16x256xbf16>
    %52 = vector.shape_cast %51 : vector<1x1x16x256xbf16> to vector<16x256xbf16>
    %cst_58 = arith.constant dense<0.000000e+00> : vector<16x128xf32>
    %53 = tpu.matmul %52, %3, %cst_58 {dimension_numbers = #tpu.dot_dimension_numbers<[1], [0], [0], [1], [0, 0, 1, 1], [], []>} : vector<16x256xbf16>, vector<256x128xbf16>, vector<16x128xf32> -> vector<16x128xf32>
    %54 = arith.maximumf %50, %53 : vector<16x128xf32>
    %c5_59 = arith.constant 5 : index
    %c0_60 = arith.constant 0 : index
    %c0_61 = arith.constant 0 : index
    %55 = vector.load %arg14[%c5_59, %c0_60, %c0_61] : memref<9x16x128xf32, #tpu.memory_space<vmem>>, vector<1x16x128xf32>
    %56 = vector.shape_cast %55 : vector<1x16x128xf32> to vector<16x128xf32>
    %57 = vector.shape_cast %54 : vector<16x128xf32> to vector<1x16x128xf32>
    tpu.vector_store %arg14[%c5_59, %c0_60, %c0_61], %57 {strides = array<i32>} : memref<9x16x128xf32, #tpu.memory_space<vmem>>, vector<1x16x128xf32>,
    %c6 = arith.constant 6 : index
    %c0_62 = arith.constant 0 : index
    %c0_63 = arith.constant 0 : index
    %58 = vector.load %arg14[%c6, %c0_62, %c0_63] : memref<9x16x128xf32, #tpu.memory_space<vmem>>, vector<1x16x128xf32>
    %59 = vector.shape_cast %58 : vector<1x16x128xf32> to vector<16x128xf32>
    %c0_64 = arith.constant 0 : index
    %c6_65 = arith.constant 6 : index
    %c0_66 = arith.constant 0 : index
    %c0_67 = arith.constant 0 : index
    %60 = vector.load %arg2[%c0_64, %c6_65, %c0_66, %c0_67] : memref<1x9x16x256xbf16, #tpu.memory_space<vmem>>, vector<1x1x16x256xbf16>
    %61 = vector.shape_cast %60 : vector<1x1x16x256xbf16> to vector<16x256xbf16>
    %cst_68 = arith.constant dense<0.000000e+00> : vector<16x128xf32>
    %62 = tpu.matmul %61, %3, %cst_68 {dimension_numbers = #tpu.dot_dimension_numbers<[1], [0], [0], [1], [0, 0, 1, 1], [], []>} : vector<16x256xbf16>, vector<256x128xbf16>, vector<16x128xf32> -> vector<16x128xf32>
    %63 = arith.maximumf %59, %62 : vector<16x128xf32>
    %c6_69 = arith.constant 6 : index
    %c0_70 = arith.constant 0 : index
    %c0_71 = arith.constant 0 : index
    %64 = vector.load %arg14[%c6_69, %c0_70, %c0_71] : memref<9x16x128xf32, #tpu.memory_space<vmem>>, vector<1x16x128xf32>
    %65 = vector.shape_cast %64 : vector<1x16x128xf32> to vector<16x128xf32>
    %66 = vector.shape_cast %63 : vector<16x128xf32> to vector<1x16x128xf32>
    tpu.vector_store %arg14[%c6_69, %c0_70, %c0_71], %66 {strides = array<i32>} : memref<9x16x128xf32, #tpu.memory_space<vmem>>, vector<1x16x128xf32>,
    %c7 = arith.constant 7 : index
    %c0_72 = arith.constant 0 : index
    %c0_73 = arith.constant 0 : index
    %67 = vector.load %arg14[%c7, %c0_72, %c0_73] : memref<9x16x128xf32, #tpu.memory_space<vmem>>, vector<1x16x128xf32>
    %68 = vector.shape_cast %67 : vector<1x16x128xf32> to vector<16x128xf32>
    %c0_74 = arith.constant 0 : index
    %c7_75 = arith.constant 7 : index
    %c0_76 = arith.constant 0 : index
    %c0_77 = arith.constant 0 : index
    %69 = vector.load %arg2[%c0_74, %c7_75, %c0_76, %c0_77] : memref<1x9x16x256xbf16, #tpu.memory_space<vmem>>, vector<1x1x16x256xbf16>
    %70 = vector.shape_cast %69 : vector<1x1x16x256xbf16> to vector<16x256xbf16>
    %cst_78 = arith.constant dense<0.000000e+00> : vector<16x128xf32>
    %71 = tpu.matmul %70, %3, %cst_78 {dimension_numbers = #tpu.dot_dimension_numbers<[1], [0], [0], [1], [0, 0, 1, 1], [], []>} : vector<16x256xbf16>, vector<256x128xbf16>, vector<16x128xf32> -> vector<16x128xf32>
    %72 = arith.maximumf %68, %71 : vector<16x128xf32>
    %c7_79 = arith.constant 7 : index
    %c0_80 = arith.constant 0 : index
    %c0_81 = arith.constant 0 : index
    %73 = vector.load %arg14[%c7_79, %c0_80, %c0_81] : memref<9x16x128xf32, #tpu.memory_space<vmem>>, vector<1x16x128xf32>
    %74 = vector.shape_cast %73 : vector<1x16x128xf32> to vector<16x128xf32>
    %75 = vector.shape_cast %72 : vector<16x128xf32> to vector<1x16x128xf32>
    tpu.vector_store %arg14[%c7_79, %c0_80, %c0_81], %75 {strides = array<i32>} : memref<9x16x128xf32, #tpu.memory_space<vmem>>, vector<1x16x128xf32>,
    %c8 = arith.constant 8 : index
    %c0_82 = arith.constant 0 : index
    %c0_83 = arith.constant 0 : index
    %76 = vector.load %arg14[%c8, %c0_82, %c0_83] : memref<9x16x128xf32, #tpu.memory_space<vmem>>, vector<1x16x128xf32>
    %77 = vector.shape_cast %76 : vector<1x16x128xf32> to vector<16x128xf32>
    %c0_84 = arith.constant 0 : index
    %c8_85 = arith.constant 8 : index
    %c0_86 = arith.constant 0 : index
    %c0_87 = arith.constant 0 : index
    %78 = vector.load %arg2[%c0_84, %c8_85, %c0_86, %c0_87] : memref<1x9x16x256xbf16, #tpu.memory_space<vmem>>, vector<1x1x16x256xbf16>
    %79 = vector.shape_cast %78 : vector<1x1x16x256xbf16> to vector<16x256xbf16>
    %cst_88 = arith.constant dense<0.000000e+00> : vector<16x128xf32>
    %80 = tpu.matmul %79, %3, %cst_88 {dimension_numbers = #tpu.dot_dimension_numbers<[1], [0], [0], [1], [0, 0, 1, 1], [], []>} : vector<16x256xbf16>, vector<256x128xbf16>, vector<16x128xf32> -> vector<16x128xf32>
    %81 = arith.maximumf %77, %80 : vector<16x128xf32>
    %c8_89 = arith.constant 8 : index
    %c0_90 = arith.constant 0 : index
    %c0_91 = arith.constant 0 : index
    %82 = vector.load %arg14[%c8_89, %c0_90, %c0_91] : memref<9x16x128xf32, #tpu.memory_space<vmem>>, vector<1x16x128xf32>
    %83 = vector.shape_cast %82 : vector<1x16x128xf32> to vector<16x128xf32>
    %84 = vector.shape_cast %81 : vector<16x128xf32> to vector<1x16x128xf32>
    tpu.vector_store %arg14[%c8_89, %c0_90, %c0_91], %84 {strides = array<i32>} : memref<9x16x128xf32, #tpu.memory_space<vmem>>, vector<1x16x128xf32>,
    %c8_i32 = arith.constant 8 : i32
    %85 = arith.cmpi eq, %arg1, %c8_i32 : i32
    %86 = arith.extui %85 : i1 to i32
    %c0_i32_92 = arith.constant 0 : i32
    %87 = arith.cmpi ne, %86, %c0_i32_92 : i32
    scf.if %87 {
      %c0_93 = arith.constant 0 : index
      %c0_94 = arith.constant 0 : index
      %88 = vector.load %arg4[%c0_93, %c0_94] : memref<1x128xf32, #tpu.memory_space<vmem>>, vector<1x128xf32>
      %c0_95 = arith.constant 0 : index
      %c0_96 = arith.constant 0 : index
      %89 = vector.load %arg5[%c0_95, %c0_96] : memref<128x512xbf16, #tpu.memory_space<vmem>>, vector<128x512xbf16>
      %c0_97 = arith.constant 0 : index
      %c0_98 = arith.constant 0 : index
      %c0_99 = arith.constant 0 : index
      %90 = vector.load %arg14[%c0_97, %c0_98, %c0_99] : memref<9x16x128xf32, #tpu.memory_space<vmem>>, vector<1x16x128xf32>
      %91 = vector.shape_cast %90 : vector<1x16x128xf32> to vector<16x128xf32>
      %92 = vector.broadcast %88 : vector<1x128xf32> to vector<16x128xf32>
      %93 = arith.addf %91, %92 : vector<16x128xf32>
      %cst_100 = arith.constant 0.000000e+00 : f32
      %94 = vector.broadcast %cst_100 : f32 to vector<16x128xf32>
      %95 = arith.maximumf %93, %94 : vector<16x128xf32>
      %96 = arith.truncf %95 : vector<16x128xf32> to vector<16x128xbf16>
      %cst_101 = arith.constant dense<0.000000e+00> : vector<16x512xf32>
      %97 = tpu.matmul %96, %89, %cst_101 {dimension_numbers = #tpu.dot_dimension_numbers<[1], [0], [0], [1], [0, 0, 1, 1], [], []>} : vector<16x128xbf16>, vector<128x512xbf16>, vector<16x512xf32> -> vector<16x512xf32>
      %c0_102 = arith.constant 0 : index
      %c0_103 = arith.constant 0 : index
      %98 = vector.load %arg15[%c0_102, %c0_103] : memref<16x512xf32, #tpu.memory_space<vmem>>, vector<16x512xf32>
      tpu.vector_store %arg15[%c0_102, %c0_103], %97 {strides = array<i32>} : memref<16x512xf32, #tpu.memory_space<vmem>>, vector<16x512xf32>,
      %c1_104 = arith.constant 1 : index
      %c0_105 = arith.constant 0 : index
      %c0_106 = arith.constant 0 : index
      %99 = vector.load %arg14[%c1_104, %c0_105, %c0_106] : memref<9x16x128xf32, #tpu.memory_space<vmem>>, vector<1x16x128xf32>
      %100 = vector.shape_cast %99 : vector<1x16x128xf32> to vector<16x128xf32>
      %101 = vector.broadcast %88 : vector<1x128xf32> to vector<16x128xf32>
      %102 = arith.addf %100, %101 : vector<16x128xf32>
      %cst_107 = arith.constant 0.000000e+00 : f32
      %103 = vector.broadcast %cst_107 : f32 to vector<16x128xf32>
      %104 = arith.maximumf %102, %103 : vector<16x128xf32>
      %105 = arith.truncf %104 : vector<16x128xf32> to vector<16x128xbf16>
      %cst_108 = arith.constant dense<0.000000e+00> : vector<16x512xf32>
      %106 = tpu.matmul %105, %89, %cst_108 {dimension_numbers = #tpu.dot_dimension_numbers<[1], [0], [0], [1], [0, 0, 1, 1], [], []>} : vector<16x128xbf16>, vector<128x512xbf16>, vector<16x512xf32> -> vector<16x512xf32>
      %c0_109 = arith.constant 0 : index
      %c0_110 = arith.constant 0 : index
      %107 = vector.load %arg15[%c0_109, %c0_110] : memref<16x512xf32, #tpu.memory_space<vmem>>, vector<16x512xf32>
      %108 = arith.maximumf %107, %106 : vector<16x512xf32>
      %c0_111 = arith.constant 0 : index
      %c0_112 = arith.constant 0 : index
      %109 = vector.load %arg15[%c0_111, %c0_112] : memref<16x512xf32, #tpu.memory_space<vmem>>, vector<16x512xf32>
      tpu.vector_store %arg15[%c0_111, %c0_112], %108 {strides = array<i32>} : memref<16x512xf32, #tpu.memory_space<vmem>>, vector<16x512xf32>,
      %c2_113 = arith.constant 2 : index
      %c0_114 = arith.constant 0 : index
      %c0_115 = arith.constant 0 : index
      %110 = vector.load %arg14[%c2_113, %c0_114, %c0_115] : memref<9x16x128xf32, #tpu.memory_space<vmem>>, vector<1x16x128xf32>
      %111 = vector.shape_cast %110 : vector<1x16x128xf32> to vector<16x128xf32>
      %112 = vector.broadcast %88 : vector<1x128xf32> to vector<16x128xf32>
      %113 = arith.addf %111, %112 : vector<16x128xf32>
      %cst_116 = arith.constant 0.000000e+00 : f32
      %114 = vector.broadcast %cst_116 : f32 to vector<16x128xf32>
      %115 = arith.maximumf %113, %114 : vector<16x128xf32>
      %116 = arith.truncf %115 : vector<16x128xf32> to vector<16x128xbf16>
      %cst_117 = arith.constant dense<0.000000e+00> : vector<16x512xf32>
      %117 = tpu.matmul %116, %89, %cst_117 {dimension_numbers = #tpu.dot_dimension_numbers<[1], [0], [0], [1], [0, 0, 1, 1], [], []>} : vector<16x128xbf16>, vector<128x512xbf16>, vector<16x512xf32> -> vector<16x512xf32>
      %c0_118 = arith.constant 0 : index
      %c0_119 = arith.constant 0 : index
      %118 = vector.load %arg15[%c0_118, %c0_119] : memref<16x512xf32, #tpu.memory_space<vmem>>, vector<16x512xf32>
      %119 = arith.maximumf %118, %117 : vector<16x512xf32>
      %c0_120 = arith.constant 0 : index
      %c0_121 = arith.constant 0 : index
      %120 = vector.load %arg15[%c0_120, %c0_121] : memref<16x512xf32, #tpu.memory_space<vmem>>, vector<16x512xf32>
      tpu.vector_store %arg15[%c0_120, %c0_121], %119 {strides = array<i32>} : memref<16x512xf32, #tpu.memory_space<vmem>>, vector<16x512xf32>,
      %c3_122 = arith.constant 3 : index
      %c0_123 = arith.constant 0 : index
      %c0_124 = arith.constant 0 : index
      %121 = vector.load %arg14[%c3_122, %c0_123, %c0_124] : memref<9x16x128xf32, #tpu.memory_space<vmem>>, vector<1x16x128xf32>
      %122 = vector.shape_cast %121 : vector<1x16x128xf32> to vector<16x128xf32>
      %123 = vector.broadcast %88 : vector<1x128xf32> to vector<16x128xf32>
      %124 = arith.addf %122, %123 : vector<16x128xf32>
      %cst_125 = arith.constant 0.000000e+00 : f32
      %125 = vector.broadcast %cst_125 : f32 to vector<16x128xf32>
      %126 = arith.maximumf %124, %125 : vector<16x128xf32>
      %127 = arith.truncf %126 : vector<16x128xf32> to vector<16x128xbf16>
      %cst_126 = arith.constant dense<0.000000e+00> : vector<16x512xf32>
      %128 = tpu.matmul %127, %89, %cst_126 {dimension_numbers = #tpu.dot_dimension_numbers<[1], [0], [0], [1], [0, 0, 1, 1], [], []>} : vector<16x128xbf16>, vector<128x512xbf16>, vector<16x512xf32> -> vector<16x512xf32>
      %c0_127 = arith.constant 0 : index
      %c0_128 = arith.constant 0 : index
      %129 = vector.load %arg15[%c0_127, %c0_128] : memref<16x512xf32, #tpu.memory_space<vmem>>, vector<16x512xf32>
      %130 = arith.maximumf %129, %128 : vector<16x512xf32>
      %c0_129 = arith.constant 0 : index
      %c0_130 = arith.constant 0 : index
      %131 = vector.load %arg15[%c0_129, %c0_130] : memref<16x512xf32, #tpu.memory_space<vmem>>, vector<16x512xf32>
      tpu.vector_store %arg15[%c0_129, %c0_130], %130 {strides = array<i32>} : memref<16x512xf32, #tpu.memory_space<vmem>>, vector<16x512xf32>,
      %c4_131 = arith.constant 4 : index
      %c0_132 = arith.constant 0 : index
      %c0_133 = arith.constant 0 : index
      %132 = vector.load %arg14[%c4_131, %c0_132, %c0_133] : memref<9x16x128xf32, #tpu.memory_space<vmem>>, vector<1x16x128xf32>
      %133 = vector.shape_cast %132 : vector<1x16x128xf32> to vector<16x128xf32>
      %134 = vector.broadcast %88 : vector<1x128xf32> to vector<16x128xf32>
      %135 = arith.addf %133, %134 : vector<16x128xf32>
      %cst_134 = arith.constant 0.000000e+00 : f32
      %136 = vector.broadcast %cst_134 : f32 to vector<16x128xf32>
      %137 = arith.maximumf %135, %136 : vector<16x128xf32>
      %138 = arith.truncf %137 : vector<16x128xf32> to vector<16x128xbf16>
      %cst_135 = arith.constant dense<0.000000e+00> : vector<16x512xf32>
      %139 = tpu.matmul %138, %89, %cst_135 {dimension_numbers = #tpu.dot_dimension_numbers<[1], [0], [0], [1], [0, 0, 1, 1], [], []>} : vector<16x128xbf16>, vector<128x512xbf16>, vector<16x512xf32> -> vector<16x512xf32>
      %c0_136 = arith.constant 0 : index
      %c0_137 = arith.constant 0 : index
      %140 = vector.load %arg15[%c0_136, %c0_137] : memref<16x512xf32, #tpu.memory_space<vmem>>, vector<16x512xf32>
      %141 = arith.maximumf %140, %139 : vector<16x512xf32>
      %c0_138 = arith.constant 0 : index
      %c0_139 = arith.constant 0 : index
      %142 = vector.load %arg15[%c0_138, %c0_139] : memref<16x512xf32, #tpu.memory_space<vmem>>, vector<16x512xf32>
      tpu.vector_store %arg15[%c0_138, %c0_139], %141 {strides = array<i32>} : memref<16x512xf32, #tpu.memory_space<vmem>>, vector<16x512xf32>,
      %c5_140 = arith.constant 5 : index
      %c0_141 = arith.constant 0 : index
      %c0_142 = arith.constant 0 : index
      %143 = vector.load %arg14[%c5_140, %c0_141, %c0_142] : memref<9x16x128xf32, #tpu.memory_space<vmem>>, vector<1x16x128xf32>
      %144 = vector.shape_cast %143 : vector<1x16x128xf32> to vector<16x128xf32>
      %145 = vector.broadcast %88 : vector<1x128xf32> to vector<16x128xf32>
      %146 = arith.addf %144, %145 : vector<16x128xf32>
      %cst_143 = arith.constant 0.000000e+00 : f32
      %147 = vector.broadcast %cst_143 : f32 to vector<16x128xf32>
      %148 = arith.maximumf %146, %147 : vector<16x128xf32>
      %149 = arith.truncf %148 : vector<16x128xf32> to vector<16x128xbf16>
      %cst_144 = arith.constant dense<0.000000e+00> : vector<16x512xf32>
      %150 = tpu.matmul %149, %89, %cst_144 {dimension_numbers = #tpu.dot_dimension_numbers<[1], [0], [0], [1], [0, 0, 1, 1], [], []>} : vector<16x128xbf16>, vector<128x512xbf16>, vector<16x512xf32> -> vector<16x512xf32>
      %c0_145 = arith.constant 0 : index
      %c0_146 = arith.constant 0 : index
      %151 = vector.load %arg15[%c0_145, %c0_146] : memref<16x512xf32, #tpu.memory_space<vmem>>, vector<16x512xf32>
      %152 = arith.maximumf %151, %150 : vector<16x512xf32>
      %c0_147 = arith.constant 0 : index
      %c0_148 = arith.constant 0 : index
      %153 = vector.load %arg15[%c0_147, %c0_148] : memref<16x512xf32, #tpu.memory_space<vmem>>, vector<16x512xf32>
      tpu.vector_store %arg15[%c0_147, %c0_148], %152 {strides = array<i32>} : memref<16x512xf32, #tpu.memory_space<vmem>>, vector<16x512xf32>,
      %c6_149 = arith.constant 6 : index
      %c0_150 = arith.constant 0 : index
      %c0_151 = arith.constant 0 : index
      %154 = vector.load %arg14[%c6_149, %c0_150, %c0_151] : memref<9x16x128xf32, #tpu.memory_space<vmem>>, vector<1x16x128xf32>
      %155 = vector.shape_cast %154 : vector<1x16x128xf32> to vector<16x128xf32>
      %156 = vector.broadcast %88 : vector<1x128xf32> to vector<16x128xf32>
      %157 = arith.addf %155, %156 : vector<16x128xf32>
      %cst_152 = arith.constant 0.000000e+00 : f32
      %158 = vector.broadcast %cst_152 : f32 to vector<16x128xf32>
      %159 = arith.maximumf %157, %158 : vector<16x128xf32>
      %160 = arith.truncf %159 : vector<16x128xf32> to vector<16x128xbf16>
      %cst_153 = arith.constant dense<0.000000e+00> : vector<16x512xf32>
      %161 = tpu.matmul %160, %89, %cst_153 {dimension_numbers = #tpu.dot_dimension_numbers<[1], [0], [0], [1], [0, 0, 1, 1], [], []>} : vector<16x128xbf16>, vector<128x512xbf16>, vector<16x512xf32> -> vector<16x512xf32>
      %c0_154 = arith.constant 0 : index
      %c0_155 = arith.constant 0 : index
      %162 = vector.load %arg15[%c0_154, %c0_155] : memref<16x512xf32, #tpu.memory_space<vmem>>, vector<16x512xf32>
      %163 = arith.maximumf %162, %161 : vector<16x512xf32>
      %c0_156 = arith.constant 0 : index
      %c0_157 = arith.constant 0 : index
      %164 = vector.load %arg15[%c0_156, %c0_157] : memref<16x512xf32, #tpu.memory_space<vmem>>, vector<16x512xf32>
      tpu.vector_store %arg15[%c0_156, %c0_157], %163 {strides = array<i32>} : memref<16x512xf32, #tpu.memory_space<vmem>>, vector<16x512xf32>,
      %c7_158 = arith.constant 7 : index
      %c0_159 = arith.constant 0 : index
      %c0_160 = arith.constant 0 : index
      %165 = vector.load %arg14[%c7_158, %c0_159, %c0_160] : memref<9x16x128xf32, #tpu.memory_space<vmem>>, vector<1x16x128xf32>
      %166 = vector.shape_cast %165 : vector<1x16x128xf32> to vector<16x128xf32>
      %167 = vector.broadcast %88 : vector<1x128xf32> to vector<16x128xf32>
      %168 = arith.addf %166, %167 : vector<16x128xf32>
      %cst_161 = arith.constant 0.000000e+00 : f32
      %169 = vector.broadcast %cst_161 : f32 to vector<16x128xf32>
      %170 = arith.maximumf %168, %169 : vector<16x128xf32>
      %171 = arith.truncf %170 : vector<16x128xf32> to vector<16x128xbf16>
      %cst_162 = arith.constant dense<0.000000e+00> : vector<16x512xf32>
      %172 = tpu.matmul %171, %89, %cst_162 {dimension_numbers = #tpu.dot_dimension_numbers<[1], [0], [0], [1], [0, 0, 1, 1], [], []>} : vector<16x128xbf16>, vector<128x512xbf16>, vector<16x512xf32> -> vector<16x512xf32>
      %c0_163 = arith.constant 0 : index
      %c0_164 = arith.constant 0 : index
      %173 = vector.load %arg15[%c0_163, %c0_164] : memref<16x512xf32, #tpu.memory_space<vmem>>, vector<16x512xf32>
      %174 = arith.maximumf %173, %172 : vector<16x512xf32>
      %c0_165 = arith.constant 0 : index
      %c0_166 = arith.constant 0 : index
      %175 = vector.load %arg15[%c0_165, %c0_166] : memref<16x512xf32, #tpu.memory_space<vmem>>, vector<16x512xf32>
      tpu.vector_store %arg15[%c0_165, %c0_166], %174 {strides = array<i32>} : memref<16x512xf32, #tpu.memory_space<vmem>>, vector<16x512xf32>,
      %c8_167 = arith.constant 8 : index
      %c0_168 = arith.constant 0 : index
      %c0_169 = arith.constant 0 : index
      %176 = vector.load %arg14[%c8_167, %c0_168, %c0_169] : memref<9x16x128xf32, #tpu.memory_space<vmem>>, vector<1x16x128xf32>
      %177 = vector.shape_cast %176 : vector<1x16x128xf32> to vector<16x128xf32>
      %178 = vector.broadcast %88 : vector<1x128xf32> to vector<16x128xf32>
      %179 = arith.addf %177, %178 : vector<16x128xf32>
      %cst_170 = arith.constant 0.000000e+00 : f32
      %180 = vector.broadcast %cst_170 : f32 to vector<16x128xf32>
      %181 = arith.maximumf %179, %180 : vector<16x128xf32>
      %182 = arith.truncf %181 : vector<16x128xf32> to vector<16x128xbf16>
      %cst_171 = arith.constant dense<0.000000e+00> : vector<16x512xf32>
      %183 = tpu.matmul %182, %89, %cst_171 {dimension_numbers = #tpu.dot_dimension_numbers<[1], [0], [0], [1], [0, 0, 1, 1], [], []>} : vector<16x128xbf16>, vector<128x512xbf16>, vector<16x512xf32> -> vector<16x512xf32>
      %c0_172 = arith.constant 0 : index
      %c0_173 = arith.constant 0 : index
      %184 = vector.load %arg15[%c0_172, %c0_173] : memref<16x512xf32, #tpu.memory_space<vmem>>, vector<16x512xf32>
      %185 = arith.maximumf %184, %183 : vector<16x512xf32>
      %c0_174 = arith.constant 0 : index
      %c0_175 = arith.constant 0 : index
      %186 = vector.load %arg15[%c0_174, %c0_175] : memref<16x512xf32, #tpu.memory_space<vmem>>, vector<16x512xf32>
      tpu.vector_store %arg15[%c0_174, %c0_175], %185 {strides = array<i32>} : memref<16x512xf32, #tpu.memory_space<vmem>>, vector<16x512xf32>,
      %c0_176 = arith.constant 0 : index
      %c0_177 = arith.constant 0 : index
      %187 = vector.load %arg15[%c0_176, %c0_177] : memref<16x512xf32, #tpu.memory_space<vmem>>, vector<16x512xf32>
      %c0_178 = arith.constant 0 : index
      %c0_179 = arith.constant 0 : index
      %188 = vector.load %arg6[%c0_178, %c0_179] : memref<1x512xf32, #tpu.memory_space<vmem>>, vector<1x512xf32>
      %189 = vector.broadcast %188 : vector<1x512xf32> to vector<16x512xf32>
      %190 = arith.addf %187, %189 : vector<16x512xf32>
      %cst_180 = arith.constant 0.000000e+00 : f32
      %191 = vector.broadcast %cst_180 : f32 to vector<16x512xf32>
      %192 = arith.maximumf %190, %191 : vector<16x512xf32>
      %193 = arith.truncf %192 : vector<16x512xf32> to vector<16x512xbf16>
      %c0_181 = arith.constant 0 : index
      %c0_182 = arith.constant 0 : index
      %194 = vector.load %arg7[%c0_181, %c0_182] : memref<512x128xbf16, #tpu.memory_space<vmem>>, vector<512x128xbf16>
      %cst_183 = arith.constant dense<0.000000e+00> : vector<16x128xf32>
      %195 = tpu.matmul %193, %194, %cst_183 {dimension_numbers = #tpu.dot_dimension_numbers<[1], [0], [0], [1], [0, 0, 1, 1], [], []>} : vector<16x512xbf16>, vector<512x128xbf16>, vector<16x128xf32> -> vector<16x128xf32>
      %c0_184 = arith.constant 0 : index
      %c0_185 = arith.constant 0 : index
      %196 = vector.load %arg8[%c0_184, %c0_185] : memref<1x128xf32, #tpu.memory_space<vmem>>, vector<1x128xf32>
      %197 = vector.broadcast %196 : vector<1x128xf32> to vector<16x128xf32>
      %198 = arith.addf %195, %197 : vector<16x128xf32>
      %cst_186 = arith.constant 0.000000e+00 : f32
      %199 = vector.broadcast %cst_186 : f32 to vector<16x128xf32>
      %200 = arith.maximumf %198, %199 : vector<16x128xf32>
      %201 = arith.truncf %200 : vector<16x128xf32> to vector<16x128xbf16>
      %c0_187 = arith.constant 0 : index
      %c0_188 = arith.constant 0 : index
      %202 = vector.load %arg9[%c0_187, %c0_188] : memref<128x128xbf16, #tpu.memory_space<vmem>>, vector<128x128xbf16>
      %cst_189 = arith.constant dense<0.000000e+00> : vector<16x128xf32>
      %203 = tpu.matmul %201, %202, %cst_189 {dimension_numbers = #tpu.dot_dimension_numbers<[1], [0], [0], [1], [0, 0, 1, 1], [], []>} : vector<16x128xbf16>, vector<128x128xbf16>, vector<16x128xf32> -> vector<16x128xf32>
      %c0_190 = arith.constant 0 : index
      %c0_191 = arith.constant 0 : index
      %204 = vector.load %arg10[%c0_190, %c0_191] : memref<1x128xf32, #tpu.memory_space<vmem>>, vector<1x128xf32>
      %205 = vector.broadcast %204 : vector<1x128xf32> to vector<16x128xf32>
      %206 = arith.addf %203, %205 : vector<16x128xf32>
      %cst_192 = arith.constant 0.000000e+00 : f32
      %207 = vector.broadcast %cst_192 : f32 to vector<16x128xf32>
      %208 = arith.maximumf %206, %207 : vector<16x128xf32>
      %209 = arith.truncf %208 : vector<16x128xf32> to vector<16x128xbf16>
      %c0_193 = arith.constant 0 : index
      %c0_194 = arith.constant 0 : index
      %210 = vector.load %arg11[%c0_193, %c0_194] : memref<128x128xbf16, #tpu.memory_space<vmem>>, vector<128x128xbf16>
      %cst_195 = arith.constant dense<0.000000e+00> : vector<16x128xf32>
      %211 = tpu.matmul %209, %210, %cst_195 {dimension_numbers = #tpu.dot_dimension_numbers<[1], [0], [0], [1], [0, 0, 1, 1], [], []>} : vector<16x128xbf16>, vector<128x128xbf16>, vector<16x128xf32> -> vector<16x128xf32>
      %c0_196 = arith.constant 0 : index
      %c0_197 = arith.constant 0 : index
      %212 = vector.load %arg12[%c0_196, %c0_197] : memref<1x128xf32, #tpu.memory_space<vmem>>, vector<1x128xf32>
      %213 = vector.broadcast %212 : vector<1x128xf32> to vector<16x128xf32>
      %214 = arith.addf %211, %213 : vector<16x128xf32>
      %c0_198 = arith.constant 0 : index
      %c0_199 = arith.constant 0 : index
      %215 = vector.load %arg13[%c0_198, %c0_199] : memref<16x128xf32, #tpu.memory_space<vmem>>, vector<16x128xf32>
      tpu.vector_store %arg13[%c0_198, %c0_199], %214 {strides = array<i32>} : memref<16x128xf32, #tpu.memory_space<vmem>>, vector<16x128xf32>,
    } else {
    }
    return
  }
  func.func @transform_0(%arg0: i32, %arg1: i32) -> (i32, i32, i32, i32) {
    %c0_i32 = arith.constant 0 : i32
    %c0_i32_0 = arith.constant 0 : i32
    %c0_i32_1 = arith.constant 0 : i32
    return %arg1, %c0_i32, %arg0, %c0_i32_0 : i32, i32, i32, i32
  }
  func.func @transform_1(%arg0: i32, %arg1: i32) -> (i32, i32) {
    %c0_i32 = arith.constant 0 : i32
    %c0_i32_0 = arith.constant 0 : i32
    %c0_i32_1 = arith.constant 0 : i32
    return %c0_i32, %c0_i32_0 : i32, i32
  }
  func.func @transform_2(%arg0: i32, %arg1: i32) -> (i32, i32) {
    %c0_i32 = arith.constant 0 : i32
    %c0_i32_0 = arith.constant 0 : i32
    %c0_i32_1 = arith.constant 0 : i32
    return %c0_i32, %c0_i32_0 : i32, i32
  }
  func.func @transform_3(%arg0: i32, %arg1: i32) -> (i32, i32) {
    %c0_i32 = arith.constant 0 : i32
    %c0_i32_0 = arith.constant 0 : i32
    %c0_i32_1 = arith.constant 0 : i32
    return %c0_i32, %c0_i32_0 : i32, i32
  }
  func.func @transform_4(%arg0: i32, %arg1: i32) -> (i32, i32) {
    %c0_i32 = arith.constant 0 : i32
    %c0_i32_0 = arith.constant 0 : i32
    %c0_i32_1 = arith.constant 0 : i32
    return %c0_i32, %c0_i32_0 : i32, i32
  }
  func.func @transform_5(%arg0: i32, %arg1: i32) -> (i32, i32) {
    %c0_i32 = arith.constant 0 : i32
    %c0_i32_0 = arith.constant 0 : i32
    %c0_i32_1 = arith.constant 0 : i32
    return %c0_i32, %c0_i32_0 : i32, i32
  }
  func.func @transform_6(%arg0: i32, %arg1: i32) -> (i32, i32) {
    %c0_i32 = arith.constant 0 : i32
    %c0_i32_0 = arith.constant 0 : i32
    %c0_i32_1 = arith.constant 0 : i32
    return %c0_i32, %c0_i32_0 : i32, i32
  }
  func.func @transform_7(%arg0: i32, %arg1: i32) -> (i32, i32) {
    %c0_i32 = arith.constant 0 : i32
    %c0_i32_0 = arith.constant 0 : i32
    %c0_i32_1 = arith.constant 0 : i32
    return %c0_i32, %c0_i32_0 : i32, i32
  }
  func.func @transform_8(%arg0: i32, %arg1: i32) -> (i32, i32) {
    %c0_i32 = arith.constant 0 : i32
    %c0_i32_0 = arith.constant 0 : i32
    %c0_i32_1 = arith.constant 0 : i32
    return %c0_i32, %c0_i32_0 : i32, i32
  }
  func.func @transform_9(%arg0: i32, %arg1: i32) -> (i32, i32) {
    %c0_i32 = arith.constant 0 : i32
    %c0_i32_0 = arith.constant 0 : i32
    %c0_i32_1 = arith.constant 0 : i32
    return %c0_i32, %c0_i32_0 : i32, i32
  }
  func.func @transform_10(%arg0: i32, %arg1: i32) -> (i32, i32) {
    %c0_i32 = arith.constant 0 : i32
    %c0_i32_0 = arith.constant 0 : i32
    %c0_i32_1 = arith.constant 0 : i32
    return %c0_i32, %c0_i32_0 : i32, i32
  }
  func.func @transform_11(%arg0: i32, %arg1: i32) -> (i32, i32) {
    %c0_i32 = arith.constant 0 : i32
    %c0_i32_0 = arith.constant 0 : i32
    return %arg0, %c0_i32 : i32, i32
  }
}

</mosaic_0001>

<bundles_post_ra>
// kernel: lenet_forward.2
= control target key start
LH: loop header
LB: loop body
LE: loop exit
PB: predicated region body
PF: predicated region fallthrough
CT: control target
= control target key end

     0   :  { %s1302_s12 = smov 0   ;;  %s1304_s13 = smov 0   ;;  %s1486_s0 = inlined_call_operand.vmem [shape: bf16[4,416,128], index: 0, kind: input, shape index: {}]   ;;  %s1487_s1 = inlined_call_operand.vmem [shape: bf16[128,128], index: 1, kind: input, shape index: {}]   ;;  %s1488_s2 = inlined_call_operand.vmem [shape: f32[1,128], index: 2, kind: input, shape index: {}]   ;;  %s1489_s3 = inlined_call_operand.vmem [shape: bf16[416,128], index: 3, kind: output, shape index: {}]  }
   0x1   :  { %s1306_s14 = smov 0   ;;  %s1308_s15 = smov 0  }
   0x2   :  { %s1310_s16 = smov 0  }
   0x3 LB: > { %s22_s17 = sadd.s32 1, %s1269_s14  ;;  %s25_s18 = sadd.s32 1, %s1273_s15  ;;  %s1277_s16 = sphi %s1310_s16, %s13_s16   ;;  %s1273_s15 = sphi %s1308_s15, %s1493_s15   ;;  %s1269_s14 = sphi %s1306_s14, %s1492_s14   ;;  %s1265_s13 = sphi %s1304_s13, %s1491_s13   ;;  %s1261_s12 = sphi %s1302_s12, %s1490_s12  }
   0x4   : > { %p23_p0 = scmp.ge.s32.totalorder %s22_s17, 4  ;;  %p911_p1 = scmp.ge.s32.totalorder %s1277_s16, 1 }
   0x5   : > { %p156_p2 = scmp.lt.s32.totalorder %s1277_s16, 9 }
   0x6   : > { %s1495_s17 = smov (%p23_p0, %s22_s17), 0  ;;  %s1497_s18 = smov (!%p23_p0, %s25_s18), %s1273_s15 }
   0x7   : > { %p157_p3 = pnand %p911_p1, %p156_p2  ;;  %p27_p4 = scmp.ge.s32.totalorder %s1497_s18, 2 }
   0x8   : > { %s184_s19 = smul.u32 (!%p157_p3), 26, %s1265_s13  ;;  %p185_p5 = scmp.lt.s32.totalorder (!%p157_p3), %s1261_s12, 3 }
   0x9   : > { %s1499_s18 = smov (%p27_p4, %s1497_s18), 0  ;;  %160 = sbr.rel (%p157_p3) target bundleno = 344 (0x158), region = 32 }
   0xa   : > { %p187_p6 = scmp.lt.s32.totalorder (!%p157_p3), %s184_s19, 51  ;;  %p914_p7 = scmp.ne.s32.totalorder (!%p157_p3), %s1261_s12, 0 }
  0x10   : > { %s186_s20 = scalar_select %p185_p5, %s1261_s12, 3 }
  0x11   : > { %s1501_s19 = smov (!%p187_p6, %s184_s19), 51  ;;  %204 = sbr.rel (%p914_p7) target bundleno = 32 (0x20), region = 36 }
  0x12   : > { %s1174_s21 = smul.u32 52, %s186_s20  ;;  %s913_s23 = sshll.u32 %s1501_s19, 2  ;;  %v1279_v0 = vmov (!%p914_p7), -inf  }
  0x13   : > { %s1339_s27 = scalar_lea.vmem %s1489_s3, %s913_s23  ;;  %205 = vst [vmem:[#allocation2] sm:$0xff] (!%p914_p7), %v1279_v0  ;;  %206 = vst [vmem:[#allocation2 + $0x8] sm:$0xff] (!%p914_p7), %v1279_v0 }
  0x14   : > { %s190_s22 = sadd.s32 %s1174_s21, %s1501_s19  ;;  %207 = vst [vmem:[#allocation2 + $0x10] sm:$0xff] (!%p914_p7), %v1279_v0  ;;  %208 = vst [vmem:[#allocation2 + $0x18] sm:$0xff] (!%p914_p7), %v1279_v0 }
  0x15   : > { %s912_s24 = sshll.u32 %s190_s22, 2  ;;  %209 = vst [vmem:[#allocation2 + $0x20] sm:$0xff] (!%p914_p7), %v1279_v0  ;;  %210 = vst [vmem:[#allocation2 + $0x28] sm:$0xff] (!%p914_p7), %v1279_v0 }
  0x16   : > { %s1344_s30 = scalar_lea.vmem %s1486_s0, %s912_s24  ;;  %211 = vst [vmem:[#allocation2 + $0x30] sm:$0xff] (!%p914_p7), %v1279_v0  ;;  %212 = vst [vmem:[#allocation2 + $0x38] sm:$0xff] (!%p914_p7), %v1279_v0 }
  0x17   : > { %213 = vst [vmem:[#allocation2 + $0x40] sm:$0xff] (!%p914_p7), %v1279_v0  ;;  %214 = vst [vmem:[#allocation2 + $0x48] sm:$0xff] (!%p914_p7), %v1279_v0 }
  0x18   : > { %215 = vst [vmem:[#allocation2 + $0x50] sm:$0xff] %v1279_v0  ;;  %216 = vst [vmem:[#allocation2 + $0x58] sm:$0xff] %v1279_v0 }
  0x19   : > { %217 = vst [vmem:[#allocation2 + $0x60] sm:$0xff] %v1279_v0  ;;  %218 = vst [vmem:[#allocation2 + $0x68] sm:$0xff] %v1279_v0 }
  0x1a   : > { %219 = vst [vmem:[#allocation2 + $0x70] sm:$0xff] %v1279_v0  ;;  %220 = vst [vmem:[#allocation2 + $0x78] sm:$0xff] %v1279_v0 }
  0x1b   : > { %221 = vst [vmem:[#allocation2 + $0x80] sm:$0xff] %v1279_v0  ;;  %222 = vst [vmem:[#allocation2 + $0x88] sm:$0xff] %v1279_v0 }
  0x1c   : > { %223 = vst [vmem:[#allocation2 + $0x90] sm:$0xff] %v1279_v0  ;;  %224 = vst [vmem:[#allocation2 + $0x98] sm:$0xff] %v1279_v0 }
  0x1d   : > { %225 = vst [vmem:[#allocation2 + $0xa0] sm:$0xff] %v1279_v0  ;;  %226 = vst [vmem:[#allocation2 + $0xa8] sm:$0xff] %v1279_v0 }
  0x1e   : > { %227 = vst [vmem:[#allocation2 + $0xb0] sm:$0xff] %v1279_v0  ;;  %228 = vst [vmem:[#allocation2 + $0xb8] sm:$0xff] %v1279_v0 }
  0x1f   : > { %229 = vst [vmem:[#allocation2 + $0xc0] sm:$0xff] %v1279_v0  ;;  %230 = vst [vmem:[#allocation2 + $0xc8] sm:$0xff] %v1279_v0 }
  0x20 PF: > { %v1218_v1 = vld [vmem:[%s1487_s1] sm:$0xff]   ;;  %v1280_v2 = vmov 0.0   ;;  %v1219_v3 = vld [vmem:[%s1487_s1 + $0x8] sm:$0xff]   ;;  %vm1281_vm0 = vmmov 0   ;;  %v1220_v4 = vld [vmem:[%s1487_s1 + $0x10] sm:$0xff]   ;;  %p936_p8 = scmp.ne.s32.totalorder %s1261_s12, 3 }
  0x21   : > { %1090 = vmatprep.subr.bf16.mxu0 %v1280_v2  ;;  %1158 = vmatprep.subr.bf16.mxu1 %v1280_v2  ;;  %v1221_v5 = vld [vmem:[%s1487_s1 + $0x18] sm:$0xff]   ;;  %v1222_v6 = vld [vmem:[%s1487_s1 + $0x20] sm:$0xff]   ;;  %v1223_v7 = vld [vmem:[%s1487_s1 + $0x28] sm:$0xff]  }
  0x22   : > { %1091 = vmatpush3.bf16.msra.mxu0 %v1218_v1  ;;  %1166 = vmatpush3.bf16.msra.mxu1 %v1218_v1  ;;  %v1224_v8 = vld [vmem:[%s1487_s1 + $0x30] sm:$0xff]   ;;  %v1225_v9 = vld [vmem:[%s1487_s1 + $0x38] sm:$0xff]   ;;  %v1226_v10 = vld [vmem:[%s1344_s30] sm:$0xff]  }
  0x23   : > { %1092 = vmatprep.subr.bf16.mxu0 %v1280_v2  ;;  %1159 = vmatprep.subr.bf16.mxu1 %v1280_v2  ;;  %v1227_v11 = vld [vmem:[%s1344_s30 + $0x38] sm:$0xff]   ;;  %v1228_v12 = vld [vmem:[%s1344_s30 + $0x8] sm:$0xff]   ;;  %v1229_v13 = vld [vmem:[%s1344_s30 + $0x40] sm:$0xff]  }
  0x24   : > { %1106 = vmatprep.mubr.msk.bf16.mxu0 %vm1281_vm0, %v1280_v2  ;;  %1134 = vmatprep.mubr.msk.bf16.mxu1 %vm1281_vm0, %v1280_v2  ;;  %v1230_v14 = vld [vmem:[%s1344_s30 + $0x10] sm:$0xff]   ;;  %v1231_v15 = vld [vmem:[%s1344_s30 + $0x48] sm:$0xff]   ;;  %v1232_v16 = vld [vmem:[%s1344_s30 + $0x18] sm:$0xff]  }
  0x25   : > { %v1233_v17 = vld [vmem:[%s1344_s30 + $0x50] sm:$0xff]   ;;  %v1234_v18 = vld [vmem:[%s1344_s30 + $0x20] sm:$0xff]   ;;  %v1235_v19 = vld [vmem:[%s1344_s30 + $0x58] sm:$0xff]  }
  0x26   : > { %1093 = vmatpush3.bf16.msra.mxu0 %v1219_v3  ;;  %1167 = vmatpush3.bf16.msra.mxu1 %v1219_v3  ;;  %v1236_v20 = vld [vmem:[%s1344_s30 + $0x28] sm:$0xff]   ;;  %v1237_v21 = vld [vmem:[%s1344_s30 + $0x60] sm:$0xff]   ;;  %v1238_v22 = vld [vmem:[%s1344_s30 + $0x30] sm:$0xff]  }
  0x27   : > { %1094 = vmatprep.subr.bf16.mxu0 %v1280_v2  ;;  %1160 = vmatprep.subr.bf16.mxu1 %v1280_v2  ;;  %v231_v23 = vld [vmem:[#allocation2] sm:$0xff]  ;;  %v245_v24 = vld [vmem:[#allocation2 + $0x70] sm:$0xff]  ;;  %v232_v26 = vld [vmem:[#allocation2 + $0x8] sm:$0xff] }
  0x28   : > { %v246_v28 = vld [vmem:[#allocation2 + $0x78] sm:$0xff]  ;;  %v233_v39 = vld [vmem:[#allocation2 + $0x10] sm:$0xff]  ;;  %v247_v40 = vld [vmem:[#allocation2 + $0x80] sm:$0xff] }
  0x29   : > { %v234_v42 = vld [vmem:[#allocation2 + $0x18] sm:$0xff]  ;;  %v248_v44 = vld [vmem:[#allocation2 + $0x88] sm:$0xff]  ;;  %v235_v55 = vld [vmem:[#allocation2 + $0x20] sm:$0xff] }
  0x2a   : > { %1095 = vmatpush3.bf16.msra.mxu0 %v1220_v4  ;;  %1168 = vmatpush3.bf16.msra.mxu1 %v1220_v4  ;;  %v249_v56 = vld [vmem:[#allocation2 + $0x90] sm:$0xff]  ;;  %v236_v58 = vld [vmem:[#allocation2 + $0x28] sm:$0xff]  ;;  %v250_v60 = vld [vmem:[#allocation2 + $0x98] sm:$0xff] }
  0x2b   : > { %1096 = vmatprep.subr.bf16.mxu0 %v1280_v2  ;;  %1161 = vmatprep.subr.bf16.mxu1 %v1280_v2 }
  0x2e   : > { %1097 = vmatpush3.bf16.msra.mxu0 %v1221_v5  ;;  %1169 = vmatpush3.bf16.msra.mxu1 %v1221_v5 }
  0x2f   : > { %1098 = vmatprep.subr.bf16.mxu0 %v1280_v2  ;;  %1162 = vmatprep.subr.bf16.mxu1 %v1280_v2 }
  0x32   : > { %1099 = vmatpush3.bf16.msra.mxu0 %v1222_v6  ;;  %1170 = vmatpush3.bf16.msra.mxu1 %v1222_v6 }
  0x33   : > { %1100 = vmatprep.subr.bf16.mxu0 %v1280_v2  ;;  %1163 = vmatprep.subr.bf16.mxu1 %v1280_v2 }
  0x36   : > { %1101 = vmatpush3.bf16.msra.mxu0 %v1223_v7  ;;  %1171 = vmatpush3.bf16.msra.mxu1 %v1223_v7  ;;  %v237_v7 = vld [vmem:[#allocation2 + $0x30] sm:$0xff] }
  0x37   : > { %1102 = vmatprep.subr.bf16.mxu0 %v1280_v2  ;;  %1164 = vmatprep.subr.bf16.mxu1 %v1280_v2 }
  0x3a   : > { %1103 = vmatpush3.bf16.msra.mxu0 %v1224_v8  ;;  %1172 = vmatpush3.bf16.msra.mxu1 %v1224_v8  ;;  %v251_v8 = vld [vmem:[#allocation2 + $0xa0] sm:$0xff] }
  0x3b   : > { %1104 = vmatprep.subr.bf16.mxu0 %v1280_v2  ;;  %1165 = vmatprep.subr.bf16.mxu1 %v1280_v2 }
  0x3e   : > { %1105 = vmatpush3.bf16.msra.mxu0 %v1225_v9  ;;  %1173 = vmatpush3.bf16.msra.mxu1 %v1225_v9 }
  0x41   : > { %1107 = vmatmul.mubr.bf16.vlgmr.msra.gmra.mrb[0].mxu0 %v1226_v10  ;;  %1135 = vmatmul.mubr.bf16.vlgmr.msra.gmra.mrb[0].mxu1 %v1227_v11  ;;  %v238_v10 = vld [vmem:[#allocation2 + $0x38] sm:$0xff] }
  0x42   : > { %1110 = vmatprep.mubr.msk.bf16.mxu0 %vm1281_vm0, %v1280_v2  ;;  %1138 = vmatprep.mubr.msk.bf16.mxu1 %vm1281_vm0, %v1280_v2 }
  0x49   : > { %1111 = vmatmul.mubr.bf16.gmra.mrb[4].mxu0 %v1228_v12  ;;  %1139 = vmatmul.mubr.bf16.gmra.mrb[4].mxu1 %v1229_v13  ;;  %v252_v12 = vld [vmem:[#allocation2 + $0xa8] sm:$0xff] }
  0x4a   : > { %1114 = vmatprep.mubr.msk.bf16.mxu0 %vm1281_vm0, %v1280_v2  ;;  %1142 = vmatprep.mubr.msk.bf16.mxu1 %vm1281_vm0, %v1280_v2 }
  0x51   : > { %1115 = vmatmul.mubr.bf16.gmra.mrb[8].mxu0 %v1230_v14  ;;  %1143 = vmatmul.mubr.bf16.gmra.mrb[8].mxu1 %v1231_v15 }
  0x52   : > { %1118 = vmatprep.mubr.msk.bf16.mxu0 %vm1281_vm0, %v1280_v2  ;;  %1146 = vmatprep.mubr.msk.bf16.mxu1 %vm1281_vm0, %v1280_v2 }
  0x59   : > { %1119 = vmatmul.mubr.bf16.gmra.mrb[12].mxu0 %v1232_v16  ;;  %1147 = vmatmul.mubr.bf16.gmra.mrb[12].mxu1 %v1233_v17 }
  0x5a   : > { %1122 = vmatprep.mubr.msk.bf16.mxu0 %vm1281_vm0, %v1280_v2  ;;  %1150 = vmatprep.mubr.msk.bf16.mxu1 %vm1281_vm0, %v1280_v2 }
  0x61   : > { %1123 = vmatmul.mubr.bf16.gmra.mrb[16].mxu0 %v1234_v18  ;;  %1151 = vmatmul.mubr.bf16.gmra.mrb[16].mxu1 %v1235_v19 }
  0x62   : > { %1126 = vmatprep.mubr.msk.bf16.mxu0 %vm1281_vm0, %v1280_v2  ;;  %1154 = vmatprep.mubr.msk.bf16.mxu1 %vm1281_vm0, %v1280_v2 }
  0x69   : > { %1127 = vmatmul.mubr.bf16.gmra.mrb[20].mxu0 %v1236_v20  ;;  %1155 = vmatmul.mubr.bf16.gmra.mrb[20].mxu1 %v1237_v21 }
  0x6a   : > { %1130 = vmatprep.mubr.msk.bf16.mxu0 %vm1281_vm0, %v1280_v2 }
  0x71   : > { %1131 = vmatmul.mubr.bf16.gmra.mrb[24].mxu0 %v1238_v22 }
 0x114   : > { %v459_v25 = vpop.f32.mrb[0].mxu0  ;;  %v515_v27 = vpop.f32.mrb[0].mxu1 }
 0x115   : > { %v562_v29 = vmax.f32 %v231_v23, %v459_v25  ;;  %v1108_v30 = vpop.f32.mrb[1].mxu0  ;;  %v576_v31 = vmax.f32 %v245_v24, %v515_v27  ;;  %v1136_v32 = vpop.f32.mrb[1].mxu1  ;;  %v239_v23 = vld [vmem:[#allocation2 + $0x40] sm:$0xff]  ;;  %v253_v24 = vld [vmem:[#allocation2 + $0xb0] sm:$0xff] }
 0x116   : > { %v462_v33 = vpop.f32.mrb[2].mxu0  ;;  %v518_v34 = vpop.f32.mrb[2].mxu1 }
 0x117   : > { %588 = vst [vmem:[#allocation2] sm:$0xff] %v562_v29  ;;  %v563_v35 = vmax.f32 %v232_v26, %v462_v33  ;;  %v1109_v36 = vpop.f32.mrb[3].mxu0  ;;  %602 = vst [vmem:[#allocation2 + $0x70] sm:$0xff] %v576_v31  ;;  %v577_v37 = vmax.f32 %v246_v28, %v518_v34  ;;  %v1137_v38 = vpop.f32.mrb[3].mxu1  ;;  %v240_v26 = vld [vmem:[#allocation2 + $0x48] sm:$0xff]  ;;  %v254_v28 = vld [vmem:[#allocation2 + $0xb8] sm:$0xff] }
 0x119   : > { %589 = vst [vmem:[#allocation2 + $0x8] sm:$0xff] %v563_v35  ;;  %603 = vst [vmem:[#allocation2 + $0x78] sm:$0xff] %v577_v37 }
 0x11c   : > { %v467_v41 = vpop.f32.mrb[4].mxu0  ;;  %v523_v43 = vpop.f32.mrb[4].mxu1 }
 0x11d   : > { %v564_v45 = vmax.f32 %v233_v39, %v467_v41  ;;  %v1112_v46 = vpop.f32.mrb[5].mxu0  ;;  %v578_v47 = vmax.f32 %v247_v40, %v523_v43  ;;  %v1140_v48 = vpop.f32.mrb[5].mxu1  ;;  %v241_v39 = vld [vmem:[#allocation2 + $0x50] sm:$0xff]  ;;  %v255_v40 = vld [vmem:[#allocation2 + $0xc0] sm:$0xff] }
 0x11e   : > { %v470_v49 = vpop.f32.mrb[6].mxu0  ;;  %v526_v50 = vpop.f32.mrb[6].mxu1 }
 0x11f   : > { %590 = vst [vmem:[#allocation2 + $0x10] sm:$0xff] %v564_v45  ;;  %v565_v51 = vmax.f32 %v234_v42, %v470_v49  ;;  %v1113_v52 = vpop.f32.mrb[7].mxu0  ;;  %604 = vst [vmem:[#allocation2 + $0x80] sm:$0xff] %v578_v47  ;;  %v579_v53 = vmax.f32 %v248_v44, %v526_v50  ;;  %v1141_v54 = vpop.f32.mrb[7].mxu1  ;;  %v242_v42 = vld [vmem:[#allocation2 + $0x58] sm:$0xff]  ;;  %v256_v44 = vld [vmem:[#allocation2 + $0xc8] sm:$0xff] }
 0x121   : > { %591 = vst [vmem:[#allocation2 + $0x18] sm:$0xff] %v565_v51  ;;  %605 = vst [vmem:[#allocation2 + $0x88] sm:$0xff] %v579_v53 }
 0x124   : > { %v475_v57 = vpop.f32.mrb[8].mxu0  ;;  %v531_v59 = vpop.f32.mrb[8].mxu1 }
 0x125   : > { %v566_v61 = vmax.f32 %v235_v55, %v475_v57  ;;  %v1116_v62 = vpop.f32.mrb[9].mxu0  ;;  %v580_v63 = vmax.f32 %v249_v56, %v531_v59  ;;  %v1144_v0 = vpop.f32.mrb[9].mxu1  ;;  %v243_v55 = vld [vmem:[#allocation2 + $0x60] sm:$0xff]  ;;  %v244_v57 = vld [vmem:[#allocation2 + $0x68] sm:$0xff] }
 0x126   : > { %v478_v1 = vpop.f32.mrb[10].mxu0  ;;  %v534_v2 = vpop.f32.mrb[10].mxu1  ;;  %v619_v0 = vld [vmem:[#allocation2 + $0x8] sm:$0xff] (!%p936_p8) }
 0x127   : > { %592 = vst [vmem:[#allocation2 + $0x20] sm:$0xff] %v566_v61  ;;  %v567_v3 = vmax.f32 %v236_v58, %v478_v1  ;;  %v1117_v4 = vpop.f32.mrb[11].mxu0  ;;  %606 = vst [vmem:[#allocation2 + $0x90] sm:$0xff] %v580_v63  ;;  %v581_v5 = vmax.f32 %v250_v60, %v534_v2  ;;  %v1145_v6 = vpop.f32.mrb[11].mxu1  ;;  %v618_v63 = vld [vmem:[#allocation2] sm:$0xff] (!%p936_p8) }
 0x128   : > { %v1430_v1 = vld [vmem:[%s1488_s2] ss:$0 sm:$0xff] (!%p936_p8)  ;;  %v620_v4 = vld [vmem:[#allocation2 + $0x10] sm:$0xff] (!%p936_p8) }
 0x129   : > { %593 = vst [vmem:[#allocation2 + $0x28] sm:$0xff] %v567_v3  ;;  %607 = vst [vmem:[#allocation2 + $0x98] sm:$0xff] %v581_v5  ;;  %v651_v2 = vadd.f32 (!%p936_p8), %v1430_v1, %v618_v63  ;;  %v652_v3 = vadd.f32 (!%p936_p8), %v1430_v1, %v619_v0  ;;  %v621_v5 = vld [vmem:[#allocation2 + $0x18] sm:$0xff] (!%p936_p8) }
 0x12c   : > { %v483_v9 = vpop.f32.mrb[12].mxu0  ;;  %v539_v11 = vpop.f32.mrb[12].mxu1 }
 0x12d   : > { %v568_v13 = vmax.f32 %v237_v7, %v483_v9  ;;  %v1120_v14 = vpop.f32.mrb[13].mxu0  ;;  %v582_v15 = vmax.f32 %v251_v8, %v539_v11  ;;  %v1148_v16 = vpop.f32.mrb[13].mxu1  ;;  %v653_v7 = vadd.f32 (!%p936_p8), %v1430_v1, %v620_v4  ;;  %v654_v8 = vadd.f32 (!%p936_p8), %v1430_v1, %v621_v5 }
 0x12e   : > { %v486_v17 = vpop.f32.mrb[14].mxu0  ;;  %v542_v18 = vpop.f32.mrb[14].mxu1  ;;  %v622_v6 = vld [vmem:[#allocation2 + $0x20] sm:$0xff] (!%p936_p8)  ;;  %v678_v14 = vmax.f32 (!%p936_p8), %v652_v3, 0.0 }
 0x12f   : > { %594 = vst [vmem:[#allocation2 + $0x30] sm:$0xff] %v568_v13  ;;  %v569_v19 = vmax.f32 %v238_v10, %v486_v17  ;;  %v1121_v20 = vpop.f32.mrb[15].mxu0  ;;  %608 = vst [vmem:[#allocation2 + $0xa0] sm:$0xff] %v582_v15  ;;  %v583_v21 = vmax.f32 %v252_v12, %v542_v18  ;;  %v1149_v22 = vpop.f32.mrb[15].mxu1  ;;  %v655_v10 = vadd.f32 (!%p936_p8), %v1430_v1, %v622_v6  ;;  %v677_v13 = vmax.f32 (!%p936_p8), %v651_v2, 0.0 }
 0x130   : > { %v623_v9 = vld [vmem:[#allocation2 + $0x28] sm:$0xff] (!%p936_p8)  ;;  %v679_v20 = vmax.f32 (!%p936_p8), %v653_v7, 0.0 }
 0x131   : > { %595 = vst [vmem:[#allocation2 + $0x38] sm:$0xff] %v569_v19  ;;  %609 = vst [vmem:[#allocation2 + $0xa8] sm:$0xff] %v583_v21  ;;  %v656_v15 = vadd.f32 (!%p936_p8), %v1430_v1, %v623_v9  ;;  %v680_v21 = vmax.f32 (!%p936_p8), %v654_v8, 0.0  ;;  %v681_v22 = vmax.f32 (!%p936_p8), %v655_v10, 0.0 }
 0x134   : > { %v491_v25 = vpop.f32.mrb[16].mxu0  ;;  %v547_v27 = vpop.f32.mrb[16].mxu1 }
 0x135   : > { %v570_v29 = vmax.f32 %v239_v23, %v491_v25  ;;  %v1124_v30 = vpop.f32.mrb[17].mxu0  ;;  %v584_v31 = vmax.f32 %v253_v24, %v547_v27  ;;  %v1152_v32 = vpop.f32.mrb[17].mxu1  ;;  %v682_v27 = vmax.f32 (!%p936_p8), %v656_v15, 0.0 }
 0x136   : > { %v494_v33 = vpop.f32.mrb[18].mxu0  ;;  %v550_v34 = vpop.f32.mrb[18].mxu1  ;;  %v624_v11 = vld [vmem:[#allocation2 + $0x30] sm:$0xff] (!%p936_p8) }
 0x137   : > { %596 = vst [vmem:[#allocation2 + $0x40] sm:$0xff] %v570_v29  ;;  %v571_v35 = vmax.f32 %v240_v26, %v494_v33  ;;  %v1125_v36 = vpop.f32.mrb[19].mxu0  ;;  %610 = vst [vmem:[#allocation2 + $0xb0] sm:$0xff] %v584_v31  ;;  %v585_v37 = vmax.f32 %v254_v28, %v550_v34  ;;  %v1153_v38 = vpop.f32.mrb[19].mxu1  ;;  %v657_v16 = vadd.f32 (!%p936_p8), %v1430_v1, %v624_v11 }
 0x138   : > { %v625_v12 = vld [vmem:[#allocation2 + $0x38] sm:$0xff] (!%p936_p8)  ;;  %v995_v26 = vpack.c.bf16 (!%p936_p8), %v678_v14, %v677_v13  ;;  %v1000_v31 = vpack.c.bf16 (!%p936_p8), %v680_v21, %v679_v20 }
 0x139   : > { %597 = vst [vmem:[#allocation2 + $0x48] sm:$0xff] %v571_v35  ;;  %611 = vst [vmem:[#allocation2 + $0xb8] sm:$0xff] %v585_v37  ;;  %v658_v23 = vadd.f32 (!%p936_p8), %v1430_v1, %v625_v12  ;;  %v683_v28 = vmax.f32 (!%p936_p8), %v657_v16, 0.0  ;;  %v632_v35 = vld [vmem:[#allocation2 + $0x70] sm:$0xff] (!%p936_p8)  ;;  %v633_v36 = vld [vmem:[#allocation2 + $0x78] sm:$0xff] (!%p936_p8)  ;;  %v1005_v37 = vpack.c.bf16 (!%p936_p8), %v682_v27, %v681_v22 }
 0x13a   : > { %996 = vst [vmem:[%s1339_s27] sm:$0xff] (!%p936_p8), %v995_v26   ;;  %1057 = vst [vmem:[%s1339_s27 + $0x8] sm:$0xff] (!%p936_p8), %v1000_v31  }
 0x13b   : > { %v684_v32 = vmax.f32 (!%p936_p8), %v658_v23, 0.0  ;;  %1058 = vst [vmem:[%s1339_s27 + $0x10] sm:$0xff] (!%p936_p8), %v1005_v37  }
 0x13c   : > { %v499_v41 = vpop.f32.mrb[20].mxu0  ;;  %v555_v43 = vpop.f32.mrb[20].mxu1 }
 0x13d   : > { %v572_v45 = vmax.f32 %v241_v39, %v499_v41  ;;  %v1128_v46 = vpop.f32.mrb[21].mxu0  ;;  %v586_v47 = vmax.f32 %v255_v40, %v555_v43  ;;  %v1156_v48 = vpop.f32.mrb[21].mxu1  ;;  %v634_v41 = vld [vmem:[#allocation2 + $0x80] sm:$0xff] (!%p936_p8)  ;;  %v1010_v43 = vpack.c.bf16 (!%p936_p8), %v684_v32, %v683_v28 }
 0x13e   : > { %v502_v49 = vpop.f32.mrb[22].mxu0  ;;  %v558_v50 = vpop.f32.mrb[22].mxu1  ;;  %v626_v17 = vld [vmem:[#allocation2 + $0x40] sm:$0xff] (!%p936_p8)  ;;  %v640_v63 = vld [vmem:[#allocation2 + $0xb0] sm:$0xff] (!%p936_p8) }
 0x13f   : > { %598 = vst [vmem:[#allocation2 + $0x50] sm:$0xff] %v572_v45  ;;  %v573_v51 = vmax.f32 %v242_v42, %v502_v49  ;;  %v1129_v52 = vpop.f32.mrb[23].mxu0  ;;  %612 = vst [vmem:[#allocation2 + $0xc0] sm:$0xff] %v586_v47  ;;  %v587_v53 = vmax.f32 %v256_v44, %v558_v50  ;;  %v1157_v54 = vpop.f32.mrb[23].mxu1  ;;  %v659_v29 = vadd.f32 (!%p936_p8), %v1430_v1, %v626_v17  ;;  %v635_v42 = vld [vmem:[#allocation2 + $0x88] sm:$0xff] (!%p936_p8)  ;;  %v636_v47 = vld [vmem:[#allocation2 + $0x90] sm:$0xff] (!%p936_p8) }
 0x140   : > { %v627_v18 = vld [vmem:[#allocation2 + $0x48] sm:$0xff] (!%p936_p8)  ;;  %v665_v50 = vadd.f32 (!%p936_p8), %v1430_v1, %v632_v35  ;;  %v637_v52 = vld [vmem:[#allocation2 + $0x98] sm:$0xff] (!%p936_p8)  ;;  %1059 = vst [vmem:[%s1339_s27 + $0x18] sm:$0xff] (!%p936_p8), %v1010_v43   ;;  %v673_v14 = vadd.f32 (!%p936_p8), %v1430_v1, %v640_v63 }
 0x141   : > { %599 = vst [vmem:[#allocation2 + $0x58] sm:$0xff] %v573_v51  ;;  %613 = vst [vmem:[#allocation2 + $0xc8] sm:$0xff] %v587_v53  ;;  %v660_v33 = vadd.f32 (!%p936_p8), %v1430_v1, %v627_v18  ;;  %v685_v38 = vmax.f32 (!%p936_p8), %v659_v29, 0.0  ;;  %v666_v51 = vadd.f32 (!%p936_p8), %v1430_v1, %v633_v36  ;;  %v641_v0 = vld [vmem:[#allocation2 + $0xb8] sm:$0xff] (!%p936_p8)  ;;  %v670_v5 = vadd.f32 (!%p936_p8), %v1430_v1, %v637_v52 }
 0x142   : > { %v674_v15 = vadd.f32 (!%p936_p8), %v1430_v1, %v641_v0  ;;  %v699_v21 = vmax.f32 (!%p936_p8), %v673_v14, 0.0 }
 0x143   : > { %617 = sbr.rel (%p936_p8) target bundleno = 344 (0x158), region = 40  ;;  %v686_v44 = vmax.f32 (!%p936_p8), %v660_v33, 0.0  ;;  %v696_v13 = vmax.f32 (!%p936_p8), %v670_v5, 0.0 }
 0x144   : > { %v507_v56 = vpop.f32.mrb[24].mxu0  ;;  %v700_v22 = vmax.f32 (!%p936_p8), %v674_v15, 0.0 }
 0x145   : > { %v574_v58 = vmax.f32 %v243_v55, %v507_v56  ;;  %v1132_v59 = vpop.f32.mrb[25].mxu0  ;;  %v1015_v53 = vpack.c.bf16 (!%p936_p8), %v686_v44, %v685_v38  ;;  %v667_v55 = vadd.f32 (!%p936_p8), %v1430_v1, %v634_v41  ;;  %v668_v56 = vadd.f32 (!%p936_p8), %v1430_v1, %v635_v42 }
 0x146   : > { %v510_v60 = vpop.f32.mrb[26].mxu0  ;;  %v628_v19 = vld [vmem:[#allocation2 + $0x50] sm:$0xff] (!%p936_p8)  ;;  %v642_v6 = vld [vmem:[#allocation2 + $0xc0] sm:$0xff] (!%p936_p8)  ;;  %v1050_v26 = vpack.c.bf16 (!%p936_p8), %v700_v22, %v699_v21 }
 0x147   : > { %600 = vst [vmem:[#allocation2 + $0x60] sm:$0xff] %v574_v58  ;;  %v575_v61 = vmax.f32 %v244_v57, %v510_v60  ;;  %v1133_v62 = vpop.f32.mrb[27].mxu0  ;;  %v661_v34 = vadd.f32 (!%p936_p8), %v1430_v1, %v628_v19  ;;  %v638_v57 = vld [vmem:[#allocation2 + $0xa0] sm:$0xff] (!%p936_p8)  ;;  %v639_v58 = vld [vmem:[#allocation2 + $0xa8] sm:$0xff] (!%p936_p8)  ;;  %v691_v60 = vmax.f32 (!%p936_p8), %v665_v50, 0.0  ;;  %1060 = vst [vmem:[%s1339_s27 + $0x20] sm:$0xff] (!%p936_p8), %v1015_v53   ;;  %v675_v18 = vadd.f32 (!%p936_p8), %v1430_v1, %v642_v6 }
 0x148   : > { %v629_v24 = vld [vmem:[#allocation2 + $0x58] sm:$0xff] (!%p936_p8)  ;;  %v669_v62 = vadd.f32 (!%p936_p8), %v1430_v1, %v636_v47  ;;  %v693_v3 = vmax.f32 (!%p936_p8), %v667_v55, 0.0  ;;  %v694_v4 = vmax.f32 (!%p936_p8), %v668_v56, 0.0  ;;  %v643_v7 = vld [vmem:[#allocation2 + $0xc8] sm:$0xff] (!%p936_p8)  ;;  %v671_v10 = vadd.f32 (!%p936_p8), %v1430_v1, %v638_v57  ;;  %1067 = vst [vmem:[%s1339_s27 + $0x58] sm:$0xff] (!%p936_p8), %v1050_v26  }
 0x149   : > { %601 = vst [vmem:[#allocation2 + $0x68] sm:$0xff] %v575_v61  ;;  %v662_v39 = vadd.f32 (!%p936_p8), %v1430_v1, %v629_v24  ;;  %v687_v45 = vmax.f32 (!%p936_p8), %v661_v34, 0.0  ;;  %v692_v61 = vmax.f32 (!%p936_p8), %v666_v51, 0.0  ;;  %v672_v11 = vadd.f32 (!%p936_p8), %v1430_v1, %v639_v58 }
 0x14a   : > { %v695_v9 = vmax.f32 %v669_v62, 0.0  ;;  %v1035_v12 = vpack.c.bf16 %v694_v4, %v693_v3  ;;  %v697_v16 = vmax.f32 %v671_v10, 0.0  ;;  %v676_v19 = vadd.f32 %v1430_v1, %v643_v7 }
 0x14b   : > { %v688_v48 = vmax.f32 %v662_v39, 0.0  ;;  %v1030_v8 = vpack.c.bf16 %v692_v61, %v691_v60  ;;  %v698_v17 = vmax.f32 %v672_v11, 0.0  ;;  %v701_v24 = vmax.f32 %v675_v18, 0.0 }
 0x14c   : > { %1064 = vst [vmem:[%s1339_s27 + $0x40] sm:$0xff] %v1035_v12   ;;  %v1040_v20 = vpack.c.bf16 %v696_v13, %v695_v9 }
 0x14d   : > { %v1020_v59 = vpack.c.bf16 %v688_v48, %v687_v45  ;;  %1063 = vst [vmem:[%s1339_s27 + $0x38] sm:$0xff] %v1030_v8   ;;  %v1045_v23 = vpack.c.bf16 %v698_v17, %v697_v16 }
 0x14e   : > { %v630_v25 = vld [vmem:[#allocation2 + $0x60] sm:$0xff]  ;;  %1065 = vst [vmem:[%s1339_s27 + $0x48] sm:$0xff] %v1040_v20  }
 0x14f   : > { %v663_v40 = vadd.f32 %v1430_v1, %v630_v25  ;;  %1061 = vst [vmem:[%s1339_s27 + $0x28] sm:$0xff] %v1020_v59   ;;  %v702_v25 = vmax.f32 %v676_v19, 0.0  ;;  %1066 = vst [vmem:[%s1339_s27 + $0x50] sm:$0xff] %v1045_v23  }
 0x150   : > { %v631_v30 = vld [vmem:[#allocation2 + $0x68] sm:$0xff] }
 0x151   : > { %v664_v46 = vadd.f32 %v1430_v1, %v631_v30  ;;  %v689_v49 = vmax.f32 %v663_v40, 0.0  ;;  %v1055_v27 = vpack.c.bf16 %v702_v25, %v701_v24 }
 0x153   : > { %v690_v54 = vmax.f32 %v664_v46, 0.0  ;;  %1068 = vst [vmem:[%s1339_s27 + $0x60] sm:$0xff] %v1055_v27  }
 0x155   : > { %v1025_v2 = vpack.c.bf16 %v690_v54, %v689_v49 }
 0x157   : > { %1062 = vst [vmem:[%s1339_s27 + $0x30] sm:$0xff] %v1025_v2  }
 0x158 PF: > { %s13_s16 = sadd.s32 1, %s1277_s16   ;;  %s1490_s12 = smov %s1269_s14 }
 0x159   : > { %p10_p9 = scmp.ge.s32.totalorder %s13_s16, 10   ;;  %s1491_s13 = smov %s1273_s15 }
 0x15a   : > { %s1492_s14 = smov %s1495_s17  ;;  %s1493_s15 = smov %s1499_s18 }
 0x15b   :  { %12 = sbr.rel (!%p10_p9) target bundleno = 3 (0x3), region = 70 }

// kernel: lenet_forward.3
= control target key start
LH: loop header
LB: loop body
LE: loop exit
PB: predicated region body
PF: predicated region fallthrough
CT: control target
= control target key end

     0   :  { %s3756_s17 = smov 0   ;;  %s3758_s18 = smov 0   ;;  %s4777_s0 = inlined_call_operand.vmem [shape: bf16[9,9,16,256], index: 0, kind: input, shape index: {}]   ;;  %s4778_s1 = inlined_call_operand.vmem [shape: bf16[256,128], index: 1, kind: input, shape index: {}]   ;;  %s4779_s2 = inlined_call_operand.vmem [shape: f32[1,128], index: 2, kind: input, shape index: {}]   ;;  %s4780_s3 = inlined_call_operand.vmem [shape: bf16[128,512], index: 3, kind: input, shape index: {}]   ;;  %s4781_s4 = inlined_call_operand.vmem [shape: f32[1,512], index: 4, kind: input, shape index: {}]   ;;  %s4782_s5 = inlined_call_operand.vmem [shape: bf16[512,128], index: 5, kind: input, shape index: {}]   ;;  %s4783_s6 = inlined_call_operand.vmem [shape: f32[1,128], index: 6, kind: input, shape index: {}]   ;;  %s4784_s7 = inlined_call_operand.vmem [shape: bf16[128,128], index: 7, kind: input, shape index: {}]   ;;  %s4785_s8 = inlined_call_operand.vmem [shape: f32[1,128], index: 8, kind: input, shape index: {}]   ;;  %s4786_s9 = inlined_call_operand.vmem [shape: bf16[128,128], index: 9, kind: input, shape index: {}]   ;;  %s4787_s10 = inlined_call_operand.vmem [shape: f32[1,128], index: 10, kind: input, shape index: {}]   ;;  %s4788_s11 = inlined_call_operand.vmem [shape: f32[16,128], index: 11, kind: output, shape index: {}]  }
   0x1   :  { %s3760_s19 = smov 0  }
   0x2 LB: > { %s30_s20 = sadd.s32 1, %s3686_s18  ;;  %p3058_p0 = scmp.ge.s32.totalorder %s3690_s19, 1  ;;  %s3690_s19 = sphi %s3760_s19, %s21_s19   ;;  %s3686_s18 = sphi %s3758_s18, %s4790_s18   ;;  %s3682_s17 = sphi %s3756_s17, %s4789_s17  }
   0x3   : > { %p31_p1 = scmp.ge.s32.totalorder %s30_s20, 9  ;;  %p357_p2 = scmp.lt.s32.totalorder %s3690_s19, 10 }
   0x5   : > { %s4792_s20 = smov (%p31_p1, %s30_s20), 0  ;;  %p358_p3 = pnand %p3058_p0, %p357_p2 }
   0x6   : > { %p403_p4 = scmp.lt.s32.totalorder (!%p358_p3), %s3682_s17, 8  ;;  %p3060_p5 = scmp.ne.s32.totalorder (!%p358_p3), %s3682_s17, 0 }
   0x7   : > { %361 = sbr.rel (%p358_p3) target bundleno = 1515 (0x5eb), region = 64 }
   0xe   : > { %s404_s21 = scalar_select %p403_p4, %s3682_s17, 8 }
   0xf   : > { %423 = sbr.rel (%p3060_p5) target bundleno = 25 (0x19), region = 68  ;;  %v3692_v0 = vmov (!%p3060_p5), -inf  }
  0x10   : > { %s3500_s22 = smul.u32 144, %s404_s21  ;;  %424 = vst [vmem:[#allocation2] sm:$0xff] (!%p3060_p5), %v3692_v0  ;;  %425 = vst [vmem:[#allocation2 + $0x8] sm:$0xff] (!%p3060_p5), %v3692_v0 }
  0x11   : > { %426 = vst [vmem:[#allocation2 + $0x10] sm:$0xff] (!%p3060_p5), %v3692_v0  ;;  %427 = vst [vmem:[#allocation2 + $0x18] sm:$0xff] (!%p3060_p5), %v3692_v0 }
  0x12   : > { %s3781_s25 = scalar_lea.vmem %s4777_s0, %s3500_s22  ;;  %428 = vst [vmem:[#allocation2 + $0x20] sm:$0xff] (!%p3060_p5), %v3692_v0  ;;  %429 = vst [vmem:[#allocation2 + $0x28] sm:$0xff] (!%p3060_p5), %v3692_v0 }
  0x13   : > { %430 = vst [vmem:[#allocation2 + $0x30] sm:$0xff] (!%p3060_p5), %v3692_v0  ;;  %431 = vst [vmem:[#allocation2 + $0x38] sm:$0xff] (!%p3060_p5), %v3692_v0 }
  0x14   : > { %432 = vst [vmem:[#allocation2 + $0x40] sm:$0xff] (!%p3060_p5), %v3692_v0  ;;  %433 = vst [vmem:[#allocation2 + $0x48] sm:$0xff] (!%p3060_p5), %v3692_v0 }
  0x15   : > { %434 = vst [vmem:[#allocation2 + $0x50] sm:$0xff] (!%p3060_p5), %v3692_v0  ;;  %435 = vst [vmem:[#allocation2 + $0x58] sm:$0xff] (!%p3060_p5), %v3692_v0 }
  0x16   : > { %436 = vst [vmem:[#allocation2 + $0x60] sm:$0xff] %v3692_v0  ;;  %437 = vst [vmem:[#allocation2 + $0x68] sm:$0xff] %v3692_v0 }
  0x17   : > { %438 = vst [vmem:[#allocation2 + $0x70] sm:$0xff] %v3692_v0  ;;  %439 = vst [vmem:[#allocation2 + $0x78] sm:$0xff] %v3692_v0 }
  0x18   : > { %440 = vst [vmem:[#allocation2 + $0x80] sm:$0xff] %v3692_v0  ;;  %441 = vst [vmem:[#allocation2 + $0x88] sm:$0xff] %v3692_v0 }
  0x19 PF: > { %v3787_v1 = vld [vmem:[%s4778_s1 + $0x40] sm:$0xff]   ;;  %v3798_v3 = vld [vmem:[%s4778_s1 + $0x48] sm:$0xff]   ;;  %v3812_v5 = vld [vmem:[%s4778_s1 + $0x50] sm:$0xff]   ;;  %p3111_p6 = scmp.ne.s32.totalorder %s3682_s17, 8 }
  0x1a   : > { %v3792_v2 = vld [vmem:[%s4778_s1] sm:$0xff]   ;;  %3200 = vmatprep.subr.bf16.mxu0 %v3787_v1  ;;  %3222 = vmatprep.subr.bf16.mxu1 %v3787_v1  ;;  %v3805_v4 = vld [vmem:[%s4778_s1 + $0x8] sm:$0xff]   ;;  %v3819_v6 = vld [vmem:[%s4778_s1 + $0x10] sm:$0xff]   ;;  %vm3695_vm0 = vmmov (!%p3111_p6), 0  }
  0x1b   : > { %3201 = vmatpush3.bf16.msra.mxu0 %v3792_v2  ;;  %3223 = vmatpush3.bf16.msra.mxu1 %v3792_v2  ;;  %v3826_v7 = vld [vmem:[%s4778_s1 + $0x58] sm:$0xff]   ;;  %v3840_v9 = vld [vmem:[%s4778_s1 + $0x60] sm:$0xff]   ;;  %v3854_v11 = vld [vmem:[%s4778_s1 + $0x68] sm:$0xff]  }
  0x1c   : > { %3202 = vmatprep.subr.bf16.mxu0 %v3798_v3  ;;  %3224 = vmatprep.subr.bf16.mxu1 %v3798_v3  ;;  %v3833_v8 = vld [vmem:[%s4778_s1 + $0x18] sm:$0xff]   ;;  %v3847_v10 = vld [vmem:[%s4778_s1 + $0x20] sm:$0xff]   ;;  %v3863_v14 = vld [vmem:[%s4778_s1 + $0x28] sm:$0xff]  }
  0x1d   : > { %v3547_v12 = vld [vmem:[%s3781_s25 + $0x4] ss:$8 sps:$4 sm:$0xff]   ;;  %v3550_v13 = vld [vmem:[%s3781_s25 + $0x14] ss:$8 sps:$4 sm:$0xff]   ;;  %v3545_v19 = vld [vmem:[%s3781_s25] ss:$8 sps:$4 sm:$0xff]  }
  0x1e   : > { %616 = vmatprep.mubr.bf16.mxu0 %v3547_v12  ;;  %v3869_v15 = vld [vmem:[%s4778_s1 + $0x70] sm:$0xff]   ;;  %677 = vmatprep.mubr.bf16.mxu1 %v3550_v13  ;;  %v3883_v17 = vld [vmem:[%s4778_s1 + $0x78] sm:$0xff]   ;;  %v3553_v21 = vld [vmem:[%s3781_s25 + $0x24] ss:$8 sps:$4 sm:$0xff]  }
  0x1f   : > { %3203 = vmatpush3.bf16.msra.mxu0 %v3805_v4  ;;  %3225 = vmatpush3.bf16.msra.mxu1 %v3805_v4  ;;  %v3877_v16 = vld [vmem:[%s4778_s1 + $0x30] sm:$0xff]   ;;  %v3891_v18 = vld [vmem:[%s4778_s1 + $0x38] sm:$0xff]   ;;  %v3551_v23 = vld [vmem:[%s3781_s25 + $0x20] ss:$8 sps:$4 sm:$0xff]  }
  0x20   : > { %3204 = vmatprep.subr.bf16.mxu0 %v3812_v5  ;;  %3226 = vmatprep.subr.bf16.mxu1 %v3812_v5  ;;  %v3548_v20 = vld [vmem:[%s3781_s25 + $0x10] ss:$8 sps:$4 sm:$0xff]   ;;  %v3556_v22 = vld [vmem:[%s3781_s25 + $0x34] ss:$8 sps:$4 sm:$0xff]   ;;  %v3559_v25 = vld [vmem:[%s3781_s25 + $0x44] ss:$8 sps:$4 sm:$0xff]  }
  0x21   : > { %v3554_v24 = vld [vmem:[%s3781_s25 + $0x30] ss:$8 sps:$4 sm:$0xff]   ;;  %v3562_v26 = vld [vmem:[%s3781_s25 + $0x54] ss:$8 sps:$4 sm:$0xff]   ;;  %v3557_v27 = vld [vmem:[%s3781_s25 + $0x40] ss:$8 sps:$4 sm:$0xff]  }
  0x22   : > { %v3560_v28 = vld [vmem:[%s3781_s25 + $0x50] ss:$8 sps:$4 sm:$0xff]   ;;  %v3565_v29 = vld [vmem:[%s3781_s25 + $0x64] ss:$8 sps:$4 sm:$0xff]   ;;  %v3568_v30 = vld [vmem:[%s3781_s25 + $0x74] ss:$8 sps:$4 sm:$0xff]  }
  0x23   : > { %3205 = vmatpush3.bf16.msra.mxu0 %v3819_v6  ;;  %3227 = vmatpush3.bf16.msra.mxu1 %v3819_v6  ;;  %v3563_v31 = vld [vmem:[%s3781_s25 + $0x60] ss:$8 sps:$4 sm:$0xff]   ;;  %v3566_v32 = vld [vmem:[%s3781_s25 + $0x70] ss:$8 sps:$4 sm:$0xff]   ;;  %v3571_v33 = vld [vmem:[%s3781_s25 + $0x84] ss:$8 sps:$4 sm:$0xff]  }
  0x24   : > { %3206 = vmatprep.subr.bf16.mxu0 %v3826_v7  ;;  %3228 = vmatprep.subr.bf16.mxu1 %v3826_v7  ;;  %v3569_v34 = vld [vmem:[%s3781_s25 + $0x80] ss:$8 sps:$4 sm:$0xff]   ;;  %v630_v41 = vld [vmem:[#allocation2 + $0x10] sm:$0xff]  ;;  %v631_v49 = vld [vmem:[#allocation2 + $0x18] sm:$0xff] }
  0x25   : > { %v474_v36 = vld [vmem:[#allocation2] sm:$0xff]  ;;  %v475_v43 = vld [vmem:[#allocation2 + $0x8] sm:$0xff]  ;;  %v752_v61 = vld [vmem:[#allocation2 + $0x30] sm:$0xff] }
  0x26   : > { %v691_v56 = vld [vmem:[#allocation2 + $0x20] sm:$0xff]  ;;  %v692_v63 = vld [vmem:[#allocation2 + $0x28] sm:$0xff] }
  0x27   : > { %3207 = vmatpush3.bf16.msra.mxu0 %v3833_v8  ;;  %3229 = vmatpush3.bf16.msra.mxu1 %v3833_v8  ;;  %v813_v12 = vld [vmem:[#allocation2 + $0x40] sm:$0xff] }
  0x28   : > { %3208 = vmatprep.subr.bf16.mxu0 %v3840_v9  ;;  %3230 = vmatprep.subr.bf16.mxu1 %v3840_v9 }
  0x2b   : > { %3209 = vmatpush3.bf16.msra.mxu0 %v3847_v10  ;;  %3231 = vmatpush3.bf16.msra.mxu1 %v3847_v10 }
  0x2c   : > { %3210 = vmatprep.subr.bf16.mxu0 %v3854_v11  ;;  %3232 = vmatprep.subr.bf16.mxu1 %v3854_v11 }
  0x2f   : > { %3211 = vmatpush3.bf16.msra.mxu0 %v3863_v14  ;;  %3233 = vmatpush3.bf16.msra.mxu1 %v3863_v14 }
  0x30   : > { %3212 = vmatprep.subr.bf16.mxu0 %v3869_v15  ;;  %3234 = vmatprep.subr.bf16.mxu1 %v3869_v15 }
  0x33   : > { %3213 = vmatpush3.bf16.msra.mxu0 %v3877_v16  ;;  %3235 = vmatpush3.bf16.msra.mxu1 %v3877_v16 }
  0x34   : > { %3214 = vmatprep.subr.bf16.mxu0 %v3883_v17  ;;  %3236 = vmatprep.subr.bf16.mxu1 %v3883_v17 }
  0x37   : > { %3215 = vmatpush3.bf16.msra.mxu0 %v3891_v18  ;;  %3237 = vmatpush3.bf16.msra.mxu1 %v3891_v18 }
  0x38   : > { %3244 = vmatprep.subr.bf16.mxu0 %v3787_v1  ;;  %3266 = vmatprep.subr.bf16.mxu1 %v3787_v1 }
  0x3a   : > { %617 = vmatmul.mubr.bf16.vlgmr.msra.gmra.mrb[0].mxu0 %v3545_v19  ;;  %678 = vmatmul.mubr.bf16.vlgmr.msra.gmra.mrb[0].mxu1 %v3548_v20  ;;  %v814_v19 = vld [vmem:[#allocation2 + $0x48] sm:$0xff] }
  0x3b   : > { %3245 = vmatpush3.bf16.msra.mxu0 %v3792_v2  ;;  %3267 = vmatpush3.bf16.msra.mxu1 %v3792_v2 }
  0x3c   : > { %3246 = vmatprep.subr.bf16.mxu0 %v3798_v3  ;;  %738 = vmatprep.mubr.bf16.mxu0 %v3553_v21 }
  0x3d   : > { %3268 = vmatprep.subr.bf16.mxu1 %v3798_v3  ;;  %799 = vmatprep.mubr.bf16.mxu1 %v3556_v22 }
  0x3f   : > { %3247 = vmatpush3.bf16.msra.mxu0 %v3805_v4  ;;  %3269 = vmatpush3.bf16.msra.mxu1 %v3805_v4 }
  0x40   : > { %3248 = vmatprep.subr.bf16.mxu0 %v3812_v5  ;;  %3270 = vmatprep.subr.bf16.mxu1 %v3812_v5 }
  0x43   : > { %3249 = vmatpush3.bf16.msra.mxu0 %v3819_v6  ;;  %3271 = vmatpush3.bf16.msra.mxu1 %v3819_v6 }
  0x44   : > { %3250 = vmatprep.subr.bf16.mxu0 %v3826_v7  ;;  %3272 = vmatprep.subr.bf16.mxu1 %v3826_v7 }
  0x47   : > { %3251 = vmatpush3.bf16.msra.mxu0 %v3833_v8  ;;  %3273 = vmatpush3.bf16.msra.mxu1 %v3833_v8 }
  0x48   : > { %3252 = vmatprep.subr.bf16.mxu0 %v3840_v9  ;;  %3274 = vmatprep.subr.bf16.mxu1 %v3840_v9 }
  0x4b   : > { %3253 = vmatpush3.bf16.msra.mxu0 %v3847_v10  ;;  %3275 = vmatpush3.bf16.msra.mxu1 %v3847_v10 }
  0x4c   : > { %3254 = vmatprep.subr.bf16.mxu0 %v3854_v11  ;;  %3276 = vmatprep.subr.bf16.mxu1 %v3854_v11 }
  0x4f   : > { %3255 = vmatpush3.bf16.msra.mxu0 %v3863_v14  ;;  %3277 = vmatpush3.bf16.msra.mxu1 %v3863_v14 }
  0x50   : > { %3256 = vmatprep.subr.bf16.mxu0 %v3869_v15  ;;  %3278 = vmatprep.subr.bf16.mxu1 %v3869_v15 }
  0x53   : > { %3257 = vmatpush3.bf16.msra.mxu0 %v3877_v16  ;;  %3279 = vmatpush3.bf16.msra.mxu1 %v3877_v16 }
  0x54   : > { %3258 = vmatprep.subr.bf16.mxu0 %v3883_v17  ;;  %3280 = vmatprep.subr.bf16.mxu1 %v3883_v17 }
  0x57   : > { %3259 = vmatpush3.bf16.msra.mxu0 %v3891_v18  ;;  %3281 = vmatpush3.bf16.msra.mxu1 %v3891_v18 }
  0x58   : > { %3288 = vmatprep.subr.bf16.mxu0 %v3787_v1  ;;  %3310 = vmatprep.subr.bf16.mxu1 %v3787_v1 }
  0x5a   : > { %739 = vmatmul.mubr.bf16.vlgmr.msra.gmra.mrb[4].mxu0 %v3551_v23  ;;  %800 = vmatmul.mubr.bf16.vlgmr.msra.gmra.mrb[4].mxu1 %v3554_v24 }
  0x5b   : > { %3289 = vmatpush3.bf16.msra.mxu0 %v3792_v2  ;;  %3311 = vmatpush3.bf16.msra.mxu1 %v3792_v2 }
  0x5c   : > { %3290 = vmatprep.subr.bf16.mxu0 %v3798_v3  ;;  %860 = vmatprep.mubr.bf16.mxu0 %v3559_v25  ;;  %v875_v25 = vld [vmem:[#allocation2 + $0x58] sm:$0xff] }
  0x5d   : > { %3312 = vmatprep.subr.bf16.mxu1 %v3798_v3  ;;  %921 = vmatprep.mubr.bf16.mxu1 %v3562_v26 }
  0x5f   : > { %3291 = vmatpush3.bf16.msra.mxu0 %v3805_v4  ;;  %3313 = vmatpush3.bf16.msra.mxu1 %v3805_v4 }
  0x60   : > { %3292 = vmatprep.subr.bf16.mxu0 %v3812_v5  ;;  %3314 = vmatprep.subr.bf16.mxu1 %v3812_v5 }
  0x63   : > { %3293 = vmatpush3.bf16.msra.mxu0 %v3819_v6  ;;  %3315 = vmatpush3.bf16.msra.mxu1 %v3819_v6 }
  0x64   : > { %3294 = vmatprep.subr.bf16.mxu0 %v3826_v7  ;;  %3316 = vmatprep.subr.bf16.mxu1 %v3826_v7 }
  0x67   : > { %3295 = vmatpush3.bf16.msra.mxu0 %v3833_v8  ;;  %3317 = vmatpush3.bf16.msra.mxu1 %v3833_v8 }
  0x68   : > { %3296 = vmatprep.subr.bf16.mxu0 %v3840_v9  ;;  %3318 = vmatprep.subr.bf16.mxu1 %v3840_v9 }
  0x6b   : > { %3297 = vmatpush3.bf16.msra.mxu0 %v3847_v10  ;;  %3319 = vmatpush3.bf16.msra.mxu1 %v3847_v10 }
  0x6c   : > { %3298 = vmatprep.subr.bf16.mxu0 %v3854_v11  ;;  %3320 = vmatprep.subr.bf16.mxu1 %v3854_v11 }
  0x6f   : > { %3299 = vmatpush3.bf16.msra.mxu0 %v3863_v14  ;;  %3321 = vmatpush3.bf16.msra.mxu1 %v3863_v14 }
  0x70   : > { %3300 = vmatprep.subr.bf16.mxu0 %v3869_v15  ;;  %3322 = vmatprep.subr.bf16.mxu1 %v3869_v15 }
  0x73   : > { %3301 = vmatpush3.bf16.msra.mxu0 %v3877_v16  ;;  %3323 = vmatpush3.bf16.msra.mxu1 %v3877_v16 }
  0x74   : > { %3302 = vmatprep.subr.bf16.mxu0 %v3883_v17  ;;  %3324 = vmatprep.subr.bf16.mxu1 %v3883_v17 }
  0x77   : > { %3303 = vmatpush3.bf16.msra.mxu0 %v3891_v18  ;;  %3325 = vmatpush3.bf16.msra.mxu1 %v3891_v18 }
  0x78   : > { %3332 = vmatprep.subr.bf16.mxu0 %v3787_v1  ;;  %3354 = vmatprep.subr.bf16.mxu1 %v3787_v1 }
  0x7a   : > { %861 = vmatmul.mubr.bf16.vlgmr.msra.gmra.mrb[8].mxu0 %v3557_v27  ;;  %922 = vmatmul.mubr.bf16.vlgmr.msra.gmra.mrb[8].mxu1 %v3560_v28 }
  0x7b   : > { %3333 = vmatpush3.bf16.msra.mxu0 %v3792_v2  ;;  %3355 = vmatpush3.bf16.msra.mxu1 %v3792_v2 }
  0x7c   : > { %3334 = vmatprep.subr.bf16.mxu0 %v3798_v3  ;;  %982 = vmatprep.mubr.bf16.mxu0 %v3565_v29 }
  0x7d   : > { %3356 = vmatprep.subr.bf16.mxu1 %v3798_v3  ;;  %1043 = vmatprep.mubr.bf16.mxu1 %v3568_v30 }
  0x7f   : > { %3335 = vmatpush3.bf16.msra.mxu0 %v3805_v4  ;;  %3357 = vmatpush3.bf16.msra.mxu1 %v3805_v4 }
  0x80   : > { %3336 = vmatprep.subr.bf16.mxu0 %v3812_v5  ;;  %3358 = vmatprep.subr.bf16.mxu1 %v3812_v5 }
  0x83   : > { %3337 = vmatpush3.bf16.msra.mxu0 %v3819_v6  ;;  %3359 = vmatpush3.bf16.msra.mxu1 %v3819_v6 }
  0x84   : > { %3338 = vmatprep.subr.bf16.mxu0 %v3826_v7  ;;  %3360 = vmatprep.subr.bf16.mxu1 %v3826_v7 }
  0x87   : > { %3339 = vmatpush3.bf16.msra.mxu0 %v3833_v8  ;;  %3361 = vmatpush3.bf16.msra.mxu1 %v3833_v8 }
  0x88   : > { %3340 = vmatprep.subr.bf16.mxu0 %v3840_v9  ;;  %3362 = vmatprep.subr.bf16.mxu1 %v3840_v9 }
  0x8b   : > { %3341 = vmatpush3.bf16.msra.mxu0 %v3847_v10  ;;  %3363 = vmatpush3.bf16.msra.mxu1 %v3847_v10 }
  0x8c   : > { %3342 = vmatprep.subr.bf16.mxu0 %v3854_v11  ;;  %3364 = vmatprep.subr.bf16.mxu1 %v3854_v11 }
  0x8f   : > { %3343 = vmatpush3.bf16.msra.mxu0 %v3863_v14  ;;  %3365 = vmatpush3.bf16.msra.mxu1 %v3863_v14 }
  0x90   : > { %3344 = vmatprep.subr.bf16.mxu0 %v3869_v15  ;;  %3366 = vmatprep.subr.bf16.mxu1 %v3869_v15 }
  0x93   : > { %3345 = vmatpush3.bf16.msra.mxu0 %v3877_v16  ;;  %3367 = vmatpush3.bf16.msra.mxu1 %v3877_v16 }
  0x94   : > { %3346 = vmatprep.subr.bf16.mxu0 %v3883_v17  ;;  %3368 = vmatprep.subr.bf16.mxu1 %v3883_v17 }
  0x97   : > { %3347 = vmatpush3.bf16.msra.mxu0 %v3891_v18  ;;  %3369 = vmatpush3.bf16.msra.mxu1 %v3891_v18 }
  0x98   : > { %3376 = vmatprep.subr.bf16.mxu0 %v3787_v1 }
  0x9a   : > { %983 = vmatmul.mubr.bf16.vlgmr.msra.gmra.mrb[12].mxu0 %v3563_v31  ;;  %1044 = vmatmul.mubr.bf16.vlgmr.msra.gmra.mrb[12].mxu1 %v3566_v32  ;;  %v935_v32 = vld [vmem:[#allocation2 + $0x60] sm:$0xff] }
  0x9b   : > { %3377 = vmatpush3.bf16.msra.mxu0 %v3792_v2  ;;  %1104 = vmatprep.mubr.bf16.mxu0 %v3571_v33 }
  0x9c   : > { %3378 = vmatprep.subr.bf16.mxu0 %v3798_v3 }
  0x9f   : > { %3379 = vmatpush3.bf16.msra.mxu0 %v3805_v4 }
  0xa0   : > { %3380 = vmatprep.subr.bf16.mxu0 %v3812_v5  ;;  %v753_v5 = vld [vmem:[#allocation2 + $0x38] sm:$0xff] }
  0xa3   : > { %3381 = vmatpush3.bf16.msra.mxu0 %v3819_v6 }
  0xa4   : > { %3382 = vmatprep.subr.bf16.mxu0 %v3826_v7 }
  0xa7   : > { %3383 = vmatpush3.bf16.msra.mxu0 %v3833_v8 }
  0xa8   : > { %3384 = vmatprep.subr.bf16.mxu0 %v3840_v9 }
  0xab   : > { %3385 = vmatpush3.bf16.msra.mxu0 %v3847_v10 }
  0xac   : > { %3386 = vmatprep.subr.bf16.mxu0 %v3854_v11 }
  0xaf   : > { %3387 = vmatpush3.bf16.msra.mxu0 %v3863_v14 }
  0xb0   : > { %3388 = vmatprep.subr.bf16.mxu0 %v3869_v15 }
  0xb3   : > { %3389 = vmatpush3.bf16.msra.mxu0 %v3877_v16 }
  0xb4   : > { %3390 = vmatprep.subr.bf16.mxu0 %v3883_v17  ;;  %v874_v17 = vld [vmem:[#allocation2 + $0x50] sm:$0xff] }
  0xb7   : > { %3391 = vmatpush3.bf16.msra.mxu0 %v3891_v18 }
  0xba   : > { %1105 = vmatmul.mubr.bf16.vlgmr.msra.gmra.mrb[16].mxu0 %v3569_v34 }
 0x10d   : > { %v3216_v35 = vpop.f32.mrb[0].mxu0  ;;  %v3238_v38 = vpop.f32.mrb[0].mxu1 }
 0x10e   : > { %v3217_v37 = vpop.f32.mrb[1].mxu0  ;;  %v3239_v42 = vpop.f32.mrb[1].mxu1 }
 0x10f   : > { %v3218_v39 = vadd.f32 %v3217_v37, %v3216_v35  ;;  %v3219_v40 = vpop.f32.mrb[2].mxu0  ;;  %v3240_v45 = vadd.f32 %v3239_v42, %v3238_v38  ;;  %v3241_v46 = vpop.f32.mrb[2].mxu1  ;;  %v996_v37 = vld [vmem:[#allocation2 + $0x70] sm:$0xff] }
 0x110   : > { %v3220_v44 = vpop.f32.mrb[3].mxu0  ;;  %v3242_v50 = vpop.f32.mrb[3].mxu1 }
 0x111   : > { %v625_v47 = vmax.f32 %v474_v36, %v3218_v39  ;;  %v3221_v48 = vadd.f32 %v3220_v44, %v3219_v40  ;;  %v686_v51 = vmax.f32 %v630_v41, %v3240_v45  ;;  %v3243_v52 = vadd.f32 %v3242_v50, %v3241_v46  ;;  %v936_v39 = vld [vmem:[#allocation2 + $0x68] sm:$0xff]  ;;  %v997_v45 = vld [vmem:[#allocation2 + $0x78] sm:$0xff] }
 0x113   : > { %627 = vst [vmem:[#allocation2] sm:$0xff] %v625_v47  ;;  %v626_v53 = vmax.f32 %v475_v43, %v3221_v48  ;;  %688 = vst [vmem:[#allocation2 + $0x10] sm:$0xff] %v686_v51  ;;  %v687_v54 = vmax.f32 %v631_v49, %v3243_v52  ;;  %v1057_v52 = vld [vmem:[#allocation2 + $0x80] sm:$0xff] }
 0x115   : > { %628 = vst [vmem:[#allocation2 + $0x8] sm:$0xff] %v626_v53  ;;  %689 = vst [vmem:[#allocation2 + $0x18] sm:$0xff] %v687_v54 }
 0x12d   : > { %v3260_v55 = vpop.f32.mrb[4].mxu0  ;;  %v3282_v58 = vpop.f32.mrb[4].mxu1 }
 0x12e   : > { %v3261_v57 = vpop.f32.mrb[5].mxu0  ;;  %v3283_v62 = vpop.f32.mrb[5].mxu1 }
 0x12f   : > { %v3262_v59 = vadd.f32 %v3261_v57, %v3260_v55  ;;  %v3263_v60 = vpop.f32.mrb[6].mxu0  ;;  %v3284_v1 = vadd.f32 %v3283_v62, %v3282_v58  ;;  %v3285_v2 = vpop.f32.mrb[6].mxu1  ;;  %v4035_v62 = vld [vmem:[%s4780_s3 + $0xc] ss:$16 sps:$4 sm:$0xff] (!%p3111_p6)  }
 0x130   : > { %v3264_v0 = vpop.f32.mrb[7].mxu0  ;;  %v3286_v6 = vpop.f32.mrb[7].mxu1  ;;  %1370 = vmatprep.subr.bf16.mxu1 (!%p3111_p6), %v4035_v62 }
 0x131   : > { %v747_v3 = vmax.f32 %v691_v56, %v3262_v59  ;;  %v3265_v4 = vadd.f32 %v3264_v0, %v3263_v60  ;;  %v808_v7 = vmax.f32 %v752_v61, %v3284_v1  ;;  %v3287_v8 = vadd.f32 %v3286_v6, %v3285_v2  ;;  %v1058_v56 = vld [vmem:[#allocation2 + $0x88] sm:$0xff]  ;;  %v4030_v61 = vld [vmem:[%s4780_s3 + $0x4] ss:$16 sps:$4 sm:$0xff] (!%p3111_p6)   ;;  %v4043_v0 = vld [vmem:[%s4780_s3] ss:$16 sps:$4 sm:$0xff] (!%p3111_p6)  }
 0x132   : > { %1327 = vmatprep.subr.bf16.mxu0 (!%p3111_p6), %v4030_v61  ;;  %v4048_v1 = vld [vmem:[%s4780_s3 + $0x8] ss:$16 sps:$4 sm:$0xff] (!%p3111_p6)   ;;  %v4054_v2 = vld [vmem:[%s4780_s3 + $0x24] ss:$16 sps:$4 sm:$0xff] (!%p3111_p6)  }
 0x133   : > { %749 = vst [vmem:[#allocation2 + $0x20] sm:$0xff] %v747_v3  ;;  %v748_v9 = vmax.f32 %v692_v63, %v3265_v4  ;;  %810 = vst [vmem:[#allocation2 + $0x30] sm:$0xff] %v808_v7  ;;  %v809_v10 = vmax.f32 %v753_v5, %v3287_v8  ;;  %v3693_v63 = vmov (!%p3111_p6), 0   ;;  %1328 = vmatpush1.bf16.msra.mxu0 (!%p3111_p6), %v4043_v0  ;;  %1371 = vmatpush1.bf16.msra.mxu1 (!%p3111_p6), %v4048_v1  ;;  %v4061_v3 = vld [vmem:[%s4780_s3 + $0x2c] ss:$16 sps:$4 sm:$0xff] (!%p3111_p6)  }
 0x134   : > { %1359 = vmatprep.mubr.bf16.mxu0 (!%p3111_p6), %v3693_v63  ;;  %1402 = vmatprep.mubr.bf16.mxu1 (!%p3111_p6), %v3693_v63  ;;  %v4066_v4 = vld [vmem:[%s4780_s3 + $0x20] ss:$16 sps:$4 sm:$0xff] (!%p3111_p6)   ;;  %v4072_v5 = vld [vmem:[%s4780_s3 + $0x28] ss:$16 sps:$4 sm:$0xff] (!%p3111_p6)   ;;  %v4078_v6 = vld [vmem:[%s4780_s3 + $0x44] ss:$16 sps:$4 sm:$0xff] (!%p3111_p6)  }
 0x135   : > { %750 = vst [vmem:[#allocation2 + $0x28] sm:$0xff] %v748_v9  ;;  %811 = vst [vmem:[#allocation2 + $0x38] sm:$0xff] %v809_v10  ;;  %1329 = vmatprep.subr.bf16.mxu0 (!%p3111_p6), %v4054_v2  ;;  %1372 = vmatprep.subr.bf16.mxu1 (!%p3111_p6), %v4061_v3  ;;  %v4083_v7 = vld [vmem:[%s4780_s3 + $0x4c] ss:$16 sps:$4 sm:$0xff] (!%p3111_p6)   ;;  %v4088_v8 = vld [vmem:[%s4780_s3 + $0x40] ss:$16 sps:$4 sm:$0xff] (!%p3111_p6)  }
 0x136   : > { %v4093_v9 = vld [vmem:[%s4780_s3 + $0x48] ss:$16 sps:$4 sm:$0xff] (!%p3111_p6)   ;;  %v4100_v10 = vld [vmem:[%s4780_s3 + $0x64] ss:$16 sps:$4 sm:$0xff] (!%p3111_p6)  }
 0x137   : > { %1330 = vmatpush1.bf16.msra.mxu0 (!%p3111_p6), %v4066_v4  ;;  %1373 = vmatpush1.bf16.msra.mxu1 (!%p3111_p6), %v4072_v5 }
 0x138   : > { %1331 = vmatprep.subr.bf16.mxu0 (!%p3111_p6), %v4078_v6  ;;  %1374 = vmatprep.subr.bf16.mxu1 (!%p3111_p6), %v4083_v7 }
 0x13b   : > { %1332 = vmatpush1.bf16.msra.mxu0 (!%p3111_p6), %v4088_v8  ;;  %1375 = vmatpush1.bf16.msra.mxu1 (!%p3111_p6), %v4093_v9 }
 0x13c   : > { %1333 = vmatprep.subr.bf16.mxu0 (!%p3111_p6), %v4100_v10 }
 0x14d   : > { %v3304_v11 = vpop.f32.mrb[8].mxu0  ;;  %v3326_v14 = vpop.f32.mrb[8].mxu1 }
 0x14e   : > { %v3305_v13 = vpop.f32.mrb[9].mxu0  ;;  %v3327_v18 = vpop.f32.mrb[9].mxu1 }
 0x14f   : > { %v3306_v15 = vadd.f32 %v3305_v13, %v3304_v11  ;;  %v3307_v16 = vpop.f32.mrb[10].mxu0  ;;  %v3328_v21 = vadd.f32 %v3327_v18, %v3326_v14  ;;  %v3329_v22 = vpop.f32.mrb[10].mxu1  ;;  %v4107_v11 = vld [vmem:[%s4780_s3 + $0x6c] ss:$16 sps:$4 sm:$0xff] (!%p3111_p6)   ;;  %v4119_v13 = vld [vmem:[%s4780_s3 + $0x68] ss:$16 sps:$4 sm:$0xff] (!%p3111_p6)  }
 0x150   : > { %v3308_v20 = vpop.f32.mrb[11].mxu0  ;;  %v3330_v26 = vpop.f32.mrb[11].mxu1  ;;  %v4124_v14 = vld [vmem:[%s4780_s3 + $0x84] ss:$16 sps:$4 sm:$0xff] (!%p3111_p6)   ;;  %1376 = vmatprep.subr.bf16.mxu1 (!%p3111_p6), %v4107_v11 }
 0x151   : > { %v869_v23 = vmax.f32 %v813_v12, %v3306_v15  ;;  %v3309_v24 = vadd.f32 %v3308_v20, %v3307_v16  ;;  %v930_v27 = vmax.f32 %v874_v17, %v3328_v21  ;;  %v3331_v28 = vadd.f32 %v3330_v26, %v3329_v22  ;;  %v4112_v12 = vld [vmem:[%s4780_s3 + $0x60] ss:$16 sps:$4 sm:$0xff] (!%p3111_p6)   ;;  %v4131_v15 = vld [vmem:[%s4780_s3 + $0x8c] ss:$16 sps:$4 sm:$0xff] (!%p3111_p6)   ;;  %v4141_v17 = vld [vmem:[%s4780_s3 + $0x88] ss:$16 sps:$4 sm:$0xff] (!%p3111_p6)   ;;  %1377 = vmatpush1.bf16.msra.mxu1 (!%p3111_p6), %v4119_v13 }
 0x152   : > { %v4136_v16 = vld [vmem:[%s4780_s3 + $0x80] ss:$16 sps:$4 sm:$0xff] (!%p3111_p6)   ;;  %1334 = vmatpush1.bf16.msra.mxu0 (!%p3111_p6), %v4112_v12  ;;  %v4148_v18 = vld [vmem:[%s4780_s3 + $0xa4] ss:$16 sps:$4 sm:$0xff] (!%p3111_p6)   ;;  %1378 = vmatprep.subr.bf16.mxu1 (!%p3111_p6), %v4131_v15  ;;  %v4167_v21 = vld [vmem:[%s4780_s3 + $0xa8] ss:$16 sps:$4 sm:$0xff] (!%p3111_p6)  }
 0x153   : > { %871 = vst [vmem:[#allocation2 + $0x40] sm:$0xff] %v869_v23  ;;  %v870_v29 = vmax.f32 %v814_v19, %v3309_v24  ;;  %932 = vst [vmem:[#allocation2 + $0x50] sm:$0xff] %v930_v27  ;;  %v931_v30 = vmax.f32 %v875_v25, %v3331_v28  ;;  %1335 = vmatprep.subr.bf16.mxu0 (!%p3111_p6), %v4124_v14  ;;  %v4155_v19 = vld [vmem:[%s4780_s3 + $0xac] ss:$16 sps:$4 sm:$0xff] (!%p3111_p6)   ;;  %v4160_v20 = vld [vmem:[%s4780_s3 + $0xa0] ss:$16 sps:$4 sm:$0xff] (!%p3111_p6)  }
 0x154   : > { %v4172_v22 = vld [vmem:[%s4780_s3 + $0xc4] ss:$16 sps:$4 sm:$0xff] (!%p3111_p6)   ;;  %v4179_v23 = vld [vmem:[%s4780_s3 + $0xcc] ss:$16 sps:$4 sm:$0xff] (!%p3111_p6)   ;;  %v4184_v24 = vld [vmem:[%s4779_s2] ss:$0 sm:$0xff] (!%p3111_p6) }
 0x155   : > { %872 = vst [vmem:[#allocation2 + $0x48] sm:$0xff] %v870_v29  ;;  %933 = vst [vmem:[#allocation2 + $0x58] sm:$0xff] %v931_v30  ;;  %1379 = vmatpush1.bf16.msra.mxu1 (!%p3111_p6), %v4141_v17  ;;  %v1154_v25 = vld [vmem:[#allocation2] sm:$0xff] (!%p3111_p6)  ;;  %v1155_v26 = vld [vmem:[#allocation2 + $0x8] sm:$0xff] (!%p3111_p6) }
 0x156   : > { %1336 = vmatpush1.bf16.msra.mxu0 (!%p3111_p6), %v4136_v16  ;;  %1380 = vmatprep.subr.bf16.mxu1 (!%p3111_p6), %v4155_v19  ;;  %v4189_v27 = vld [vmem:[%s4780_s3 + $0xc0] ss:$16 sps:$4 sm:$0xff] (!%p3111_p6)   ;;  %v1162_v28 = vadd.f32 (!%p3111_p6), %v4184_v24, %v1154_v25  ;;  %v1163_v29 = vadd.f32 (!%p3111_p6), %v4184_v24, %v1155_v26  ;;  %v4198_v30 = vld [vmem:[%s4780_s3 + $0xc8] ss:$16 sps:$4 sm:$0xff] (!%p3111_p6)  }
 0x157   : > { %1337 = vmatprep.subr.bf16.mxu0 (!%p3111_p6), %v4148_v18 }
 0x159   : > { %1381 = vmatpush1.bf16.msra.mxu1 (!%p3111_p6), %v4167_v21 }
 0x15a   : > { %1338 = vmatpush1.bf16.msra.mxu0 (!%p3111_p6), %v4160_v20  ;;  %1382 = vmatprep.subr.bf16.mxu1 (!%p3111_p6), %v4179_v23 }
 0x15b   : > { %1339 = vmatprep.subr.bf16.mxu0 (!%p3111_p6), %v4172_v22 }
 0x15d   : > { %1383 = vmatpush1.bf16.msra.mxu1 (!%p3111_p6), %v4198_v30 }
 0x15e   : > { %1340 = vmatpush1.bf16.msra.mxu0 (!%p3111_p6), %v4189_v27 }
 0x16d   : > { %v3348_v31 = vpop.f32.mrb[12].mxu0  ;;  %v3370_v34 = vpop.f32.mrb[12].mxu1 }
 0x16e   : > { %v3349_v33 = vpop.f32.mrb[13].mxu0  ;;  %v3371_v38 = vpop.f32.mrb[13].mxu1 }
 0x16f   : > { %v3350_v35 = vadd.f32 %v3349_v33, %v3348_v31  ;;  %v3351_v36 = vpop.f32.mrb[14].mxu0  ;;  %v3372_v41 = vadd.f32 %v3371_v38, %v3370_v34  ;;  %v3373_v42 = vpop.f32.mrb[14].mxu1  ;;  %v4205_v31 = vld [vmem:[%s4780_s3 + $0xe4] ss:$16 sps:$4 sm:$0xff] (!%p3111_p6)   ;;  %v1164_v33 = vmax.f32 (!%p3111_p6), %v1162_v28, 0.0  ;;  %v1165_v34 = vmax.f32 (!%p3111_p6), %v1163_v29, 0.0 }
 0x170   : > { %v3352_v40 = vpop.f32.mrb[15].mxu0  ;;  %v3374_v46 = vpop.f32.mrb[15].mxu1  ;;  %1341 = vmatprep.subr.bf16.mxu0 (!%p3111_p6), %v4205_v31  ;;  %v1421_v38 = vld [vmem:[#allocation2 + $0x10] sm:$0xff] (!%p3111_p6) }
 0x171   : > { %v991_v43 = vmax.f32 %v935_v32, %v3350_v35  ;;  %v3353_v44 = vadd.f32 %v3352_v40, %v3351_v36  ;;  %v1052_v47 = vmax.f32 %v996_v37, %v3372_v41  ;;  %v3375_v48 = vadd.f32 %v3374_v46, %v3373_v42  ;;  %v4210_v32 = vld [vmem:[%s4780_s3 + $0xec] ss:$16 sps:$4 sm:$0xff] (!%p3111_p6)   ;;  %v4217_v35 = vld [vmem:[%s4780_s3 + $0xe0] ss:$16 sps:$4 sm:$0xff] (!%p3111_p6)   ;;  %v4222_v36 = vld [vmem:[%s4780_s3 + $0xe8] ss:$16 sps:$4 sm:$0xff] (!%p3111_p6)  }
 0x172   : > { %1384 = vmatprep.subr.bf16.mxu1 (!%p3111_p6), %v4210_v32  ;;  %v1166_v37 = vpack.c.bf16 (!%p3111_p6), %v1165_v34, %v1164_v33  ;;  %1342 = vmatpush1.bf16.msra.mxu0 (!%p3111_p6), %v4217_v35  ;;  %v1423_v40 = vadd.f32 (!%p3111_p6), %v4184_v24, %v1421_v38  ;;  %v1539_v46 = vld [vmem:[#allocation2 + $0x28] sm:$0xff] (!%p3111_p6)  ;;  %v1889_v34 = vld [vmem:[#allocation2 + $0x50] sm:$0xff] (!%p3111_p6) }
 0x173   : > { %993 = vst [vmem:[#allocation2 + $0x60] sm:$0xff] %v991_v43  ;;  %v992_v49 = vmax.f32 %v936_v39, %v3353_v44  ;;  %1054 = vst [vmem:[#allocation2 + $0x70] sm:$0xff] %v1052_v47  ;;  %v1053_v50 = vmax.f32 %v997_v45, %v3375_v48  ;;  %1385 = vmatpush1.bf16.msra.mxu1 (!%p3111_p6), %v4222_v36  ;;  %1428 = vmatprep.subr.bf16.mxu0 (!%p3111_p6), %v4030_v61  ;;  %v1422_v39 = vld [vmem:[#allocation2 + $0x18] sm:$0xff] (!%p3111_p6)  ;;  %v1538_v45 = vld [vmem:[#allocation2 + $0x20] sm:$0xff] (!%p3111_p6) }
 0x174   : > { %1471 = vmatprep.subr.bf16.mxu1 (!%p3111_p6), %v4035_v62  ;;  %v1424_v41 = vadd.f32 (!%p3111_p6), %v4184_v24, %v1422_v39  ;;  %v1425_v42 = vmax.f32 (!%p3111_p6), %v1423_v40, 0.0  ;;  %v1540_v47 = vadd.f32 (!%p3111_p6), %v4184_v24, %v1538_v45  ;;  %v1541_v48 = vadd.f32 (!%p3111_p6), %v4184_v24, %v1539_v46 }
 0x175   : > { %994 = vst [vmem:[#allocation2 + $0x68] sm:$0xff] %v992_v49  ;;  %1055 = vst [vmem:[#allocation2 + $0x78] sm:$0xff] %v1053_v50  ;;  %1360 = vmatmul.mubr.bf16.vlgmr.msra.gmra.mrb[0].mxu0 (!%p3111_p6), %v1166_v37  ;;  %v1891_v38 = vadd.f32 (!%p3111_p6), %v4184_v24, %v1889_v34 }
 0x176   : > { %1403 = vmatmul.mubr.bf16.vlgmr.msra.gmra.mrb[0].mxu1 (!%p3111_p6), %v1166_v37  ;;  %1429 = vmatpush1.bf16.msra.mxu0 (!%p3111_p6), %v4043_v0  ;;  %v1426_v43 = vmax.f32 (!%p3111_p6), %v1424_v41, 0.0  ;;  %v1542_v49 = vmax.f32 (!%p3111_p6), %v1540_v47, 0.0  ;;  %v1543_v50 = vmax.f32 (!%p3111_p6), %v1541_v48, 0.0  ;;  %v1890_v37 = vld [vmem:[#allocation2 + $0x58] sm:$0xff] (!%p3111_p6) }
 0x177   : > { %1472 = vmatpush1.bf16.msra.mxu1 (!%p3111_p6), %v4048_v1  ;;  %1430 = vmatprep.subr.bf16.mxu0 (!%p3111_p6), %v4054_v2  ;;  %v1892_v39 = vadd.f32 (!%p3111_p6), %v4184_v24, %v1890_v37  ;;  %v1893_v40 = vmax.f32 (!%p3111_p6), %v1891_v38, 0.0 }
 0x178   : > { %1473 = vmatprep.subr.bf16.mxu1 (!%p3111_p6), %v4061_v3  ;;  %1460 = vmatprep.mubr.bf16.mxu0 (!%p3111_p6), %v3693_v63  ;;  %v1427_v44 = vpack.c.bf16 (!%p3111_p6), %v1426_v43, %v1425_v42 }
 0x179   : > { %1503 = vmatprep.mubr.bf16.mxu1 (!%p3111_p6), %v3693_v63  ;;  %v1894_v41 = vmax.f32 (!%p3111_p6), %v1892_v39, 0.0 }
 0x17a   : > { %1431 = vmatpush1.bf16.msra.mxu0 (!%p3111_p6), %v4066_v4  ;;  %v2006_v43 = vld [vmem:[#allocation2 + $0x60] sm:$0xff] (!%p3111_p6) }
 0x17b   : > { %1474 = vmatpush1.bf16.msra.mxu1 (!%p3111_p6), %v4072_v5  ;;  %1432 = vmatprep.subr.bf16.mxu0 (!%p3111_p6), %v4078_v6  ;;  %v1895_v42 = vpack.c.bf16 (!%p3111_p6), %v1894_v41, %v1893_v40  ;;  %v2008_v45 = vadd.f32 (!%p3111_p6), %v4184_v24, %v2006_v43 }
 0x17c   : > { %1475 = vmatprep.subr.bf16.mxu1 (!%p3111_p6), %v4083_v7 }
 0x17d   : > { %v2010_v47 = vmax.f32 (!%p3111_p6), %v2008_v45, 0.0 }
 0x17e   : > { %1433 = vmatpush1.bf16.msra.mxu0 (!%p3111_p6), %v4088_v8 }
 0x17f   : > { %1476 = vmatpush1.bf16.msra.mxu1 (!%p3111_p6), %v4093_v9  ;;  %1434 = vmatprep.subr.bf16.mxu0 (!%p3111_p6), %v4100_v10 }
 0x180   : > { %1477 = vmatprep.subr.bf16.mxu1 (!%p3111_p6), %v4107_v11 }
 0x182   : > { %1435 = vmatpush1.bf16.msra.mxu0 (!%p3111_p6), %v4112_v12 }
 0x183   : > { %1478 = vmatpush1.bf16.msra.mxu1 (!%p3111_p6), %v4119_v13  ;;  %1436 = vmatprep.subr.bf16.mxu0 (!%p3111_p6), %v4124_v14 }
 0x184   : > { %1479 = vmatprep.subr.bf16.mxu1 (!%p3111_p6), %v4131_v15 }
 0x186   : > { %1437 = vmatpush1.bf16.msra.mxu0 (!%p3111_p6), %v4136_v16 }
 0x187   : > { %1480 = vmatpush1.bf16.msra.mxu1 (!%p3111_p6), %v4141_v17  ;;  %1438 = vmatprep.subr.bf16.mxu0 (!%p3111_p6), %v4148_v18 }
 0x188   : > { %1481 = vmatprep.subr.bf16.mxu1 (!%p3111_p6), %v4155_v19 }
 0x18a   : > { %1439 = vmatpush1.bf16.msra.mxu0 (!%p3111_p6), %v4160_v20 }
 0x18b   : > { %1482 = vmatpush1.bf16.msra.mxu1 (!%p3111_p6), %v4167_v21  ;;  %1440 = vmatprep.subr.bf16.mxu0 (!%p3111_p6), %v4172_v22 }
 0x18c   : > { %1483 = vmatprep.subr.bf16.mxu1 (!%p3111_p6), %v4179_v23 }
 0x18d   : > { %v3392_v51 = vpop.f32.mrb[16].mxu0 }
 0x18e   : > { %v3393_v53 = vpop.f32.mrb[17].mxu0  ;;  %1441 = vmatpush1.bf16.msra.mxu0 (!%p3111_p6), %v4189_v27 }
 0x18f   : > { %v3394_v54 = vadd.f32 %v3393_v53, %v3392_v51  ;;  %v3395_v55 = vpop.f32.mrb[18].mxu0  ;;  %1120 = sbr.rel (%p3111_p6) target bundleno = 1515 (0x5eb), region = 72  ;;  %1484 = vmatpush1.bf16.msra.mxu1 (!%p3111_p6), %v4198_v30  ;;  %1442 = vmatprep.subr.bf16.mxu0 (!%p3111_p6), %v4205_v31  ;;  %v1544_v51 = vpack.c.bf16 (!%p3111_p6), %v1543_v50, %v1542_v49  ;;  %v1656_v53 = vld [vmem:[#allocation2 + $0x38] sm:$0xff] (!%p3111_p6)  ;;  %v2123_v50 = vld [vmem:[#allocation2 + $0x70] sm:$0xff] (!%p3111_p6) }
 0x190   : > { %v3396_v57 = vpop.f32.mrb[19].mxu0  ;;  %1485 = vmatprep.subr.bf16.mxu1 (!%p3111_p6), %v4210_v32 }
 0x191   : > { %v1113_v58 = vmax.f32 %v1057_v52, %v3394_v54  ;;  %v3397_v59 = vadd.f32 %v3396_v57, %v3395_v55  ;;  %v1655_v52 = vld [vmem:[#allocation2 + $0x30] sm:$0xff] (!%p3111_p6)  ;;  %v1658_v55 = vadd.f32 (!%p3111_p6), %v4184_v24, %v1656_v53 }
 0x192   : > { %1443 = vmatpush1.bf16.msra.mxu0 (!%p3111_p6), %v4217_v35  ;;  %v1657_v54 = vadd.f32 (!%p3111_p6), %v4184_v24, %v1655_v52 }
 0x193   : > { %1115 = vst [vmem:[#allocation2 + $0x80] sm:$0xff] %v1113_v58  ;;  %v1114_v60 = vmax.f32 %v1058_v56, %v3397_v59  ;;  %1486 = vmatpush1.bf16.msra.mxu1 (!%p3111_p6), %v4222_v36  ;;  %1545 = vmatprep.subr.bf16.mxu0 (!%p3111_p6), %v4030_v61  ;;  %v1660_v57 = vmax.f32 (!%p3111_p6), %v1658_v55, 0.0  ;;  %v1772_v59 = vld [vmem:[#allocation2 + $0x40] sm:$0xff] (!%p3111_p6) }
 0x194   : > { %1588 = vmatprep.subr.bf16.mxu1 (!%p3111_p6), %v4035_v62  ;;  %v1659_v56 = vmax.f32 (!%p3111_p6), %v1657_v54, 0.0  ;;  %v1774_v25 = vadd.f32 (!%p3111_p6), %v4184_v24, %v1772_v59 }
 0x195   : > { %1116 = vst [vmem:[#allocation2 + $0x88] sm:$0xff] %v1114_v60  ;;  %1461 = vmatmul.mubr.bf16.vlgmr.msra.gmra.mrb[4].mxu0 (!%p3111_p6), %v1427_v44  ;;  %v1773_v60 = vld [vmem:[#allocation2 + $0x48] sm:$0xff] (!%p3111_p6) }
 0x196   : > { %1504 = vmatmul.mubr.bf16.vlgmr.msra.gmra.mrb[4].mxu1 %v1427_v44  ;;  %1546 = vmatpush1.bf16.msra.mxu0 %v4043_v0  ;;  %v1661_v58 = vpack.c.bf16 %v1660_v57, %v1659_v56  ;;  %v1775_v26 = vadd.f32 %v4184_v24, %v1773_v60  ;;  %v1776_v28 = vmax.f32 %v1774_v25, 0.0  ;;  %v2007_v44 = vld [vmem:[#allocation2 + $0x68] sm:$0xff]  ;;  %v2125_v56 = vadd.f32 %v4184_v24, %v2123_v50 }
 0x197   : > { %1589 = vmatpush1.bf16.msra.mxu1 %v4048_v1  ;;  %1547 = vmatprep.subr.bf16.mxu0 %v4054_v2  ;;  %v2009_v46 = vadd.f32 %v4184_v24, %v2007_v44 }
 0x198   : > { %1590 = vmatprep.subr.bf16.mxu1 %v4061_v3  ;;  %1577 = vmatprep.mubr.bf16.mxu0 %v3693_v63  ;;  %v1777_v29 = vmax.f32 %v1775_v26, 0.0  ;;  %v2127_v26 = vmax.f32 %v2125_v56, 0.0  ;;  %v3620_v56 = vld [vmem:[%s4782_s5 + $0x40] sm:$0xff]  }
 0x199   : > { %1620 = vmatprep.mubr.bf16.mxu1 %v3693_v63  ;;  %v2011_v48 = vmax.f32 %v2009_v46, 0.0 }
 0x19a   : > { %1548 = vmatpush1.bf16.msra.mxu0 %v4066_v4  ;;  %v1778_v33 = vpack.c.bf16 %v1777_v29, %v1776_v28 }
 0x19b   : > { %1591 = vmatpush1.bf16.msra.mxu1 %v4072_v5  ;;  %1549 = vmatprep.subr.bf16.mxu0 %v4078_v6  ;;  %v2012_v49 = vpack.c.bf16 %v2011_v48, %v2010_v47 }
 0x19c   : > { %1592 = vmatprep.subr.bf16.mxu1 %v4083_v7 }
 0x19e   : > { %1550 = vmatpush1.bf16.msra.mxu0 %v4088_v8 }
 0x19f   : > { %1593 = vmatpush1.bf16.msra.mxu1 %v4093_v9  ;;  %1551 = vmatprep.subr.bf16.mxu0 %v4100_v10 }
 0x1a0   : > { %1594 = vmatprep.subr.bf16.mxu1 %v4107_v11 }
 0x1a2   : > { %1552 = vmatpush1.bf16.msra.mxu0 %v4112_v12 }
 0x1a3   : > { %1595 = vmatpush1.bf16.msra.mxu1 %v4119_v13  ;;  %1553 = vmatprep.subr.bf16.mxu0 %v4124_v14 }
 0x1a4   : > { %1596 = vmatprep.subr.bf16.mxu1 %v4131_v15 }
 0x1a6   : > { %1554 = vmatpush1.bf16.msra.mxu0 %v4136_v16 }
 0x1a7   : > { %1597 = vmatpush1.bf16.msra.mxu1 %v4141_v17  ;;  %1555 = vmatprep.subr.bf16.mxu0 %v4148_v18 }
 0x1a8   : > { %1598 = vmatprep.subr.bf16.mxu1 %v4155_v19 }
 0x1aa   : > { %1556 = vmatpush1.bf16.msra.mxu0 %v4160_v20 }
 0x1ab   : > { %1599 = vmatpush1.bf16.msra.mxu1 %v4167_v21  ;;  %1557 = vmatprep.subr.bf16.mxu0 %v4172_v22 }
 0x1ac   : > { %1600 = vmatprep.subr.bf16.mxu1 %v4179_v23 }
 0x1ae   : > { %1558 = vmatpush1.bf16.msra.mxu0 %v4189_v27 }
 0x1af   : > { %1601 = vmatpush1.bf16.msra.mxu1 %v4198_v30  ;;  %1559 = vmatprep.subr.bf16.mxu0 %v4205_v31 }
 0x1b0   : > { %1602 = vmatprep.subr.bf16.mxu1 %v4210_v32 }
 0x1b2   : > { %1560 = vmatpush1.bf16.msra.mxu0 %v4217_v35 }
 0x1b3   : > { %1603 = vmatpush1.bf16.msra.mxu1 %v4222_v36  ;;  %1662 = vmatprep.subr.bf16.mxu0 %v4030_v61 }
 0x1b4   : > { %1705 = vmatprep.subr.bf16.mxu1 %v4035_v62 }
 0x1b5   : > { %1578 = vmatmul.mubr.bf16.vlgmr.msra.gmra.mrb[8].mxu0 %v1544_v51 }
 0x1b6   : > { %1621 = vmatmul.mubr.bf16.vlgmr.msra.gmra.mrb[8].mxu1 %v1544_v51  ;;  %1663 = vmatpush1.bf16.msra.mxu0 %v4043_v0  ;;  %v2124_v51 = vld [vmem:[#allocation2 + $0x78] sm:$0xff] }
 0x1b7   : > { %1706 = vmatpush1.bf16.msra.mxu1 %v4048_v1  ;;  %1664 = vmatprep.subr.bf16.mxu0 %v4054_v2  ;;  %v2126_v57 = vadd.f32 %v4184_v24, %v2124_v51 }
 0x1b8   : > { %1707 = vmatprep.subr.bf16.mxu1 %v4061_v3  ;;  %1694 = vmatprep.mubr.bf16.mxu0 %v3693_v63 }
 0x1b9   : > { %1737 = vmatprep.mubr.bf16.mxu1 %v3693_v63  ;;  %v2128_v28 = vmax.f32 %v2126_v57, 0.0  ;;  %v3621_v57 = vld [vmem:[%s4782_s5 + $0xc0] sm:$0xff]  }
 0x1ba   : > { %1665 = vmatpush1.bf16.msra.mxu0 %v4066_v4 }
 0x1bb   : > { %1708 = vmatpush1.bf16.msra.mxu1 %v4072_v5  ;;  %1666 = vmatprep.subr.bf16.mxu0 %v4078_v6  ;;  %v2129_v29 = vpack.c.bf16 %v2128_v28, %v2127_v26  ;;  %v3626_v26 = vld [vmem:[%s4782_s5 + $0x8] sm:$0xff]  }
 0x1bc   : > { %1709 = vmatprep.subr.bf16.mxu1 %v4083_v7  ;;  %v3627_v28 = vld [vmem:[%s4782_s5 + $0x88] sm:$0xff]  }
 0x1be   : > { %1667 = vmatpush1.bf16.msra.mxu0 %v4088_v8 }
 0x1bf   : > { %1710 = vmatpush1.bf16.msra.mxu1 %v4093_v9  ;;  %1668 = vmatprep.subr.bf16.mxu0 %v4100_v10 }
 0x1c0   : > { %1711 = vmatprep.subr.bf16.mxu1 %v4107_v11 }
 0x1c2   : > { %1669 = vmatpush1.bf16.msra.mxu0 %v4112_v12 }
 0x1c3   : > { %1712 = vmatpush1.bf16.msra.mxu1 %v4119_v13  ;;  %1670 = vmatprep.subr.bf16.mxu0 %v4124_v14 }
 0x1c4   : > { %1713 = vmatprep.subr.bf16.mxu1 %v4131_v15 }
 0x1c6   : > { %1671 = vmatpush1.bf16.msra.mxu0 %v4136_v16 }
 0x1c7   : > { %1714 = vmatpush1.bf16.msra.mxu1 %v4141_v17  ;;  %1672 = vmatprep.subr.bf16.mxu0 %v4148_v18 }
 0x1c8   : > { %1715 = vmatprep.subr.bf16.mxu1 %v4155_v19 }
 0x1ca   : > { %1673 = vmatpush1.bf16.msra.mxu0 %v4160_v20 }
 0x1cb   : > { %1716 = vmatpush1.bf16.msra.mxu1 %v4167_v21  ;;  %1674 = vmatprep.subr.bf16.mxu0 %v4172_v22 }
 0x1cc   : > { %1717 = vmatprep.subr.bf16.mxu1 %v4179_v23 }
 0x1ce   : > { %1675 = vmatpush1.bf16.msra.mxu0 %v4189_v27 }
 0x1cf   : > { %1718 = vmatpush1.bf16.msra.mxu1 %v4198_v30  ;;  %1676 = vmatprep.subr.bf16.mxu0 %v4205_v31 }
 0x1d0   : > { %1719 = vmatprep.subr.bf16.mxu1 %v4210_v32 }
 0x1d2   : > { %1677 = vmatpush1.bf16.msra.mxu0 %v4217_v35 }
 0x1d3   : > { %1720 = vmatpush1.bf16.msra.mxu1 %v4222_v36  ;;  %1779 = vmatprep.subr.bf16.mxu0 %v4030_v61 }
 0x1d4   : > { %1822 = vmatprep.subr.bf16.mxu1 %v4035_v62 }
 0x1d5   : > { %1695 = vmatmul.mubr.bf16.vlgmr.msra.gmra.mrb[12].mxu0 %v1661_v58 }
 0x1d6   : > { %1738 = vmatmul.mubr.bf16.vlgmr.msra.gmra.mrb[12].mxu1 %v1661_v58  ;;  %1780 = vmatpush1.bf16.msra.mxu0 %v4043_v0 }
 0x1d7   : > { %1823 = vmatpush1.bf16.msra.mxu1 %v4048_v1  ;;  %1781 = vmatprep.subr.bf16.mxu0 %v4054_v2 }
 0x1d8   : > { %1824 = vmatprep.subr.bf16.mxu1 %v4061_v3  ;;  %1811 = vmatprep.mubr.bf16.mxu0 %v3693_v63 }
 0x1d9   : > { %1854 = vmatprep.mubr.bf16.mxu1 %v3693_v63 }
 0x1da   : > { %1782 = vmatpush1.bf16.msra.mxu0 %v4066_v4 }
 0x1db   : > { %1825 = vmatpush1.bf16.msra.mxu1 %v4072_v5  ;;  %1783 = vmatprep.subr.bf16.mxu0 %v4078_v6 }
 0x1dc   : > { %1826 = vmatprep.subr.bf16.mxu1 %v4083_v7 }
 0x1de   : > { %1784 = vmatpush1.bf16.msra.mxu0 %v4088_v8 }
 0x1df   : > { %1827 = vmatpush1.bf16.msra.mxu1 %v4093_v9  ;;  %1785 = vmatprep.subr.bf16.mxu0 %v4100_v10 }
 0x1e0   : > { %1828 = vmatprep.subr.bf16.mxu1 %v4107_v11 }
 0x1e2   : > { %1786 = vmatpush1.bf16.msra.mxu0 %v4112_v12 }
 0x1e3   : > { %1829 = vmatpush1.bf16.msra.mxu1 %v4119_v13  ;;  %1787 = vmatprep.subr.bf16.mxu0 %v4124_v14 }
 0x1e4   : > { %1830 = vmatprep.subr.bf16.mxu1 %v4131_v15 }
 0x1e6   : > { %1788 = vmatpush1.bf16.msra.mxu0 %v4136_v16 }
 0x1e7   : > { %1831 = vmatpush1.bf16.msra.mxu1 %v4141_v17  ;;  %1789 = vmatprep.subr.bf16.mxu0 %v4148_v18 }
 0x1e8   : > { %1832 = vmatprep.subr.bf16.mxu1 %v4155_v19 }
 0x1ea   : > { %1790 = vmatpush1.bf16.msra.mxu0 %v4160_v20 }
 0x1eb   : > { %1833 = vmatpush1.bf16.msra.mxu1 %v4167_v21  ;;  %1791 = vmatprep.subr.bf16.mxu0 %v4172_v22 }
 0x1ec   : > { %1834 = vmatprep.subr.bf16.mxu1 %v4179_v23 }
 0x1ee   : > { %1792 = vmatpush1.bf16.msra.mxu0 %v4189_v27 }
 0x1ef   : > { %1835 = vmatpush1.bf16.msra.mxu1 %v4198_v30  ;;  %1793 = vmatprep.subr.bf16.mxu0 %v4205_v31 }
 0x1f0   : > { %1836 = vmatprep.subr.bf16.mxu1 %v4210_v32 }
 0x1f2   : > { %1794 = vmatpush1.bf16.msra.mxu0 %v4217_v35 }
 0x1f3   : > { %1837 = vmatpush1.bf16.msra.mxu1 %v4222_v36  ;;  %1896 = vmatprep.subr.bf16.mxu0 %v4030_v61 }
 0x1f4   : > { %1939 = vmatprep.subr.bf16.mxu1 %v4035_v62 }
 0x1f5   : > { %1812 = vmatmul.mubr.bf16.vlgmr.msra.gmra.mrb[16].mxu0 %v1778_v33 }
 0x1f6   : > { %1855 = vmatmul.mubr.bf16.vlgmr.msra.gmra.mrb[16].mxu1 %v1778_v33  ;;  %1897 = vmatpush1.bf16.msra.mxu0 %v4043_v0 }
 0x1f7   : > { %1940 = vmatpush1.bf16.msra.mxu1 %v4048_v1  ;;  %1898 = vmatprep.subr.bf16.mxu0 %v4054_v2 }
 0x1f8   : > { %1941 = vmatprep.subr.bf16.mxu1 %v4061_v3  ;;  %1928 = vmatprep.mubr.bf16.mxu0 %v3693_v63 }
 0x1f9   : > { %1971 = vmatprep.mubr.bf16.mxu1 %v3693_v63 }
 0x1fa   : > { %1899 = vmatpush1.bf16.msra.mxu0 %v4066_v4 }
 0x1fb   : > { %1942 = vmatpush1.bf16.msra.mxu1 %v4072_v5  ;;  %1900 = vmatprep.subr.bf16.mxu0 %v4078_v6 }
 0x1fc   : > { %1943 = vmatprep.subr.bf16.mxu1 %v4083_v7 }
 0x1fe   : > { %1901 = vmatpush1.bf16.msra.mxu0 %v4088_v8 }
 0x1ff   : > { %1944 = vmatpush1.bf16.msra.mxu1 %v4093_v9  ;;  %1902 = vmatprep.subr.bf16.mxu0 %v4100_v10 }
 0x200   : > { %1945 = vmatprep.subr.bf16.mxu1 %v4107_v11 }
 0x202   : > { %1903 = vmatpush1.bf16.msra.mxu0 %v4112_v12 }
 0x203   : > { %1946 = vmatpush1.bf16.msra.mxu1 %v4119_v13  ;;  %1904 = vmatprep.subr.bf16.mxu0 %v4124_v14 }
 0x204   : > { %1947 = vmatprep.subr.bf16.mxu1 %v4131_v15 }
 0x206   : > { %1905 = vmatpush1.bf16.msra.mxu0 %v4136_v16 }
 0x207   : > { %1948 = vmatpush1.bf16.msra.mxu1 %v4141_v17  ;;  %1906 = vmatprep.subr.bf16.mxu0 %v4148_v18 }
 0x208   : > { %1949 = vmatprep.subr.bf16.mxu1 %v4155_v19 }
 0x20a   : > { %1907 = vmatpush1.bf16.msra.mxu0 %v4160_v20 }
 0x20b   : > { %1950 = vmatpush1.bf16.msra.mxu1 %v4167_v21  ;;  %1908 = vmatprep.subr.bf16.mxu0 %v4172_v22 }
 0x20c   : > { %1951 = vmatprep.subr.bf16.mxu1 %v4179_v23 }
 0x20e   : > { %1909 = vmatpush1.bf16.msra.mxu0 %v4189_v27 }
 0x20f   : > { %1952 = vmatpush1.bf16.msra.mxu1 %v4198_v30  ;;  %1910 = vmatprep.subr.bf16.mxu0 %v4205_v31 }
 0x210   : > { %1953 = vmatprep.subr.bf16.mxu1 %v4210_v32 }
 0x212   : > { %1911 = vmatpush1.bf16.msra.mxu0 %v4217_v35 }
 0x213   : > { %1954 = vmatpush1.bf16.msra.mxu1 %v4222_v36  ;;  %2013 = vmatprep.subr.bf16.mxu0 %v4030_v61 }
 0x214   : > { %2056 = vmatprep.subr.bf16.mxu1 %v4035_v62 }
 0x215   : > { %1929 = vmatmul.mubr.bf16.vlgmr.msra.gmra.mrb[20].mxu0 %v1895_v42 }
 0x216   : > { %1972 = vmatmul.mubr.bf16.vlgmr.msra.gmra.mrb[20].mxu1 %v1895_v42  ;;  %2014 = vmatpush1.bf16.msra.mxu0 %v4043_v0 }
 0x217   : > { %2057 = vmatpush1.bf16.msra.mxu1 %v4048_v1  ;;  %2015 = vmatprep.subr.bf16.mxu0 %v4054_v2 }
 0x218   : > { %2058 = vmatprep.subr.bf16.mxu1 %v4061_v3  ;;  %2045 = vmatprep.mubr.bf16.mxu0 %v3693_v63 }
 0x219   : > { %2088 = vmatprep.mubr.bf16.mxu1 %v3693_v63 }
 0x21a   : > { %2016 = vmatpush1.bf16.msra.mxu0 %v4066_v4 }
 0x21b   : > { %2059 = vmatpush1.bf16.msra.mxu1 %v4072_v5  ;;  %2017 = vmatprep.subr.bf16.mxu0 %v4078_v6 }
 0x21c   : > { %2060 = vmatprep.subr.bf16.mxu1 %v4083_v7 }
 0x21e   : > { %2018 = vmatpush1.bf16.msra.mxu0 %v4088_v8 }
 0x21f   : > { %2061 = vmatpush1.bf16.msra.mxu1 %v4093_v9  ;;  %2019 = vmatprep.subr.bf16.mxu0 %v4100_v10 }
 0x220   : > { %2062 = vmatprep.subr.bf16.mxu1 %v4107_v11 }
 0x222   : > { %2020 = vmatpush1.bf16.msra.mxu0 %v4112_v12 }
 0x223   : > { %2063 = vmatpush1.bf16.msra.mxu1 %v4119_v13  ;;  %2021 = vmatprep.subr.bf16.mxu0 %v4124_v14 }
 0x224   : > { %2064 = vmatprep.subr.bf16.mxu1 %v4131_v15 }
 0x226   : > { %2022 = vmatpush1.bf16.msra.mxu0 %v4136_v16 }
 0x227   : > { %2065 = vmatpush1.bf16.msra.mxu1 %v4141_v17  ;;  %2023 = vmatprep.subr.bf16.mxu0 %v4148_v18 }
 0x228   : > { %2066 = vmatprep.subr.bf16.mxu1 %v4155_v19 }
 0x22a   : > { %2024 = vmatpush1.bf16.msra.mxu0 %v4160_v20 }
 0x22b   : > { %2067 = vmatpush1.bf16.msra.mxu1 %v4167_v21  ;;  %2025 = vmatprep.subr.bf16.mxu0 %v4172_v22 }
 0x22c   : > { %2068 = vmatprep.subr.bf16.mxu1 %v4179_v23 }
 0x22e   : > { %2026 = vmatpush1.bf16.msra.mxu0 %v4189_v27 }
 0x22f   : > { %2069 = vmatpush1.bf16.msra.mxu1 %v4198_v30  ;;  %2027 = vmatprep.subr.bf16.mxu0 %v4205_v31 }
 0x230   : > { %2070 = vmatprep.subr.bf16.mxu1 %v4210_v32 }
 0x232   : > { %2028 = vmatpush1.bf16.msra.mxu0 %v4217_v35 }
 0x233   : > { %2071 = vmatpush1.bf16.msra.mxu1 %v4222_v36  ;;  %2130 = vmatprep.subr.bf16.mxu0 %v4030_v61 }
 0x234   : > { %2173 = vmatprep.subr.bf16.mxu1 %v4035_v62 }
 0x235   : > { %2046 = vmatmul.mubr.bf16.vlgmr.msra.gmra.mrb[24].mxu0 %v2012_v49 }
 0x236   : > { %2089 = vmatmul.mubr.bf16.vlgmr.msra.gmra.mrb[24].mxu1 %v2012_v49  ;;  %2131 = vmatpush1.bf16.msra.mxu0 %v4043_v0 }
 0x237   : > { %2174 = vmatpush1.bf16.msra.mxu1 %v4048_v1  ;;  %2132 = vmatprep.subr.bf16.mxu0 %v4054_v2 }
 0x238   : > { %2175 = vmatprep.subr.bf16.mxu1 %v4061_v3  ;;  %2162 = vmatprep.mubr.bf16.mxu0 %v3693_v63 }
 0x239   : > { %2205 = vmatprep.mubr.bf16.mxu1 %v3693_v63 }
 0x23a   : > { %2133 = vmatpush1.bf16.msra.mxu0 %v4066_v4 }
 0x23b   : > { %2176 = vmatpush1.bf16.msra.mxu1 %v4072_v5  ;;  %2134 = vmatprep.subr.bf16.mxu0 %v4078_v6 }
 0x23c   : > { %2177 = vmatprep.subr.bf16.mxu1 %v4083_v7 }
 0x23e   : > { %2135 = vmatpush1.bf16.msra.mxu0 %v4088_v8 }
 0x23f   : > { %2178 = vmatpush1.bf16.msra.mxu1 %v4093_v9  ;;  %2136 = vmatprep.subr.bf16.mxu0 %v4100_v10 }
 0x240   : > { %2179 = vmatprep.subr.bf16.mxu1 %v4107_v11 }
 0x242   : > { %2137 = vmatpush1.bf16.msra.mxu0 %v4112_v12 }
 0x243   : > { %2180 = vmatpush1.bf16.msra.mxu1 %v4119_v13  ;;  %2138 = vmatprep.subr.bf16.mxu0 %v4124_v14 }
 0x244   : > { %2181 = vmatprep.subr.bf16.mxu1 %v4131_v15 }
 0x246   : > { %2139 = vmatpush1.bf16.msra.mxu0 %v4136_v16 }
 0x247   : > { %2182 = vmatpush1.bf16.msra.mxu1 %v4141_v17  ;;  %2140 = vmatprep.subr.bf16.mxu0 %v4148_v18 }
 0x248   : > { %2183 = vmatprep.subr.bf16.mxu1 %v4155_v19  ;;  %v4468_v52 = vpop.f32.mrb[0].mxu0 }
 0x249   : > { %v4470_v53 = vpop.f32.mrb[0].mxu1  ;;  %v4472_v54 = vpop.f32.mrb[1].mxu0 }
 0x24a   : > { %v4474_v55 = vpop.f32.mrb[1].mxu1  ;;  %v4478_v58 = vpop.f32.mrb[2].mxu0  ;;  %2141 = vmatpush1.bf16.msra.mxu0 %v4160_v20 }
 0x24b   : > { %v4480_v59 = vpop.f32.mrb[2].mxu1  ;;  %2184 = vmatpush1.bf16.msra.mxu1 %v4167_v21  ;;  %v4484_v60 = vpop.f32.mrb[3].mxu0  ;;  %2142 = vmatprep.subr.bf16.mxu0 %v4172_v22 }
 0x24c   : > { %v4486_v25 = vpop.f32.mrb[3].mxu1  ;;  %2185 = vmatprep.subr.bf16.mxu1 %v4179_v23 }
 0x24e   : > { %2143 = vmatpush1.bf16.msra.mxu0 %v4189_v27 }
 0x24f   : > { %2186 = vmatpush1.bf16.msra.mxu1 %v4198_v30  ;;  %2144 = vmatprep.subr.bf16.mxu0 %v4205_v31 }
 0x250   : > { %2187 = vmatprep.subr.bf16.mxu1 %v4210_v32 }
 0x252   : > { %2145 = vmatpush1.bf16.msra.mxu0 %v4217_v35 }
 0x253   : > { %2188 = vmatpush1.bf16.msra.mxu1 %v4222_v36  ;;  %2247 = vmatprep.subr.bf16.mxu0 %v4030_v61  ;;  %v2240_v61 = vld [vmem:[#allocation2 + $0x80] sm:$0xff] }
 0x254   : > { %2290 = vmatprep.subr.bf16.mxu1 %v4035_v62  ;;  %v2241_v62 = vld [vmem:[#allocation2 + $0x88] sm:$0xff] }
 0x255   : > { %2163 = vmatmul.mubr.bf16.vlgmr.msra.gmra.mrb[28].mxu0 %v2129_v29 }
 0x256   : > { %2206 = vmatmul.mubr.bf16.vlgmr.msra.gmra.mrb[28].mxu1 %v2129_v29  ;;  %2248 = vmatpush1.bf16.msra.mxu0 %v4043_v0  ;;  %v3628_v29 = vld [vmem:[%s4782_s5 + $0x50] sm:$0xff]  }
 0x257   : > { %2291 = vmatpush1.bf16.msra.mxu1 %v4048_v1  ;;  %2249 = vmatprep.subr.bf16.mxu0 %v4054_v2 }
 0x258   : > { %2292 = vmatprep.subr.bf16.mxu1 %v4061_v3  ;;  %2279 = vmatprep.mubr.bf16.mxu0 %v3693_v63 }
 0x259   : > { %2322 = vmatprep.mubr.bf16.mxu1 %v3693_v63 }
 0x25a   : > { %2250 = vmatpush1.bf16.msra.mxu0 %v4066_v4 }
 0x25b   : > { %2293 = vmatpush1.bf16.msra.mxu1 %v4072_v5  ;;  %2251 = vmatprep.subr.bf16.mxu0 %v4078_v6  ;;  %v2242_v5 = vadd.f32 %v4184_v24, %v2240_v61  ;;  %v2243_v6 = vadd.f32 %v4184_v24, %v2241_v62  ;;  %v3629_v61 = vld [vmem:[%s4782_s5 + $0xd0] sm:$0xff]  }
 0x25c   : > { %2294 = vmatprep.subr.bf16.mxu1 %v4083_v7  ;;  %v3630_v62 = vld [vmem:[%s4782_s5 + $0x10] sm:$0xff]  }
 0x25e   : > { %2252 = vmatpush1.bf16.msra.mxu0 %v4088_v8 }
 0x25f   : > { %2295 = vmatpush1.bf16.msra.mxu1 %v4093_v9  ;;  %2253 = vmatprep.subr.bf16.mxu0 %v4100_v10 }
 0x260   : > { %2296 = vmatprep.subr.bf16.mxu1 %v4107_v11 }
 0x262   : > { %2254 = vmatpush1.bf16.msra.mxu0 %v4112_v12 }
 0x263   : > { %2297 = vmatpush1.bf16.msra.mxu1 %v4119_v13  ;;  %2255 = vmatprep.subr.bf16.mxu0 %v4124_v14 }
 0x264   : > { %2298 = vmatprep.subr.bf16.mxu1 %v4131_v15 }
 0x266   : > { %2256 = vmatpush1.bf16.msra.mxu0 %v4136_v16 }
 0x267   : > { %2299 = vmatpush1.bf16.msra.mxu1 %v4141_v17  ;;  %2257 = vmatprep.subr.bf16.mxu0 %v4148_v18  ;;  %v2244_v17 = vmax.f32 %v2242_v5, 0.0  ;;  %v2245_v18 = vmax.f32 %v2243_v6, 0.0  ;;  %v3637_v5 = vld [vmem:[%s4782_s5 + $0xe0] sm:$0xff]  }
 0x268   : > { %2300 = vmatprep.subr.bf16.mxu1 %v4155_v19  ;;  %v1462_v63 = vpop.f32.mrb[4].mxu0  ;;  %v3638_v6 = vld [vmem:[%s4782_s5 + $0x20] sm:$0xff]  }
 0x269   : > { %v1505_v0 = vpop.f32.mrb[4].mxu1  ;;  %v1522_v1 = vmax.f32 %v4468_v52, %v1462_v63  ;;  %v1464_v3 = vpop.f32.mrb[5].mxu0  ;;  %v2246_v19 = vpack.c.bf16 %v2245_v18, %v2244_v17  ;;  %v3631_v63 = vld [vmem:[%s4782_s5 + $0x90] sm:$0xff]   ;;  %v3643_v17 = vld [vmem:[%s4782_s5 + $0xa8] sm:$0xff]  }
 0x26a   : > { %v1524_v2 = vmax.f32 %v4470_v53, %v1505_v0  ;;  %v1507_v4 = vpop.f32.mrb[5].mxu1  ;;  %v1523_v7 = vmax.f32 %v4472_v54, %v1464_v3  ;;  %v1466_v9 = vpop.f32.mrb[6].mxu0  ;;  %2258 = vmatpush1.bf16.msra.mxu0 %v4160_v20  ;;  %v3632_v0 = vld [vmem:[%s4782_s5 + $0x58] sm:$0xff]  }
 0x26b   : > { %v1525_v8 = vmax.f32 %v4474_v55, %v1507_v4  ;;  %v1509_v10 = vpop.f32.mrb[6].mxu1  ;;  %2301 = vmatpush1.bf16.msra.mxu1 %v4167_v21  ;;  %v1526_v11 = vmax.f32 %v4478_v58, %v1466_v9  ;;  %v1468_v13 = vpop.f32.mrb[7].mxu0  ;;  %2259 = vmatprep.subr.bf16.mxu0 %v4172_v22  ;;  %v3622_v58 = vld [vmem:[%s4782_s5] sm:$0xff]   ;;  %v3635_v3 = vld [vmem:[%s4782_s5 + $0x98] sm:$0xff]   ;;  %v3641_v9 = vld [vmem:[%s4782_s5 + $0xe8] sm:$0xff]  }
 0x26c   : > { %v1528_v12 = vmax.f32 %v4480_v59, %v1509_v10  ;;  %v1511_v14 = vpop.f32.mrb[7].mxu1  ;;  %2302 = vmatprep.subr.bf16.mxu1 %v4179_v23  ;;  %v1527_v15 = vmax.f32 %v4484_v60, %v1468_v13  ;;  %v3623_v59 = vld [vmem:[%s4782_s5 + $0x80] sm:$0xff]   ;;  %v3624_v60 = vld [vmem:[%s4782_s5 + $0x48] sm:$0xff]  }
 0x26d   : > { %v1529_v16 = vmax.f32 %v4486_v25, %v1511_v14  ;;  %v3625_v25 = vld [vmem:[%s4782_s5 + $0xc8] sm:$0xff]   ;;  %v3636_v4 = vld [vmem:[%s4782_s5 + $0x60] sm:$0xff]  }
 0x26e   : > { %2260 = vmatpush1.bf16.msra.mxu0 %v4189_v27 }
 0x26f   : > { %2303 = vmatpush1.bf16.msra.mxu1 %v4198_v30  ;;  %2261 = vmatprep.subr.bf16.mxu0 %v4205_v31 }
 0x270   : > { %2304 = vmatprep.subr.bf16.mxu1 %v4210_v32 }
 0x272   : > { %2262 = vmatpush1.bf16.msra.mxu0 %v4217_v35 }
 0x273   : > { %2305 = vmatpush1.bf16.msra.mxu1 %v4222_v36  ;;  %3398 = vmatprep.subr.bf16.mxu0 %v3620_v56 }
 0x274   : > { %3420 = vmatprep.subr.bf16.mxu1 %v3621_v57 }
 0x275   : > { %2280 = vmatmul.mubr.bf16.vlgmr.msra.gmra.mrb[32].mxu0 %v2246_v19 }
 0x276   : > { %2323 = vmatmul.mubr.bf16.vlgmr.msra.gmra.mrb[32].mxu1 %v2246_v19  ;;  %3399 = vmatpush3.bf16.msra.mxu0 %v3622_v58 }
 0x277   : > { %3421 = vmatpush3.bf16.msra.mxu1 %v3623_v59  ;;  %3400 = vmatprep.subr.bf16.mxu0 %v3624_v60 }
 0x278   : > { %3422 = vmatprep.subr.bf16.mxu1 %v3625_v25 }
 0x27a   : > { %3401 = vmatpush3.bf16.msra.mxu0 %v3626_v26 }
 0x27b   : > { %3423 = vmatpush3.bf16.msra.mxu1 %v3627_v28  ;;  %3402 = vmatprep.subr.bf16.mxu0 %v3628_v29 }
 0x27c   : > { %3424 = vmatprep.subr.bf16.mxu1 %v3629_v61 }
 0x27e   : > { %3403 = vmatpush3.bf16.msra.mxu0 %v3630_v62 }
 0x27f   : > { %3425 = vmatpush3.bf16.msra.mxu1 %v3631_v63  ;;  %3404 = vmatprep.subr.bf16.mxu0 %v3632_v0 }
 0x288   : > { %v1579_v20 = vpop.f32.mrb[8].mxu0 }
 0x289   : > { %v1622_v21 = vpop.f32.mrb[8].mxu1  ;;  %v4540_v22 = vmax.f32 %v1522_v1, %v1579_v20  ;;  %v1581_v24 = vpop.f32.mrb[9].mxu0  ;;  %v3633_v1 = vld [vmem:[%s4782_s5 + $0xd8] sm:$0xff]  }
 0x28a   : > { %v4542_v23 = vmax.f32 %v1524_v2, %v1622_v21  ;;  %v1624_v27 = vpop.f32.mrb[9].mxu1  ;;  %v4544_v30 = vmax.f32 %v1523_v7, %v1581_v24  ;;  %v1583_v32 = vpop.f32.mrb[10].mxu0  ;;  %v3634_v2 = vld [vmem:[%s4782_s5 + $0x18] sm:$0xff]   ;;  %3426 = vmatprep.subr.bf16.mxu1 %v3633_v1  ;;  %v3639_v7 = vld [vmem:[%s4782_s5 + $0xa0] sm:$0xff]  }
 0x28b   : > { %v4546_v31 = vmax.f32 %v1525_v8, %v1624_v27  ;;  %v1626_v33 = vpop.f32.mrb[10].mxu1  ;;  %v4548_v34 = vmax.f32 %v1526_v11, %v1583_v32  ;;  %v1585_v36 = vpop.f32.mrb[11].mxu0  ;;  %3405 = vmatpush3.bf16.msra.mxu0 %v3634_v2  ;;  %3427 = vmatpush3.bf16.msra.mxu1 %v3635_v3  ;;  %v3640_v8 = vld [vmem:[%s4782_s5 + $0x68] sm:$0xff]  }
 0x28c   : > { %v4550_v35 = vmax.f32 %v1528_v12, %v1626_v33  ;;  %v1628_v37 = vpop.f32.mrb[11].mxu1  ;;  %v4552_v38 = vmax.f32 %v1527_v15, %v1585_v36  ;;  %3406 = vmatprep.subr.bf16.mxu0 %v3636_v4  ;;  %3428 = vmatprep.subr.bf16.mxu1 %v3637_v5  ;;  %v3648_v36 = vld [vmem:[%s4782_s5 + $0x78] sm:$0xff]  }
 0x28d   : > { %v4554_v39 = vmax.f32 %v1529_v16, %v1628_v37  ;;  %v3642_v16 = vld [vmem:[%s4782_s5 + $0x28] sm:$0xff]   ;;  %v3649_v37 = vld [vmem:[%s4782_s5 + $0xf8] sm:$0xff]  }
 0x28f   : > { %3407 = vmatpush3.bf16.msra.mxu0 %v3638_v6  ;;  %3429 = vmatpush3.bf16.msra.mxu1 %v3639_v7 }
 0x290   : > { %3408 = vmatprep.subr.bf16.mxu0 %v3640_v8  ;;  %3430 = vmatprep.subr.bf16.mxu1 %v3641_v9 }
 0x293   : > { %3409 = vmatpush3.bf16.msra.mxu0 %v3642_v16  ;;  %3431 = vmatpush3.bf16.msra.mxu1 %v3643_v17 }
 0x2a8   : > { %v1696_v40 = vpop.f32.mrb[12].mxu0 }
 0x2a9   : > { %v1739_v41 = vpop.f32.mrb[12].mxu1  ;;  %v1756_v42 = vmax.f32 %v4540_v22, %v1696_v40  ;;  %v4558_v44 = vpop.f32.mrb[13].mxu0  ;;  %v3694_v40 = vmov 0.0  }
 0x2aa   : > { %v1758_v43 = vmax.f32 %v4542_v23, %v1739_v41  ;;  %v4560_v45 = vpop.f32.mrb[13].mxu1  ;;  %v1757_v46 = vmax.f32 %v4544_v30, %v4558_v44  ;;  %v4566_v48 = vpop.f32.mrb[14].mxu0  ;;  %v3644_v30 = vld [vmem:[%s4782_s5 + $0x70] sm:$0xff]  }
 0x2ab   : > { %v1759_v47 = vmax.f32 %v4546_v31, %v4560_v45  ;;  %v4568_v49 = vpop.f32.mrb[14].mxu1  ;;  %v1760_v50 = vmax.f32 %v4548_v34, %v4566_v48  ;;  %v4574_v52 = vpop.f32.mrb[15].mxu0  ;;  %v3645_v31 = vld [vmem:[%s4782_s5 + $0xf0] sm:$0xff]   ;;  %3410 = vmatprep.subr.bf16.mxu0 %v3644_v30 }
 0x2ac   : > { %v1762_v51 = vmax.f32 %v4550_v35, %v4568_v49  ;;  %v4576_v53 = vpop.f32.mrb[15].mxu1  ;;  %v1761_v54 = vmax.f32 %v4552_v38, %v4574_v52  ;;  %v3646_v34 = vld [vmem:[%s4782_s5 + $0x30] sm:$0xff]   ;;  %3432 = vmatprep.subr.bf16.mxu1 %v3645_v31  ;;  %v3650_v38 = vld [vmem:[%s4782_s5 + $0x38] sm:$0xff]  }
 0x2ad   : > { %v1763_v55 = vmax.f32 %v4554_v39, %v4576_v53  ;;  %v3647_v35 = vld [vmem:[%s4782_s5 + $0xb0] sm:$0xff]   ;;  %3411 = vmatpush3.bf16.msra.mxu0 %v3646_v34  ;;  %v3651_v39 = vld [vmem:[%s4782_s5 + $0xb8] sm:$0xff]  }
 0x2ae   : > { %3433 = vmatpush3.bf16.msra.mxu1 %v3647_v35  ;;  %3412 = vmatprep.subr.bf16.mxu0 %v3648_v36 }
 0x2af   : > { %3434 = vmatprep.subr.bf16.mxu1 %v3649_v37 }
 0x2b1   : > { %3413 = vmatpush3.bf16.msra.mxu0 %v3650_v38 }
 0x2b2   : > { %3435 = vmatpush3.bf16.msra.mxu1 %v3651_v39  ;;  %3460 = vmatprep.subr.bf16.mxu0 %v3694_v40 }
 0x2b3   : > { %3480 = vmatprep.subr.bf16.mxu1 %v3694_v40 }
 0x2c8   : > { %v1813_v10 = vpop.f32.mrb[16].mxu0 }
 0x2c9   : > { %v1856_v11 = vpop.f32.mrb[16].mxu1  ;;  %v1873_v12 = vmax.f32 %v1756_v42, %v1813_v10  ;;  %v1815_v14 = vpop.f32.mrb[17].mxu0 }
 0x2ca   : > { %v1875_v13 = vmax.f32 %v1758_v43, %v1856_v11  ;;  %v1858_v15 = vpop.f32.mrb[17].mxu1  ;;  %v1874_v18 = vmax.f32 %v1757_v46, %v1815_v14  ;;  %v1817_v20 = vpop.f32.mrb[18].mxu0 }
 0x2cb   : > { %v1876_v19 = vmax.f32 %v1759_v47, %v1858_v15  ;;  %v1860_v21 = vpop.f32.mrb[18].mxu1  ;;  %v1877_v22 = vmax.f32 %v1760_v50, %v1817_v20  ;;  %v1819_v24 = vpop.f32.mrb[19].mxu0 }
 0x2cc   : > { %v1879_v23 = vmax.f32 %v1762_v51, %v1860_v21  ;;  %v1862_v27 = vpop.f32.mrb[19].mxu1  ;;  %v1878_v32 = vmax.f32 %v1761_v54, %v1819_v24  ;;  %v2367_v21 = vlaneseq }
 0x2cd   : > { %v1880_v33 = vmax.f32 %v1763_v55, %v1862_v27  ;;  %v2365_v27 = vld [vmem:[%s4781_s4] sm:$0xf] }
 0x2e8   : > { %v1930_v41 = vpop.f32.mrb[20].mxu0 }
 0x2e9   : > { %v1973_v42 = vpop.f32.mrb[20].mxu1  ;;  %v1990_v43 = vmax.f32 %v1873_v12, %v1930_v41  ;;  %v1932_v45 = vpop.f32.mrb[21].mxu0 }
 0x2ea   : > { %v1992_v44 = vmax.f32 %v1875_v13, %v1973_v42  ;;  %v1975_v46 = vpop.f32.mrb[21].mxu1  ;;  %v1991_v47 = vmax.f32 %v1874_v18, %v1932_v45  ;;  %v1934_v49 = vpop.f32.mrb[22].mxu0 }
 0x2eb   : > { %v1993_v48 = vmax.f32 %v1876_v19, %v1975_v46  ;;  %v1977_v50 = vpop.f32.mrb[22].mxu1  ;;  %v1994_v51 = vmax.f32 %v1877_v22, %v1934_v49  ;;  %v1936_v53 = vpop.f32.mrb[23].mxu0  ;;  %v2368_v22 = vshrl.u32 %v2367_v21, 7  ;;  %v3145_v21 = vld [vmem:[%s4783_s6] ss:$0 sm:$0xff] }
 0x2ec   : > { %v1996_v52 = vmax.f32 %v1879_v23, %v1977_v50  ;;  %v1979_v54 = vpop.f32.mrb[23].mxu1  ;;  %v1995_v55 = vmax.f32 %v1878_v32, %v1936_v53 }
 0x2ed   : > { %v1997_v56 = vmax.f32 %v1880_v33, %v1979_v54  ;;  %v2369_v23 = vsub.s32 0, %v2368_v22  ;;  %v2377_v24 = vsub.s32 2, %v2368_v22  ;;  %v2373_v30 = vsub.s32 1, %v2368_v22 }
 0x2ee   : > { %v2381_v31 = vsub.s32 3, %v2368_v22 }
 0x2ef   : > { %v2370_v32 = vrot.slane %v2365_v27, %v2369_v23  ;;  %v2378_v33 = vrot.slane %v2365_v27, %v2377_v24  ;;  %v2374_v36 = vrot.slane %v2365_v27, %v2373_v30 }
 0x2f0   : > { %v2382_v37 = vrot.slane %v2365_v27, %v2381_v31 }
 0x308   : > { %v2047_v57 = vpop.f32.mrb[24].mxu0 }
 0x309   : > { %v2090_v58 = vpop.f32.mrb[24].mxu1  ;;  %v2107_v59 = vmax.f32 %v1990_v43, %v2047_v57  ;;  %v2049_v25 = vpop.f32.mrb[25].mxu0 }
 0x30a   : > { %v2109_v60 = vmax.f32 %v1992_v44, %v2090_v58  ;;  %v2092_v26 = vpop.f32.mrb[25].mxu1  ;;  %v2108_v28 = vmax.f32 %v1991_v47, %v2049_v25  ;;  %v2051_v61 = vpop.f32.mrb[26].mxu0 }
 0x30b   : > { %v2110_v29 = vmax.f32 %v1993_v48, %v2092_v26  ;;  %v2094_v62 = vpop.f32.mrb[26].mxu1  ;;  %v2111_v63 = vmax.f32 %v1994_v51, %v2051_v61  ;;  %v2053_v1 = vpop.f32.mrb[27].mxu0 }
 0x30c   : > { %v2113_v0 = vmax.f32 %v1996_v52, %v2094_v62  ;;  %v2096_v2 = vpop.f32.mrb[27].mxu1  ;;  %v2112_v3 = vmax.f32 %v1995_v55, %v2053_v1 }
 0x30d   : > { %v2114_v4 = vmax.f32 %v1997_v56, %v2096_v2 }
 0x328   : > { %v2164_v5 = vpop.f32.mrb[28].mxu0 }
 0x329   : > { %v2207_v6 = vpop.f32.mrb[28].mxu1  ;;  %v2224_v7 = vmax.f32 %v2107_v59, %v2164_v5  ;;  %v2166_v9 = vpop.f32.mrb[29].mxu0  ;;  %v3652_v5 = vld [vmem:[%s4784_s7] sm:$0xff]  }
 0x32a   : > { %v2226_v8 = vmax.f32 %v2109_v60, %v2207_v6  ;;  %v2209_v10 = vpop.f32.mrb[29].mxu1  ;;  %v2225_v11 = vmax.f32 %v2108_v28, %v2166_v9  ;;  %v2168_v13 = vpop.f32.mrb[30].mxu0  ;;  %v3653_v6 = vld [vmem:[%s4784_s7 + $0x8] sm:$0xff]   ;;  %v3656_v9 = vld [vmem:[%s4784_s7 + $0x20] sm:$0xff]  }
 0x32b   : > { %v2227_v12 = vmax.f32 %v2110_v29, %v2209_v10  ;;  %v2211_v14 = vpop.f32.mrb[30].mxu1  ;;  %v2228_v15 = vmax.f32 %v2111_v63, %v2168_v13  ;;  %v2170_v17 = vpop.f32.mrb[31].mxu0  ;;  %v3657_v10 = vld [vmem:[%s4784_s7 + $0x28] sm:$0xff]   ;;  %v3660_v13 = vld [vmem:[%s4786_s9] sm:$0xff]  }
 0x32c   : > { %v2230_v16 = vmax.f32 %v2113_v0, %v2211_v14  ;;  %v2213_v18 = vpop.f32.mrb[31].mxu1  ;;  %v2229_v19 = vmax.f32 %v2112_v3, %v2170_v17  ;;  %v3661_v14 = vld [vmem:[%s4786_s9 + $0x8] sm:$0xff]   ;;  %v3664_v17 = vld [vmem:[%s4786_s9 + $0x20] sm:$0xff]  }
 0x32d   : > { %v2231_v20 = vmax.f32 %v2114_v4, %v2213_v18  ;;  %v3665_v18 = vld [vmem:[%s4786_s9 + $0x28] sm:$0xff]  }
 0x348   : > { %v2281_v34 = vpop.f32.mrb[32].mxu0 }
 0x349   : > { %v2324_v35 = vpop.f32.mrb[32].mxu1  ;;  %v2341_v38 = vmax.f32 %v2224_v7, %v2281_v34  ;;  %v2283_v41 = vpop.f32.mrb[33].mxu0  ;;  %v3654_v7 = vld [vmem:[%s4784_s7 + $0x10] sm:$0xff]  }
 0x34a   : > { %v2343_v39 = vmax.f32 %v2226_v8, %v2324_v35  ;;  %v2326_v42 = vpop.f32.mrb[33].mxu1  ;;  %v2342_v43 = vmax.f32 %v2225_v11, %v2283_v41  ;;  %v2285_v45 = vpop.f32.mrb[34].mxu0  ;;  %v3655_v8 = vld [vmem:[%s4784_s7 + $0x18] sm:$0xff]   ;;  %v3658_v11 = vld [vmem:[%s4784_s7 + $0x30] sm:$0xff]  }
 0x34b   : > { %v2344_v44 = vmax.f32 %v2227_v12, %v2326_v42  ;;  %v2328_v46 = vpop.f32.mrb[34].mxu1  ;;  %v2387_v47 = vadd.f32 %v2370_v32, %v2341_v38  ;;  %v2345_v49 = vmax.f32 %v2228_v15, %v2285_v45  ;;  %v2287_v51 = vpop.f32.mrb[35].mxu0  ;;  %v3659_v12 = vld [vmem:[%s4784_s7 + $0x38] sm:$0xff]   ;;  %v3662_v15 = vld [vmem:[%s4786_s9 + $0x10] sm:$0xff]  }
 0x34c   : > { %v2389_v48 = vadd.f32 %v2378_v33, %v2343_v39  ;;  %v2347_v50 = vmax.f32 %v2230_v16, %v2328_v46  ;;  %v2330_v52 = vpop.f32.mrb[35].mxu1  ;;  %v2388_v53 = vadd.f32 %v2374_v36, %v2342_v43  ;;  %v2346_v55 = vmax.f32 %v2229_v19, %v2287_v51  ;;  %v3663_v16 = vld [vmem:[%s4786_s9 + $0x18] sm:$0xff]   ;;  %v3178_v46 = vld [vmem:[%s4785_s8] ss:$0 sm:$0xff] }
 0x34d   : > { %v2390_v54 = vadd.f32 %v2382_v37, %v2344_v44  ;;  %v2348_v56 = vmax.f32 %v2231_v20, %v2330_v52  ;;  %v2391_v57 = vadd.f32 %v2370_v32, %v2345_v49  ;;  %v2395_v25 = vmax.f32 %v2387_v47, 0.0  ;;  %v3666_v44 = vld [vmem:[%s4786_s9 + $0x30] sm:$0xff]   ;;  %v3667_v45 = vld [vmem:[%s4786_s9 + $0x38] sm:$0xff]  }
 0x34e   : > { %v2393_v58 = vadd.f32 %v2378_v33, %v2347_v50  ;;  %v2392_v59 = vadd.f32 %v2374_v36, %v2346_v55  ;;  %v2397_v26 = vmax.f32 %v2389_v48, 0.0  ;;  %v2396_v61 = vmax.f32 %v2388_v53, 0.0 }
 0x34f   : > { %v2394_v60 = vadd.f32 %v2382_v37, %v2348_v56  ;;  %v2399_v28 = vmax.f32 %v2391_v57, 0.0  ;;  %v2398_v62 = vmax.f32 %v2390_v54, 0.0 }
 0x350   : > { %v2401_v29 = vmax.f32 %v2393_v58, 0.0  ;;  %v2400_v63 = vmax.f32 %v2392_v59, 0.0 }
 0x351   : > { %v2402_v0 = vmax.f32 %v2394_v60, 0.0  ;;  %v2403_v1 = vpack.c.bf16 %v2399_v28, %v2395_v25 }
 0x352   : > { %v2405_v2 = vpack.c.bf16 %v2401_v29, %v2397_v26  ;;  %v2404_v3 = vpack.c.bf16 %v2400_v63, %v2396_v61 }
 0x353   : > { %v2406_v4 = vpack.c.bf16 %v2402_v0, %v2398_v62 }
 0x354   : > { %2702 = vmatprep.mubr.bf16.mxu0 %v2404_v3 }
 0x355   : > { %2743 = vmatprep.mubr.bf16.mxu1 %v2406_v4  ;;  %2703 = vmatmul.mubr.bf16.vlgmr.msra.gmra.mrb[36].mxu0 %v2403_v1 }
 0x356   : > { %2744 = vmatmul.mubr.bf16.vlgmr.msra.gmra.mrb[36].mxu1 %v2405_v2  ;;  %3461 = vmatpush3.bf16.msra.mxu0 %v3652_v5 }
 0x357   : > { %3462 = vmatprep.subr.bf16.mxu0 %v3694_v40  ;;  %3476 = vmatprep.mubr.msk.bf16.mxu0 %vm3695_vm0, %v3694_v40 }
 0x358   : > { %3496 = vmatprep.mubr.msk.bf16.mxu1 %vm3695_vm0, %v3694_v40  ;;  %3481 = vmatpush3.bf16.msra.mxu1 %v3660_v13 }
 0x359   : > { %3482 = vmatprep.subr.bf16.mxu1 %v3694_v40 }
 0x35a   : > { %3463 = vmatpush3.bf16.msra.mxu0 %v3653_v6 }
 0x35b   : > { %3464 = vmatprep.subr.bf16.mxu0 %v3694_v40 }
 0x35c   : > { %3483 = vmatpush3.bf16.msra.mxu1 %v3661_v14 }
 0x35d   : > { %3484 = vmatprep.subr.bf16.mxu1 %v3694_v40 }
 0x35e   : > { %3465 = vmatpush3.bf16.msra.mxu0 %v3654_v7 }
 0x35f   : > { %3466 = vmatprep.subr.bf16.mxu0 %v3694_v40 }
 0x360   : > { %3485 = vmatpush3.bf16.msra.mxu1 %v3662_v15 }
 0x361   : > { %3486 = vmatprep.subr.bf16.mxu1 %v3694_v40 }
 0x362   : > { %3467 = vmatpush3.bf16.msra.mxu0 %v3655_v8 }
 0x363   : > { %3468 = vmatprep.subr.bf16.mxu0 %v3694_v40 }
 0x364   : > { %3487 = vmatpush3.bf16.msra.mxu1 %v3663_v16 }
 0x365   : > { %3488 = vmatprep.subr.bf16.mxu1 %v3694_v40 }
 0x366   : > { %3469 = vmatpush3.bf16.msra.mxu0 %v3656_v9 }
 0x367   : > { %3470 = vmatprep.subr.bf16.mxu0 %v3694_v40 }
 0x368   : > { %3489 = vmatpush3.bf16.msra.mxu1 %v3664_v17 }
 0x369   : > { %3490 = vmatprep.subr.bf16.mxu1 %v3694_v40 }
 0x36a   : > { %3471 = vmatpush3.bf16.msra.mxu0 %v3657_v10 }
 0x36b   : > { %3472 = vmatprep.subr.bf16.mxu0 %v3694_v40 }
 0x36c   : > { %3491 = vmatpush3.bf16.msra.mxu1 %v3665_v18 }
 0x36d   : > { %3492 = vmatprep.subr.bf16.mxu1 %v3694_v40 }
 0x36e   : > { %3473 = vmatpush3.bf16.msra.mxu0 %v3658_v11 }
 0x36f   : > { %3474 = vmatprep.subr.bf16.mxu0 %v3694_v40 }
 0x370   : > { %3493 = vmatpush3.bf16.msra.mxu1 %v3666_v44 }
 0x371   : > { %3494 = vmatprep.subr.bf16.mxu1 %v3694_v40  ;;  %v3187_v40 = vld [vmem:[%s4787_s10] ss:$0 sm:$0xff] }
 0x372   : > { %3475 = vmatpush3.bf16.msra.mxu0 %v3659_v12 }
 0x374   : > { %3495 = vmatpush3.bf16.msra.mxu1 %v3667_v45 }
 0x428   : > { %v3414_v19 = vpop.f32.mrb[36].mxu0 }
 0x429   : > { %v3436_v20 = vpop.f32.mrb[36].mxu1  ;;  %v3415_v22 = vpop.f32.mrb[37].mxu0 }
 0x42a   : > { %v3437_v23 = vpop.f32.mrb[37].mxu1  ;;  %v3416_v24 = vadd.f32 %v3415_v22, %v3414_v19  ;;  %v3417_v30 = vpop.f32.mrb[38].mxu0 }
 0x42b   : > { %v3438_v27 = vadd.f32 %v3437_v23, %v3436_v20  ;;  %v3439_v31 = vpop.f32.mrb[38].mxu1  ;;  %v3418_v32 = vpop.f32.mrb[39].mxu0 }
 0x42c   : > { %v3440_v33 = vpop.f32.mrb[39].mxu1  ;;  %v2705_v34 = vadd.f32 %v3416_v24, %v3145_v21  ;;  %v3419_v35 = vadd.f32 %v3418_v32, %v3417_v30 }
 0x42d   : > { %v3441_v36 = vadd.f32 %v3440_v33, %v3439_v31 }
 0x42e   : > { %v2746_v37 = vadd.f32 %v3438_v27, %v2705_v34  ;;  %v2708_v38 = vadd.f32 %v3419_v35, %v3145_v21 }
 0x430   : > { %v2749_v39 = vadd.f32 %v3441_v36, %v2708_v38  ;;  %v2752_v41 = vmax.f32 %v2746_v37, 0.0 }
 0x432   : > { %v2753_v42 = vmax.f32 %v2749_v39, 0.0 }
 0x434   : > { %v2754_v43 = vpack.c.bf16 %v2753_v42, %v2752_v41 }
 0x436   : > { %3477 = vmatmul.mubr.bf16.vlgmr.msra.gmra.mrb[40].mxu0 %v2754_v43 }
 0x509   : > { %v2860_v47 = vpop.f32.mrb[40].mxu0 }
 0x50a   : > { %v2861_v48 = vadd.f32 %v3178_v46, %v2860_v47  ;;  %v3478_v49 = vpop.f32.mrb[41].mxu0 }
 0x50b   : > { %v2863_v50 = vpop.f32.mrb[42].mxu0 }
 0x50c   : > { %v2864_v51 = vadd.f32 %v3178_v46, %v2863_v50  ;;  %v3479_v52 = vpop.f32.mrb[43].mxu0  ;;  %v2867_v53 = vmax.f32 %v2861_v48, 0.0 }
 0x50e   : > { %v2868_v54 = vmax.f32 %v2864_v51, 0.0 }
 0x510   : > { %v2869_v55 = vpack.c.bf16 %v2868_v54, %v2867_v53 }
 0x512   : > { %3497 = vmatmul.mubr.bf16.vlgmr.msra.gmra.mrb[40].mxu1 %v2869_v55 }
 0x5e5   : > { %v2975_v56 = vpop.f32.mrb[40].mxu1 }
 0x5e6   : > { %v2976_v57 = vadd.f32 %v3187_v40, %v2975_v56  ;;  %v3498_v58 = vpop.f32.mrb[41].mxu1 }
 0x5e7   : > { %v2978_v59 = vpop.f32.mrb[42].mxu1 }
 0x5e8   : > { %2982 = vst [vmem:[%s4788_s11] sm:$0xff] %v2976_v57  ;;  %v2979_v60 = vadd.f32 %v3187_v40, %v2978_v59  ;;  %v3499_v25 = vpop.f32.mrb[43].mxu1 }
 0x5ea   : > { %2983 = vst [vmem:[%s4788_s11 + $0x8] sm:$0xff] %v2979_v60 }
 0x5eb PF: > { %s21_s19 = sadd.s32 1, %s3690_s19   ;;  %s4789_s17 = smov %s3686_s18 }
 0x5ec   : > { %p18_p7 = scmp.ge.s32.totalorder %s21_s19, 11   ;;  %s4790_s18 = smov %s4792_s20 }
 0x5ee   :  { %20 = sbr.rel (!%p18_p7) target bundleno = 2 (0x2), region = 118 }

</bundles_post_ra>
